<compile_context>
chip_gen: v6e
topology: v6e:2x2x1
jax: 0.10.0
libtpu: 0.0.40
codegen_flags: <defaults>
</compile_context>

<pallas_src>
import functools
import math

import jax
import jax.numpy as jnp
from jax import lax
from jax.experimental import pallas as pl
from jax.experimental.pallas import tpu as pltpu

EMBED = 32      # embed_size
HEADS = 4       # n_heads
HEAD_DIM = EMBED // HEADS


def freq_attention_kernel(xf_ref, qp_ref, vp_ref, out_ref):
    # xf_ref : (Bt, 2, F)   rfft of the scalar input; row 0 = real, row 1 = imag (F on lanes)
    # qp_ref : (3, 2, 3E)   [0] = w_proj @ W_qkv, [1] = sqrt(M) * b_proj @ W_qkv (imag row = 0),
    #                       [2] = in_proj bias — each stacked (real, imag)
    # vp_ref : (2, E+1)     [:, :E] = W_o @ w1 per component, [:, E] = b_o @ w1 (scalar)
    # out_ref: (Bt, 2, F)   projected complex spectrum (real row, imag row), lane-dense
    Bt, _, F = xf_ref.shape
    E = qp_ref.shape[2] // 3
    BC = Bt * 2            # batch x {real, imag} folded into one in-kernel batch axis

    x = xf_ref[...]                                  # (Bt, 2, F)
    wq = qp_ref[0]                                   # (2, 3E)
    bdc = qp_ref[1]                                  # (2, 3E)  (already * sqrt(M); imag row 0)
    bq = qp_ref[2]                                   # (2, 3E)
    c = vp_ref[:, :E]                                # (2, E)   out_proj·proj1 fold per component
    d = vp_ref[:, E:]                                # (2, 1)   bias of that fold

    # DC-bin mask on the frequency (lane) axis — the proj bias only survives in bin 0.
    k_is_dc = (lax.broadcasted_iota(jnp.int32, (1, F), 1) == 0).astype(jnp.float32)
    k_is_dc = k_is_dc[None, None]                    # (1, 1, 1, F)

    # Rank-1 QKV "projection": pure VPU broadcast outer-product, no MXU matmul.
    qkv = (x[:, :, None, :] * wq[None, :, :, None]
           + k_is_dc * bdc[None, :, :, None]
           + bq[None, :, :, None])                   # (Bt, 2, 3E, F)

    # Fold out_proj·proj1 into V before the head loop (c differs per real/imag component).
    v4 = qkv[:, :, 2 * E:3 * E, :] * c[None, :, :, None]      # (Bt, 2, E, F)

    q = qkv[:, :, 0:E, :].reshape(BC, E, F)
    k = qkv[:, :, E:2 * E, :].reshape(BC, E, F)
    v = v4.reshape(BC, E, F)

    scale = 1.0 / math.sqrt(HEAD_DIM)
    acc = jnp.zeros((BC, 1, F), jnp.float32)

    # Static unroll over the 4 heads, accumulating a single lane-dense (1, F) row per batch.
    # Head slices are (Dh=8, F) sublane-aligned views -> free (no XLU shuffles, no concat).
    for hh in range(HEADS):
        sl = slice(hh * HEAD_DIM, (hh + 1) * HEAD_DIM)
        qh, kh, vh = q[:, sl, :], k[:, sl, :], v[:, sl, :]              # (BC, Dh, F)
        s = jnp.einsum('zdq,zdk->zqk', qh, kh,
                       preferred_element_type=jnp.float32) * scale      # (BC, F, F)
        s = s - jnp.max(s, axis=-1, keepdims=True)
        p = jnp.exp(s)
        p = p * pl.reciprocal(jnp.sum(p, axis=-1, keepdims=True), approx=True)
        vproj = jnp.sum(vh, axis=1, keepdims=True)                      # (BC, 1, F) (c-scaled V)
        acc = acc + jnp.einsum('zuk,zqk->zuq', vproj, p,
                               preferred_element_type=jnp.float32)      # (BC, 1, F)

    out_ref[...] = acc.reshape(Bt, 2, F) + d[None, :, :]                # one contiguous store


def _pick_batch_block(B):
    """Largest divisor of B that is <= 8, preferring >= 2 grid steps (v7x has 2 TensorCores)."""
    divs = [t for t in range(1, B + 1) if B % t == 0 and t <= 8]
    multi = [t for t in divs if B // t >= 2]
    return max(multi) if multi else max(divs)


def freq_attention_forward(x, params):
    """x: (B, N, D) float32 -> (B, N, D) float32.  (D must be 1, as in the torch module.)"""
    B, N, D = x.shape
    if D != 1:
        raise ValueError("FreqAttention's final .view(B, N, D) is only valid for D == 1")
    M = N * D
    F = M // 2 + 1
    E = EMBED

    # TODO(synk): rfft/irfft have no Pallas TPU primitive; they run via jnp.fft in the wrapper,
    # but thanks to the proj/proj1 folds they only touch (B, M) scalar sequences, not (B, M, E).
    x_seq = x.reshape(B, M).astype(jnp.float32)
    xf = jnp.fft.rfft(x_seq, axis=1, norm="ortho")                       # (B, F) complex64
    xf_ri = jnp.stack([jnp.real(xf), jnp.imag(xf)], axis=1)              # (B, 2, F) lane-dense

    # ---- host-side parameter folds (exact linear re-associations) ----
    wq = jnp.concatenate([params["w_proj"] @ params["wqkv_r"],
                          params["w_proj"] @ params["wqkv_i"]], axis=0)            # (2, 3E)
    bdc = jnp.concatenate([math.sqrt(M) * (params["b_proj"] @ params["wqkv_r"]),
                           jnp.zeros((1, 3 * E), jnp.float32)], axis=0)            # (2, 3E)
    bq = jnp.concatenate([params["bqkv_r"], params["bqkv_i"]], axis=0)             # (2, 3E)
    qkv_params = jnp.stack([wq, bdc, bq], axis=0)                                  # (3, 2, 3E)

    c_r = params["wo_r"] @ params["w1"][0]                                         # (E,)
    c_i = params["wo_i"] @ params["w1"][0]
    d_r = jnp.sum(params["bo_r"][0] * params["w1"][0])
    d_i = jnp.sum(params["bo_i"][0] * params["w1"][0])
    vec_params = jnp.stack([jnp.concatenate([c_r, d_r[None]]),
                            jnp.concatenate([c_i, d_i[None]])], axis=0)            # (2, E+1)

    Bt = _pick_batch_block(B)
    grid = (B // Bt,)

    out = pl.pallas_call(
        freq_attention_kernel,
        out_shape=jax.ShapeDtypeStruct((B, 2, F), jnp.float32),
        grid=grid,
        in_specs=[
            pl.BlockSpec((Bt, 2, F), lambda b: (b, 0, 0)),        # streamed spectra
            pl.BlockSpec((3, 2, 3 * E), lambda b: (0, 0, 0)),     # folded QKV params (resident)
            pl.BlockSpec((2, E + 1), lambda b: (0, 0)),           # folded out-proj params (resident)
        ],
        out_specs=pl.BlockSpec((Bt, 2, F), lambda b: (b, 0, 0)),
        compiler_params=pltpu.CompilerParams(dimension_semantics=("parallel",)),
    )(xf_ri, qkv_params, vec_params)

    xp = lax.complex(out[:, 0, :], out[:, 1, :])                          # (B, F)
    y = jnp.fft.irfft(xp, n=N, axis=1, norm="ortho") + params["b1"][0]    # (B, N)
    return y.reshape(B, N, D)


def init_params(key, embed=EMBED):
    """Synthetic deterministic parameters (same layout used by kernel and reference)."""
    ks = jax.random.split(key, 12)
    u = lambda k, shape, bound: jax.random.uniform(k, shape, jnp.float32, -bound, bound)
    xb = math.sqrt(6.0 / (embed + 3 * embed))     # xavier-ish for in_proj
    ob = 1.0 / math.sqrt(embed)
    return {
        "w_proj": u(ks[0], (1, embed), 1.0),      # Linear(1, E) weight (transposed)
        "b_proj": u(ks[1], (1, embed), 0.1),
        "wqkv_r": u(ks[2], (embed, 3 * embed), xb), "bqkv_r": u(ks[3], (1, 3 * embed), 0.1),
        "wo_r":   u(ks[4], (embed, embed), ob),     "bo_r":   u(ks[5], (1, embed), 0.1),
        "wqkv_i": u(ks[6], (embed, 3 * embed), xb), "bqkv_i": u(ks[7], (1, 3 * embed), 0.1),
        "wo_i":   u(ks[8], (embed, embed), ob),     "bo_i":   u(ks[9], (1, embed), 0.1),
        "w1":     u(ks[10], (1, embed), ob),        "b1":     u(ks[11], (1,), ob),
    }


def _mha_reference(x, wqkv, bqkv, wo, bo):
    """batch_first nn.MultiheadAttention self-attention (no mask/dropout), with
    in_proj_weight = wqkv.T, in_proj_bias = bqkv[0], out_proj.weight = wo.T, out_proj.bias = bo[0]."""
    b, f, e = x.shape
    qkv = jnp.einsum("bfe,ek->bfk", x, wqkv) + bqkv[0]
    q, k, v = qkv[..., :e], qkv[..., e:2 * e], qkv[..., 2 * e:]
    q = q.reshape(b, f, HEADS, HEAD_DIM)
    k = k.reshape(b, f, HEADS, HEAD_DIM)
    v = v.reshape(b, f, HEADS, HEAD_DIM)
    s = jnp.einsum("bqhd,bkhd->bhqk", q, k) / math.sqrt(HEAD_DIM)
    p = jax.nn.softmax(s, axis=-1)
    o = jnp.einsum("bhqk,bkhd->bqhd", p, v).reshape(b, f, e)
    return jnp.einsum("bfe,ek->bfk", o, wo) + bo[0]


def freq_attention_reference(x, params):
    """Pure-JAX reference that mirrors the PyTorch forward literally (no folds)."""
    B, N, D = x.shape
    M = N * D
    h = x.reshape(B, M, 1) * params["w_proj"][None] + params["b_proj"][None]   # (B, M, E)
    xf = jnp.fft.rfft(h, axis=1, norm="ortho")                                 # (B, F, E)
    zr = _mha_reference(jnp.real(xf), params["wqkv_r"], params["bqkv_r"],
                        params["wo_r"], params["bo_r"])
    zi = _mha_reference(jnp.imag(xf), params["wqkv_i"], params["bqkv_i"],
                        params["wo_i"], params["bo_i"])
    xo = jnp.fft.irfft(lax.complex(zr, zi), n=N, axis=1, norm="ortho")         # (B, N, E)
    y = jnp.einsum("bne,e->bn", xo, params["w1"][0]) + params["b1"][0]
    return y.reshape(B, N, D)


if __name__ == "__main__":
    key = jax.random.PRNGKey(0)
    k_x, k_p = jax.random.split(key)

    # The torch module's final .view(B, N, D) requires D == 1; M = N*D = 128, F = 65.
    B, N, D = 4, 128, 1
    x = jax.random.normal(k_x, (B, N, D), dtype=jnp.float32)
    params = init_params(k_p)

    fwd = jax.jit(freq_attention_forward)
    out = jax.block_until_ready(fwd(x, params))
    ref = freq_attention_reference(x, params)

    assert out.shape == (B, N, D)
    max_err = float(jnp.max(jnp.abs(out - ref)))
    assert jnp.allclose(out, ref, atol=5e-3, rtol=5e-3), max_err

    print("KERNEL_OK")
</pallas_src>

<mosaic_0001>
module attributes {stable_mosaic.version = 11 : i64} {
  func.func @freq_attention_kernel(%arg0: i32, %arg1: memref<2x2x65xf32, #tpu.memory_space<vmem>>, %arg2: memref<3x2x96xf32, #tpu.memory_space<vmem>>, %arg3: memref<2x33xf32, #tpu.memory_space<vmem>>, %arg4: memref<2x2x65xf32, #tpu.memory_space<vmem>>) attributes {dimension_semantics = [#tpu.dimension_semantics<parallel>], iteration_bounds = array<i64: 2>, scalar_prefetch = 0 : i64, scratch_operands = 0 : i64, tpu.core_type = #tpu.core_type<tc>, window_params = [{transform_indices = @transform_0, window_bounds = array<i64: 2, 2, 65>}, {pipeline_mode = #tpu.pipeline_mode<synchronous>, transform_indices = @transform_1, window_bounds = array<i64: 3, 2, 96>}, {pipeline_mode = #tpu.pipeline_mode<synchronous>, transform_indices = @transform_2, window_bounds = array<i64: 2, 33>}, {transform_indices = @transform_3, window_bounds = array<i64: 2, 2, 65>}]} {
    %c0 = arith.constant 0 : index
    %c0_0 = arith.constant 0 : index
    %c0_1 = arith.constant 0 : index
    %0 = vector.load %arg1[%c0, %c0_0, %c0_1] : memref<2x2x65xf32, #tpu.memory_space<vmem>>, vector<2x2x65xf32>
    %c0_2 = arith.constant 0 : index
    %c0_3 = arith.constant 0 : index
    %c0_4 = arith.constant 0 : index
    %1 = vector.load %arg2[%c0_2, %c0_3, %c0_4] : memref<3x2x96xf32, #tpu.memory_space<vmem>>, vector<1x2x96xf32>
    %2 = vector.shape_cast %1 : vector<1x2x96xf32> to vector<2x96xf32>
    %c1 = arith.constant 1 : index
    %c0_5 = arith.constant 0 : index
    %c0_6 = arith.constant 0 : index
    %3 = vector.load %arg2[%c1, %c0_5, %c0_6] : memref<3x2x96xf32, #tpu.memory_space<vmem>>, vector<1x2x96xf32>
    %4 = vector.shape_cast %3 : vector<1x2x96xf32> to vector<2x96xf32>
    %c2 = arith.constant 2 : index
    %c0_7 = arith.constant 0 : index
    %c0_8 = arith.constant 0 : index
    %5 = vector.load %arg2[%c2, %c0_7, %c0_8] : memref<3x2x96xf32, #tpu.memory_space<vmem>>, vector<1x2x96xf32>
    %6 = vector.shape_cast %5 : vector<1x2x96xf32> to vector<2x96xf32>
    %c0_9 = arith.constant 0 : index
    %c0_10 = arith.constant 0 : index
    %7 = vector.load %arg3[%c0_9, %c0_10] : memref<2x33xf32, #tpu.memory_space<vmem>>, vector<2x32xf32>
    %c0_11 = arith.constant 0 : index
    %c32 = arith.constant 32 : index
    %8 = vector.load %arg3[%c0_11, %c32] : memref<2x33xf32, #tpu.memory_space<vmem>>, vector<2x1xf32>
    %9 = tpu.iota {dimensions = array<i32: 1>} : vector<1x65xi32>
    %c0_i32 = arith.constant 0 : i32
    %10 = vector.broadcast %c0_i32 : i32 to vector<1x65xi32>
    %11 = arith.cmpi eq, %9, %10 : vector<1x65xi32>
    %12 = arith.extui %11 : vector<1x65xi1> to vector<1x65xi32>
    %13 = arith.sitofp %12 : vector<1x65xi32> to vector<1x65xf32>
    %14 = vector.shape_cast %13 : vector<1x65xf32> to vector<1x1x1x65xf32>
    %15 = vector.shape_cast %0 : vector<2x2x65xf32> to vector<2x2x1x65xf32>
    %16 = vector.shape_cast %2 : vector<2x96xf32> to vector<1x2x96x1xf32>
    %17 = vector.broadcast %15 : vector<2x2x1x65xf32> to vector<2x2x96x65xf32>
    %18 = vector.broadcast %16 : vector<1x2x96x1xf32> to vector<2x2x96x65xf32>
    %19 = arith.mulf %17, %18 : vector<2x2x96x65xf32>
    %20 = vector.shape_cast %4 : vector<2x96xf32> to vector<1x2x96x1xf32>
    %21 = vector.broadcast %14 : vector<1x1x1x65xf32> to vector<1x2x96x65xf32>
    %22 = vector.broadcast %20 : vector<1x2x96x1xf32> to vector<1x2x96x65xf32>
    %23 = arith.mulf %21, %22 : vector<1x2x96x65xf32>
    %24 = vector.broadcast %23 : vector<1x2x96x65xf32> to vector<2x2x96x65xf32>
    %25 = arith.addf %19, %24 : vector<2x2x96x65xf32>
    %26 = vector.shape_cast %6 : vector<2x96xf32> to vector<1x2x96x1xf32>
    %27 = vector.broadcast %26 : vector<1x2x96x1xf32> to vector<2x2x96x65xf32>
    %28 = arith.addf %25, %27 : vector<2x2x96x65xf32>
    %29 = vector.extract_strided_slice %28 {offsets = [0, 0, 64, 0], sizes = [2, 2, 32, 65], strides = [1, 1, 1, 1]} : vector<2x2x96x65xf32> to vector<2x2x32x65xf32>
    %30 = vector.shape_cast %7 : vector<2x32xf32> to vector<1x2x32x1xf32>
    %31 = vector.broadcast %30 : vector<1x2x32x1xf32> to vector<2x2x32x65xf32>
    %32 = arith.mulf %29, %31 : vector<2x2x32x65xf32>
    %33 = vector.extract_strided_slice %28 {offsets = [0, 0, 0, 0], sizes = [2, 2, 32, 65], strides = [1, 1, 1, 1]} : vector<2x2x96x65xf32> to vector<2x2x32x65xf32>
    %34 = vector.shape_cast %33 : vector<2x2x32x65xf32> to vector<4x32x65xf32>
    %35 = vector.extract_strided_slice %28 {offsets = [0, 0, 32, 0], sizes = [2, 2, 32, 65], strides = [1, 1, 1, 1]} : vector<2x2x96x65xf32> to vector<2x2x32x65xf32>
    %36 = vector.shape_cast %35 : vector<2x2x32x65xf32> to vector<4x32x65xf32>
    %37 = vector.shape_cast %32 : vector<2x2x32x65xf32> to vector<4x32x65xf32>
    %cst = arith.constant 0.000000e+00 : f32
    %38 = vector.broadcast %cst : f32 to vector<4x1x65xf32>
    %39 = vector.extract_strided_slice %34 {offsets = [0, 0, 0], sizes = [4, 8, 65], strides = [1, 1, 1]} : vector<4x32x65xf32> to vector<4x8x65xf32>
    %40 = vector.extract_strided_slice %36 {offsets = [0, 0, 0], sizes = [4, 8, 65], strides = [1, 1, 1]} : vector<4x32x65xf32> to vector<4x8x65xf32>
    %41 = vector.extract_strided_slice %37 {offsets = [0, 0, 0], sizes = [4, 8, 65], strides = [1, 1, 1]} : vector<4x32x65xf32> to vector<4x8x65xf32>
    "tpu.trace_start"() <{level = 10 : i32, message = "zdq,zdk->zqk"}> : () -> ()
    %cst_12 = arith.constant dense<0.000000e+00> : vector<4x65x65xf32>
    %42 = tpu.matmul %39, %40, %cst_12 {dimension_numbers = #tpu.dot_dimension_numbers<[1], [1], [2], [2], [0, 0, 0, 2, 1, 2], [0], [0]>} : vector<4x8x65xf32>, vector<4x8x65xf32>, vector<4x65x65xf32> -> vector<4x65x65xf32>
    "tpu.trace_stop"() : () -> ()
    %cst_13 = arith.constant 0.353553385 : f32
    %43 = vector.broadcast %cst_13 : f32 to vector<4x65x65xf32>
    %44 = arith.mulf %42, %43 : vector<4x65x65xf32>
    %cst_14 = arith.constant dense<0xFF800000> : vector<4x65xf32>
    %45 = vector.multi_reduction <maximumf>, %44, %cst_14 [2] : vector<4x65x65xf32> to vector<4x65xf32>
    %46 = vector.shape_cast %45 : vector<4x65xf32> to vector<4x65x1xf32>
    %47 = vector.broadcast %46 : vector<4x65x1xf32> to vector<4x65x65xf32>
    %48 = arith.subf %44, %47 : vector<4x65x65xf32>
    %49 = math.exp %48 : vector<4x65x65xf32>
    %cst_15 = arith.constant dense<0.000000e+00> : vector<4x65xf32>
    %50 = vector.multi_reduction <add>, %49, %cst_15 [2] : vector<4x65x65xf32> to vector<4x65xf32>
    %51 = vector.shape_cast %50 : vector<4x65xf32> to vector<4x65x1xf32>
    %52 = tpu.reciprocal %51 {approx = true} : vector<4x65x1xf32> -> vector<4x65x1xf32>
    %53 = vector.broadcast %52 : vector<4x65x1xf32> to vector<4x65x65xf32>
    %54 = arith.mulf %49, %53 : vector<4x65x65xf32>
    %cst_16 = arith.constant dense<0.000000e+00> : vector<4x65xf32>
    %55 = vector.multi_reduction <add>, %41, %cst_16 [1] : vector<4x8x65xf32> to vector<4x65xf32>
    %56 = vector.shape_cast %55 : vector<4x65xf32> to vector<4x1x65xf32>
    "tpu.trace_start"() <{level = 10 : i32, message = "zuk,zqk->zuq"}> : () -> ()
    %cst_17 = arith.constant dense<0.000000e+00> : vector<4x1x65xf32>
    %57 = tpu.matmul %56, %54, %cst_17 {dimension_numbers = #tpu.dot_dimension_numbers<[2], [2], [1], [1], [0, 0, 0, 1, 1, 1], [0], [0]>} : vector<4x1x65xf32>, vector<4x65x65xf32>, vector<4x1x65xf32> -> vector<4x1x65xf32>
    "tpu.trace_stop"() : () -> ()
    %58 = arith.addf %38, %57 : vector<4x1x65xf32>
    %59 = vector.extract_strided_slice %34 {offsets = [0, 8, 0], sizes = [4, 8, 65], strides = [1, 1, 1]} : vector<4x32x65xf32> to vector<4x8x65xf32>
    %60 = vector.extract_strided_slice %36 {offsets = [0, 8, 0], sizes = [4, 8, 65], strides = [1, 1, 1]} : vector<4x32x65xf32> to vector<4x8x65xf32>
    %61 = vector.extract_strided_slice %37 {offsets = [0, 8, 0], sizes = [4, 8, 65], strides = [1, 1, 1]} : vector<4x32x65xf32> to vector<4x8x65xf32>
    "tpu.trace_start"() <{level = 10 : i32, message = "zdq,zdk->zqk"}> : () -> ()
    %cst_18 = arith.constant dense<0.000000e+00> : vector<4x65x65xf32>
    %62 = tpu.matmul %59, %60, %cst_18 {dimension_numbers = #tpu.dot_dimension_numbers<[1], [1], [2], [2], [0, 0, 0, 2, 1, 2], [0], [0]>} : vector<4x8x65xf32>, vector<4x8x65xf32>, vector<4x65x65xf32> -> vector<4x65x65xf32>
    "tpu.trace_stop"() : () -> ()
    %cst_19 = arith.constant 0.353553385 : f32
    %63 = vector.broadcast %cst_19 : f32 to vector<4x65x65xf32>
    %64 = arith.mulf %62, %63 : vector<4x65x65xf32>
    %cst_20 = arith.constant dense<0xFF800000> : vector<4x65xf32>
    %65 = vector.multi_reduction <maximumf>, %64, %cst_20 [2] : vector<4x65x65xf32> to vector<4x65xf32>
    %66 = vector.shape_cast %65 : vector<4x65xf32> to vector<4x65x1xf32>
    %67 = vector.broadcast %66 : vector<4x65x1xf32> to vector<4x65x65xf32>
    %68 = arith.subf %64, %67 : vector<4x65x65xf32>
    %69 = math.exp %68 : vector<4x65x65xf32>
    %cst_21 = arith.constant dense<0.000000e+00> : vector<4x65xf32>
    %70 = vector.multi_reduction <add>, %69, %cst_21 [2] : vector<4x65x65xf32> to vector<4x65xf32>
    %71 = vector.shape_cast %70 : vector<4x65xf32> to vector<4x65x1xf32>
    %72 = tpu.reciprocal %71 {approx = true} : vector<4x65x1xf32> -> vector<4x65x1xf32>
    %73 = vector.broadcast %72 : vector<4x65x1xf32> to vector<4x65x65xf32>
    %74 = arith.mulf %69, %73 : vector<4x65x65xf32>
    %cst_22 = arith.constant dense<0.000000e+00> : vector<4x65xf32>
    %75 = vector.multi_reduction <add>, %61, %cst_22 [1] : vector<4x8x65xf32> to vector<4x65xf32>
    %76 = vector.shape_cast %75 : vector<4x65xf32> to vector<4x1x65xf32>
    "tpu.trace_start"() <{level = 10 : i32, message = "zuk,zqk->zuq"}> : () -> ()
    %cst_23 = arith.constant dense<0.000000e+00> : vector<4x1x65xf32>
    %77 = tpu.matmul %76, %74, %cst_23 {dimension_numbers = #tpu.dot_dimension_numbers<[2], [2], [1], [1], [0, 0, 0, 1, 1, 1], [0], [0]>} : vector<4x1x65xf32>, vector<4x65x65xf32>, vector<4x1x65xf32> -> vector<4x1x65xf32>
    "tpu.trace_stop"() : () -> ()
    %78 = arith.addf %58, %77 : vector<4x1x65xf32>
    %79 = vector.extract_strided_slice %34 {offsets = [0, 16, 0], sizes = [4, 8, 65], strides = [1, 1, 1]} : vector<4x32x65xf32> to vector<4x8x65xf32>
    %80 = vector.extract_strided_slice %36 {offsets = [0, 16, 0], sizes = [4, 8, 65], strides = [1, 1, 1]} : vector<4x32x65xf32> to vector<4x8x65xf32>
    %81 = vector.extract_strided_slice %37 {offsets = [0, 16, 0], sizes = [4, 8, 65], strides = [1, 1, 1]} : vector<4x32x65xf32> to vector<4x8x65xf32>
    "tpu.trace_start"() <{level = 10 : i32, message = "zdq,zdk->zqk"}> : () -> ()
    %cst_24 = arith.constant dense<0.000000e+00> : vector<4x65x65xf32>
    %82 = tpu.matmul %79, %80, %cst_24 {dimension_numbers = #tpu.dot_dimension_numbers<[1], [1], [2], [2], [0, 0, 0, 2, 1, 2], [0], [0]>} : vector<4x8x65xf32>, vector<4x8x65xf32>, vector<4x65x65xf32> -> vector<4x65x65xf32>
    "tpu.trace_stop"() : () -> ()
    %cst_25 = arith.constant 0.353553385 : f32
    %83 = vector.broadcast %cst_25 : f32 to vector<4x65x65xf32>
    %84 = arith.mulf %82, %83 : vector<4x65x65xf32>
    %cst_26 = arith.constant dense<0xFF800000> : vector<4x65xf32>
    %85 = vector.multi_reduction <maximumf>, %84, %cst_26 [2] : vector<4x65x65xf32> to vector<4x65xf32>
    %86 = vector.shape_cast %85 : vector<4x65xf32> to vector<4x65x1xf32>
    %87 = vector.broadcast %86 : vector<4x65x1xf32> to vector<4x65x65xf32>
    %88 = arith.subf %84, %87 : vector<4x65x65xf32>
    %89 = math.exp %88 : vector<4x65x65xf32>
    %cst_27 = arith.constant dense<0.000000e+00> : vector<4x65xf32>
    %90 = vector.multi_reduction <add>, %89, %cst_27 [2] : vector<4x65x65xf32> to vector<4x65xf32>
    %91 = vector.shape_cast %90 : vector<4x65xf32> to vector<4x65x1xf32>
    %92 = tpu.reciprocal %91 {approx = true} : vector<4x65x1xf32> -> vector<4x65x1xf32>
    %93 = vector.broadcast %92 : vector<4x65x1xf32> to vector<4x65x65xf32>
    %94 = arith.mulf %89, %93 : vector<4x65x65xf32>
    %cst_28 = arith.constant dense<0.000000e+00> : vector<4x65xf32>
    %95 = vector.multi_reduction <add>, %81, %cst_28 [1] : vector<4x8x65xf32> to vector<4x65xf32>
    %96 = vector.shape_cast %95 : vector<4x65xf32> to vector<4x1x65xf32>
    "tpu.trace_start"() <{level = 10 : i32, message = "zuk,zqk->zuq"}> : () -> ()
    %cst_29 = arith.constant dense<0.000000e+00> : vector<4x1x65xf32>
    %97 = tpu.matmul %96, %94, %cst_29 {dimension_numbers = #tpu.dot_dimension_numbers<[2], [2], [1], [1], [0, 0, 0, 1, 1, 1], [0], [0]>} : vector<4x1x65xf32>, vector<4x65x65xf32>, vector<4x1x65xf32> -> vector<4x1x65xf32>
    "tpu.trace_stop"() : () -> ()
    %98 = arith.addf %78, %97 : vector<4x1x65xf32>
    %99 = vector.extract_strided_slice %34 {offsets = [0, 24, 0], sizes = [4, 8, 65], strides = [1, 1, 1]} : vector<4x32x65xf32> to vector<4x8x65xf32>
    %100 = vector.extract_strided_slice %36 {offsets = [0, 24, 0], sizes = [4, 8, 65], strides = [1, 1, 1]} : vector<4x32x65xf32> to vector<4x8x65xf32>
    %101 = vector.extract_strided_slice %37 {offsets = [0, 24, 0], sizes = [4, 8, 65], strides = [1, 1, 1]} : vector<4x32x65xf32> to vector<4x8x65xf32>
    "tpu.trace_start"() <{level = 10 : i32, message = "zdq,zdk->zqk"}> : () -> ()
    %cst_30 = arith.constant dense<0.000000e+00> : vector<4x65x65xf32>
    %102 = tpu.matmul %99, %100, %cst_30 {dimension_numbers = #tpu.dot_dimension_numbers<[1], [1], [2], [2], [0, 0, 0, 2, 1, 2], [0], [0]>} : vector<4x8x65xf32>, vector<4x8x65xf32>, vector<4x65x65xf32> -> vector<4x65x65xf32>
    "tpu.trace_stop"() : () -> ()
    %cst_31 = arith.constant 0.353553385 : f32
    %103 = vector.broadcast %cst_31 : f32 to vector<4x65x65xf32>
    %104 = arith.mulf %102, %103 : vector<4x65x65xf32>
    %cst_32 = arith.constant dense<0xFF800000> : vector<4x65xf32>
    %105 = vector.multi_reduction <maximumf>, %104, %cst_32 [2] : vector<4x65x65xf32> to vector<4x65xf32>
    %106 = vector.shape_cast %105 : vector<4x65xf32> to vector<4x65x1xf32>
    %107 = vector.broadcast %106 : vector<4x65x1xf32> to vector<4x65x65xf32>
    %108 = arith.subf %104, %107 : vector<4x65x65xf32>
    %109 = math.exp %108 : vector<4x65x65xf32>
    %cst_33 = arith.constant dense<0.000000e+00> : vector<4x65xf32>
    %110 = vector.multi_reduction <add>, %109, %cst_33 [2] : vector<4x65x65xf32> to vector<4x65xf32>
    %111 = vector.shape_cast %110 : vector<4x65xf32> to vector<4x65x1xf32>
    %112 = tpu.reciprocal %111 {approx = true} : vector<4x65x1xf32> -> vector<4x65x1xf32>
    %113 = vector.broadcast %112 : vector<4x65x1xf32> to vector<4x65x65xf32>
    %114 = arith.mulf %109, %113 : vector<4x65x65xf32>
    %cst_34 = arith.constant dense<0.000000e+00> : vector<4x65xf32>
    %115 = vector.multi_reduction <add>, %101, %cst_34 [1] : vector<4x8x65xf32> to vector<4x65xf32>
    %116 = vector.shape_cast %115 : vector<4x65xf32> to vector<4x1x65xf32>
    "tpu.trace_start"() <{level = 10 : i32, message = "zuk,zqk->zuq"}> : () -> ()
    %cst_35 = arith.constant dense<0.000000e+00> : vector<4x1x65xf32>
    %117 = tpu.matmul %116, %114, %cst_35 {dimension_numbers = #tpu.dot_dimension_numbers<[2], [2], [1], [1], [0, 0, 0, 1, 1, 1], [0], [0]>} : vector<4x1x65xf32>, vector<4x65x65xf32>, vector<4x1x65xf32> -> vector<4x1x65xf32>
    "tpu.trace_stop"() : () -> ()
    %118 = arith.addf %98, %117 : vector<4x1x65xf32>
    %119 = vector.shape_cast %118 : vector<4x1x65xf32> to vector<2x2x65xf32>
    %120 = vector.shape_cast %8 : vector<2x1xf32> to vector<1x2x1xf32>
    %121 = vector.broadcast %120 : vector<1x2x1xf32> to vector<2x2x65xf32>
    %122 = arith.addf %119, %121 : vector<2x2x65xf32>
    %c0_36 = arith.constant 0 : index
    %c0_37 = arith.constant 0 : index
    %c0_38 = arith.constant 0 : index
    %123 = vector.load %arg4[%c0_36, %c0_37, %c0_38] : memref<2x2x65xf32, #tpu.memory_space<vmem>>, vector<2x2x65xf32>
    tpu.vector_store %arg4[%c0_36, %c0_37, %c0_38], %122 {strides = array<i32>} : memref<2x2x65xf32, #tpu.memory_space<vmem>>, vector<2x2x65xf32>,
    return
  }
  func.func @transform_0(%arg0: i32) -> (i32, i32, i32) {
    %c0_i32 = arith.constant 0 : i32
    %c0_i32_0 = arith.constant 0 : i32
    %c0_i32_1 = arith.constant 0 : i32
    return %arg0, %c0_i32, %c0_i32_0 : i32, i32, i32
  }
  func.func @transform_1(%arg0: i32) -> (i32, i32, i32) {
    %c0_i32 = arith.constant 0 : i32
    %c0_i32_0 = arith.constant 0 : i32
    %c0_i32_1 = arith.constant 0 : i32
    %c0_i32_2 = arith.constant 0 : i32
    return %c0_i32, %c0_i32_0, %c0_i32_1 : i32, i32, i32
  }
  func.func @transform_2(%arg0: i32) -> (i32, i32) {
    %c0_i32 = arith.constant 0 : i32
    %c0_i32_0 = arith.constant 0 : i32
    %c0_i32_1 = arith.constant 0 : i32
    return %c0_i32, %c0_i32_0 : i32, i32
  }
  func.func @transform_3(%arg0: i32) -> (i32, i32, i32) {
    %c0_i32 = arith.constant 0 : i32
    %c0_i32_0 = arith.constant 0 : i32
    %c0_i32_1 = arith.constant 0 : i32
    return %arg0, %c0_i32, %c0_i32_0 : i32, i32, i32
  }
}

</mosaic_0001>

<bundles_post_ra>
// kernel: reverse.0
= control target key start
LH: loop header
LB: loop body
LE: loop exit
PB: predicated region body
PF: predicated region fallthrough
CT: control target
= control target key end

     0   :  { %v2_v0 = vlaneseq  ;;  %s112_s0 = inlined_call_operand.vmem [shape: f32[4,63], index: 0, kind: input, shape index: {}]   ;;  %s113_s1 = inlined_call_operand.vmem [shape: f32[4,63], index: 1, kind: output, shape index: {}]  }
   0x2   :  { %v3_v1 = vsub.s32 62, %v2_v0 }
   0x4   :  { %4 = vset.pattern.permute.xlu0 %v3_v1 }
   0x5   :  { %v21_v2 = vld [vmem:[%s112_s0] sm:$0xf] }
   0x6   :  { %22 = vst [vmem:[#allocation1] sm:$0xf] %v21_v2 }
   0xd   :  { %v41_v3 = vld [vmem:[#allocation1] sm:$0xf] }
   0xe   :  { %42 = vst [vmem:[#allocation0] sm:$0xf] %v41_v3 }
  0x15   :  { %v43_v4 = vld [vmem:[#allocation0] sm:$0xff] }
  0x16   :  { %44 = vperm.xlu0 %4, %v43_v4  }
  0x91   :  { %v45_v5 = vpop.permute.xlu0 %44 }
  0x92   :  { %46 = vst [vmem:[#allocation2] sm:$0xff] %v45_v5 }
  0x99   :  { %v51_v6 = vld [vmem:[#allocation2] sm:$0xf] }
  0x9a   :  { %54 = vst [vmem:[#allocation3] sm:$0xf] %v51_v6 }
  0xa1   :  { %v71_v7 = vld [vmem:[#allocation3] sm:$0xf] }
  0xa2   :  { %72 = vst [vmem:[%s113_s1] sm:$0xf] %v71_v7 }

// kernel: freq_attention_forward.1
= control target key start
LH: loop header
LB: loop body
LE: loop exit
PB: predicated region body
PF: predicated region fallthrough
CT: control target
= control target key end

     0   :  { %s9079_s12 = smov 0   ;;  %s12255_s0 = inlined_call_operand.vmem [shape: f32[4,2,65], index: 0, kind: input, shape index: {}]   ;;  %s12256_s1 = inlined_call_operand.vmem [shape: f32[3,2,96], index: 1, kind: input, shape index: {}]   ;;  %s12257_s2 = inlined_call_operand.vmem [shape: f32[2,33], index: 2, kind: input, shape index: {}]   ;;  %s12258_s3 = inlined_call_operand.vmem [shape: f32[4,2,65], index: 3, kind: output, shape index: {}]  }
   0x1 LB: > { %s7017_s13 = sadd.s32 4294967295, %s9053_s12   ;;  %p7021_p0 = scmp.ge.s32.totalorder %s9053_s12, 1  ;;  %s9053_s12 = sphi %s9079_s12, %s13_s12  }
   0x2   : > { %p138_p1 = scmp.lt.s32.totalorder %s9053_s12, 3 }
   0x4   : > { %p139_p2 = pnand %p7021_p0, %p138_p1 }
   0x6   : > { %142 = sbr.rel (%p139_p2) target bundleno = 3239 (0xca7), region = 32 }
   0xb   : > { %v182_v0 = vlaneseq  ;;  %v12259_v1 = vmov 0.0   ;;  %v176_v3 = vld [vmem:[%s12256_s1] sm:$0x3]  ;;  %v7026_v6 = vld [vmem:[%s12256_s1 + $0x2] sm:$0x3]  ;;  %s7022_s20 = sshll.u32 %s7017_s13, 1 }
   0xc   : > { %7686 = vmatprep.subr.mxu1 %v12259_v1  ;;  %7657 = vmatprep.subr.mxu0 %v12259_v1  ;;  %v7027_v11 = vld [vmem:[%s12256_s1 + $0x4] sm:$0x3]  ;;  %p163_p3 = scmp.lt.s32.totalorder %s7022_s20, 3  ;;  %vm9056_vm0 = vmmov 0   ;;  %v9057_v14 = vmov 1966171168  }
   0xd   : > { %v201_v2 = vshrl.u32 %v182_v0, 7  ;;  %7659 = vmatprep.mubr.msk.f32.mxu0 %vm9056_vm0, %v12259_v1  ;;  %7688 = vmatprep.mubr.msk.f32.mxu1 %vm9056_vm0, %v12259_v1  ;;  %v198_v15 = vunpack.c.l.s4 %v9057_v14  ;;  %v183_v20 = vand.u32 127, %v182_v0  ;;  %vm813_vm2 = vcmask 64512  }
   0xe   : > { %s12650_s20 = smov (!%p163_p3, %s7022_s20), 3  ;;  %vm1494_vm3 = vcmask 531456   ;;  %vm1519_vm4 = vcmask 524288   ;;  %vm6952_vm5 = vcmask 1041409   ;;  %vm6958_vm6 = vcmask 525312  }
   0xf   : > { %v9092_v4 = vsub.s32 0, %v201_v2  ;;  %v9094_v5 = vsub.s32 1, %v201_v2  ;;  %s7023_s21 = sshll.u32 %s12650_s20, 1  ;;  %v199_v16 = vunpack.c.0.s8 %v198_v15  ;;  %vm184_vm1 = vcmp.eq.s32.totalorder %v183_v20, 0 }
  0x10   : > { %s9152_s24 = scalar_lea.vmem %s12255_s0, %s7023_s21  ;;  %v9162_v27 = vsel %vm184_vm1, 1.0, %v12259_v1  ;;  %s172_s4 = scalar_lea.vmem %s12258_s3, %s7023_s21 }
  0x11   : > { %12377 = vst [vmem:[#allocation2_spill] sm:$0xff] %v9092_v4  ;;  %12378 = vst [vmem:[#allocation3_spill] sm:$0xff] %v9094_v5  ;;  %v9100_v7 = vrot.slane %v176_v3, %v9094_v5  ;;  %v9103_v8 = vrot.slane %v176_v3, %v9092_v4  ;;  %v9108_v9 = vrot.slane %v7026_v6, %v9094_v5  ;;  %v7029_v17 = vld.sshfl [vmem:[%s9152_s24] sm:$0x11 pattern:$0x75316420] }
  0x12   : > { %v9111_v10 = vrot.slane %v7026_v6, %v9092_v4  ;;  %v9119_v12 = vrot.slane %v7027_v11, %v9094_v5  ;;  %v9122_v13 = vrot.slane %v7027_v11, %v9092_v4  ;;  %v202_v18 = vsub.s32 %v199_v16, %v201_v2  ;;  %12387 = vst [vmem:[#allocation12_spill] sm:$0xff] %v9162_v27  ;;  %v7030_v52 = vld.sshfl [vmem:[%s9152_s24 + $0x2] sm:$0x11 pattern:$0x75316420] }
  0x13   : > { %12379 = vst [vmem:[#allocation4_spill] sm:$0xff] %v9100_v7  ;;  %12380 = vst [vmem:[#allocation5_spill] sm:$0xff] %v9103_v8  ;;  %289 = vbcast.lane.b32.xlu0 %v9100_v7, 256  ;;  %238 = vbcast.lane.b32.xlu1 %v9103_v8, 256  ;;  %v196_v19 = vcombine.high %v7029_v17, %v7029_v17  ;;  %v218_v55 = vcombine.high %v7030_v52, %v7030_v52 }
  0x14   : > { %12381 = vst [vmem:[#allocation6_spill] sm:$0xff] %v9108_v9  ;;  %12382 = vst [vmem:[#allocation7_spill] sm:$0xff] %v9111_v10  ;;  %v203_v21 = vrot.slane %v7029_v17, %v202_v18  ;;  %v225_v56 = vrot.slane %v7030_v52, %v202_v18 }
  0x15   : > { %12383 = vst [vmem:[#allocation8_spill] sm:$0xff] %v9119_v12  ;;  %12384 = vst [vmem:[#allocation9_spill] sm:$0xff] %v9122_v13  ;;  %v210_v22 = vrot.slane %v196_v19, %v202_v18  ;;  %v232_v57 = vrot.slane %v218_v55, %v202_v18 }
  0x16   : > { %v9156_v23 = vrot.slane %v203_v21, %v9092_v4  ;;  %v9176_v58 = vrot.slane %v225_v56, %v9092_v4 }
  0x17   : > { %459 = vbcast.lane.b32.xlu0 %v9108_v9, 256  ;;  %408 = vbcast.lane.b32.xlu1 %v9111_v10, 256  ;;  %v9159_v26 = vrot.slane %v210_v22, %v9092_v4  ;;  %v9179_v59 = vrot.slane %v232_v57, %v9092_v4 }
  0x18   : > { %12385 = vst [vmem:[#allocation10_spill] sm:$0xff] %v9156_v23  ;;  %12388 = vst [vmem:[#allocation13_spill] sm:$0xff] %v9176_v58 }
  0x19   : > { %12386 = vst [vmem:[#allocation11_spill] sm:$0xff] %v9159_v26  ;;  %12389 = vst [vmem:[#allocation14_spill] sm:$0xff] %v9179_v59 }
  0x1b   : > { %633 = vbcast.lane.b32.xlu0 %v9119_v12, 256  ;;  %582 = vbcast.lane.b32.xlu1 %v9122_v13, 256 }
  0x1f   : > { %305 = vbcast.lane.b32.xlu0 %v9100_v7, 288  ;;  %475 = vbcast.lane.b32.xlu1 %v9108_v9, 288 }
  0x23   : > { %254 = vbcast.lane.b32.xlu0 %v9103_v8, 288  ;;  %424 = vbcast.lane.b32.xlu1 %v9111_v10, 288 }
  0x27   : > { %649 = vbcast.lane.b32.xlu0 %v9119_v12, 288  ;;  %598 = vbcast.lane.b32.xlu1 %v9122_v13, 288 }
  0x2b   : > { %293 = vbcast.lane.b32.xlu0 %v9100_v7, 264  ;;  %463 = vbcast.lane.b32.xlu1 %v9108_v9, 264 }
  0x2f   : > { %242 = vbcast.lane.b32.xlu0 %v9103_v8, 264  ;;  %412 = vbcast.lane.b32.xlu1 %v9111_v10, 264 }
  0x33   : > { %637 = vbcast.lane.b32.xlu0 %v9119_v12, 264  ;;  %586 = vbcast.lane.b32.xlu1 %v9122_v13, 264 }
  0x85   : > { %v290_v24 = vpop.permute.xlu0 %289  ;;  %v239_v25 = vpop.permute.xlu1 %238 }
  0x86   : > { %v355_v28 = vmul.f32 %v9156_v23, %v239_v25  ;;  %v367_v31 = vmul.f32 %v9159_v26, %v290_v24  ;;  %v379_v60 = vmul.f32 %v9176_v58, %v239_v25  ;;  %v391_v61 = vmul.f32 %v9179_v59, %v290_v24 }
  0x89   : > { %v460_v29 = vpop.permute.xlu0 %459  ;;  %v409_v30 = vpop.permute.xlu1 %408 }
  0x8a   : > { %v517_v32 = vmul.f32 %v9162_v27, %v460_v29  ;;  %v505_v33 = vmul.f32 %v9162_v27, %v409_v30 }
  0x8c   : > { %v529_v34 = vadd.f32 %v505_v33, %v355_v28  ;;  %v541_v35 = vadd.f32 %v517_v32, %v367_v31  ;;  %v553_v62 = vadd.f32 %v505_v33, %v379_v60  ;;  %v565_v63 = vadd.f32 %v517_v32, %v391_v61 }
  0x8d   : > { %v634_v36 = vpop.permute.xlu0 %633  ;;  %v583_v37 = vpop.permute.xlu1 %582 }
  0x8e   : > { %v679_v38 = vadd.f32 %v583_v37, %v529_v34  ;;  %v691_v39 = vadd.f32 %v634_v36, %v541_v35  ;;  %v703_v0 = vadd.f32 %v583_v37, %v553_v62  ;;  %v715_v2 = vadd.f32 %v634_v36, %v565_v63 }
  0x90   : > { %781 = vxpose.xlu1.b32.start.end [1/1] (short) (narrow) %v679_v38, 72  ;;  %951 = vxpose.xlu0.b32.start.end [1/1] (short) (narrow) %v691_v39, 72 }
  0x91   : > { %v306_v40 = vpop.permute.xlu0 %305  ;;  %v476_v41 = vpop.permute.xlu1 %475 }
  0x92   : > { %v371_v42 = vmul.f32 %v9159_v26, %v306_v40  ;;  %v521_v43 = vmul.f32 %v9162_v27, %v476_v41  ;;  %v395_v34 = vmul.f32 %v9179_v59, %v306_v40 }
  0x94   : > { %v545_v48 = vadd.f32 %v521_v43, %v371_v42  ;;  %v569_v36 = vadd.f32 %v521_v43, %v395_v34 }
  0x95   : > { %v255_v44 = vpop.permute.xlu0 %254  ;;  %v425_v45 = vpop.permute.xlu1 %424 }
  0x96   : > { %v359_v46 = vmul.f32 %v9156_v23, %v255_v44  ;;  %v509_v47 = vmul.f32 %v9162_v27, %v425_v45  ;;  %v383_v35 = vmul.f32 %v9176_v58, %v255_v44 }
  0x98   : > { %v533_v49 = vadd.f32 %v509_v47, %v359_v46  ;;  %v557_v37 = vadd.f32 %v509_v47, %v383_v35 }
  0x99   : > { %v650_v50 = vpop.permute.xlu0 %649  ;;  %v599_v51 = vpop.permute.xlu1 %598 }
  0x9a   : > { %v695_v53 = vadd.f32 %v650_v50, %v545_v48  ;;  %v683_v54 = vadd.f32 %v599_v51, %v533_v49  ;;  %v719_v38 = vadd.f32 %v650_v50, %v569_v36  ;;  %v707_v39 = vadd.f32 %v599_v51, %v557_v37 }
  0x9c   : > { %7687 = vmatpush3.msra.mxu1 %v695_v53  ;;  %7658 = vmatpush3.msra.mxu0 %v683_v54 }
  0x9d   : > { %7715 = vmatprep.subr.mxu0 %v12259_v1  ;;  %7744 = vmatprep.subr.mxu1 %v12259_v1  ;;  %v464_v3 = vpop.permute.xlu1 %463  ;;  %v294_v6 = vpop.permute.xlu0 %293 }
  0x9e   : > { %v368_v17 = vmul.f32 %v9159_v26, %v294_v6  ;;  %v518_v18 = vmul.f32 %v9162_v27, %v464_v3  ;;  %v392_v28 = vmul.f32 %v9179_v59, %v294_v6 }
  0xa0   : > { %v542_v21 = vadd.f32 %v518_v18, %v368_v17  ;;  %v566_v31 = vadd.f32 %v518_v18, %v392_v28 }
  0xa1   : > { %v413_v11 = vpop.permute.xlu1 %412  ;;  %v243_v14 = vpop.permute.xlu0 %242 }
  0xa2   : > { %v356_v15 = vmul.f32 %v9156_v23, %v243_v14  ;;  %v506_v16 = vmul.f32 %v9162_v27, %v413_v11  ;;  %v380_v29 = vmul.f32 %v9176_v58, %v243_v14 }
  0xa4   : > { %v530_v19 = vadd.f32 %v506_v16, %v356_v15  ;;  %v554_v30 = vadd.f32 %v506_v16, %v380_v29 }
  0xa5   : > { %v587_v20 = vpop.permute.xlu1 %586  ;;  %v638_v22 = vpop.permute.xlu0 %637 }
  0xa6   : > { %v680_v24 = vadd.f32 %v587_v20, %v530_v19  ;;  %v692_v25 = vadd.f32 %v638_v22, %v542_v21  ;;  %v704_v32 = vadd.f32 %v587_v20, %v554_v30  ;;  %v716_v33 = vadd.f32 %v638_v22, %v566_v31 }
  0xb1   : > { %1120 = vxpose.xlu1.b32.start.end [1/1] (short) (narrow) %v703_v0, 72  ;;  %1289 = vxpose.xlu0.b32.start.end [1/1] (short) (narrow) %v715_v2, 72 }
  0xd2   : > { %1920 = vxpose.xlu1.b32.start.end [1/1] (short) (narrow) %v680_v24, 72  ;;  %2089 = vxpose.xlu0.b32.start.end [1/1] (short) (narrow) %v692_v25, 72 }
  0xf3   : > { %2258 = vxpose.xlu1.b32.start.end [1/1] (short) (narrow) %v704_v32, 72  ;;  %2427 = vxpose.xlu0.b32.start.end [1/1] (short) (narrow) %v716_v33, 72 }
 0x10c   : > { %v797_v41 = vpop.trf.xlu1  ;;  %v967_v42 = vpop.trf.xlu0 }
 0x10d   : > { %7660 = vmatmul.mubr.msk.f32.vlgmr.msra.gmra.mxu0 %vm813_vm2, %v797_v41  ;;  %7689 = vmatmul.mubr.msk.f32.vlgmr.msra.gmra.mxu1 %vm813_vm2, %v967_v42 }
 0x10e   : > { %7716 = vmatpush3.msra.mxu0 %v707_v39  ;;  %7745 = vmatpush3.msra.mxu1 %v719_v38 }
 0x10f   : > { %7662 = vmatprep.mubr.msk.f32.mxu0 %vm9056_vm0, %v12259_v1  ;;  %7691 = vmatprep.mubr.msk.f32.mxu1 %vm9056_vm0, %v12259_v1 }
 0x110   : > { %v798_v40 = vpop.trf.xlu1  ;;  %v968_v43 = vpop.trf.xlu0  ;;  %7773 = vmatprep.subr.mxu0 %v12259_v1  ;;  %7802 = vmatprep.subr.mxu1 %v12259_v1 }
 0x111   : > { %7663 = vmatmul.mubr.msk.f32.gmra.mxu0 %vm813_vm2, %v798_v40  ;;  %7692 = vmatmul.mubr.msk.f32.gmra.mxu1 %vm813_vm2, %v968_v43 }
 0x112   : > { %7665 = vmatprep.mubr.msk.f32.mxu0 %vm9056_vm0, %v12259_v1  ;;  %7694 = vmatprep.mubr.msk.f32.mxu1 %vm9056_vm0, %v12259_v1 }
 0x114   : > { %v799_v44 = vpop.trf.xlu1  ;;  %v969_v45 = vpop.trf.xlu0 }
 0x115   : > { %7666 = vmatmul.mubr.msk.f32.gmra.mxu0 %vm813_vm2, %v799_v44  ;;  %7695 = vmatmul.mubr.msk.f32.gmra.mxu1 %vm813_vm2, %v969_v45 }
 0x116   : > { %7668 = vmatprep.mubr.msk.f32.mxu0 %vm9056_vm0, %v12259_v1  ;;  %7697 = vmatprep.mubr.msk.f32.mxu1 %vm9056_vm0, %v12259_v1 }
 0x118   : > { %v800_v46 = vpop.trf.xlu1  ;;  %v970_v47 = vpop.trf.xlu0 }
 0x119   : > { %7669 = vmatmul.mubr.msk.f32.gmra.mxu0 %vm813_vm2, %v800_v46  ;;  %7698 = vmatmul.mubr.msk.f32.gmra.mxu1 %vm813_vm2, %v970_v47 }
 0x11a   : > { %7671 = vmatprep.mubr.msk.f32.mxu0 %vm9056_vm0, %v12259_v1  ;;  %7700 = vmatprep.mubr.msk.f32.mxu1 %vm9056_vm0, %v12259_v1 }
 0x11c   : > { %v801_v48 = vpop.trf.xlu1  ;;  %v971_v49 = vpop.trf.xlu0 }
 0x11d   : > { %7672 = vmatmul.mubr.msk.f32.gmra.mxu0 %vm813_vm2, %v801_v48  ;;  %7701 = vmatmul.mubr.msk.f32.gmra.mxu1 %vm813_vm2, %v971_v49 }
 0x11e   : > { %7674 = vmatprep.mubr.msk.f32.mxu0 %vm9056_vm0, %v12259_v1  ;;  %7703 = vmatprep.mubr.msk.f32.mxu1 %vm9056_vm0, %v12259_v1 }
 0x120   : > { %v802_v50 = vpop.trf.xlu1  ;;  %v972_v51 = vpop.trf.xlu0 }
 0x121   : > { %7675 = vmatmul.mubr.msk.f32.gmra.mxu0 %vm813_vm2, %v802_v50  ;;  %7704 = vmatmul.mubr.msk.f32.gmra.mxu1 %vm813_vm2, %v972_v51 }
 0x122   : > { %7677 = vmatprep.mubr.msk.f32.mxu0 %vm9056_vm0, %v12259_v1  ;;  %7706 = vmatprep.mubr.msk.f32.mxu1 %vm9056_vm0, %v12259_v1 }
 0x124   : > { %v803_v52 = vpop.trf.xlu1  ;;  %v973_v53 = vpop.trf.xlu0 }
 0x125   : > { %7678 = vmatmul.mubr.msk.f32.gmra.mxu0 %vm813_vm2, %v803_v52  ;;  %7707 = vmatmul.mubr.msk.f32.gmra.mxu1 %vm813_vm2, %v973_v53 }
 0x126   : > { %7680 = vmatprep.mubr.msk.f32.mxu0 %vm9056_vm0, %v12259_v1  ;;  %7709 = vmatprep.mubr.msk.f32.mxu1 %vm9056_vm0, %v12259_v1 }
 0x128   : > { %v804_v54 = vpop.trf.xlu1  ;;  %v974_v55 = vpop.trf.xlu0 }
 0x129   : > { %7681 = vmatmul.mubr.msk.f32.gmra.mxu0 %vm813_vm2, %v804_v54  ;;  %7710 = vmatmul.mubr.msk.f32.gmra.mxu1 %vm813_vm2, %v974_v55 }
 0x12a   : > { %7683 = vmatprep.mubr.msk.f32.mxu0 %vm9056_vm0, %v12259_v1  ;;  %7712 = vmatprep.mubr.msk.f32.mxu1 %vm9056_vm0, %v12259_v1 }
 0x12c   : > { %v805_v56 = vpop.trf.xlu1  ;;  %v975_v57 = vpop.trf.xlu0 }
 0x12d   : > { %7684 = vmatmul.mubr.msk.f32.gmra.mxu0 %vm813_vm2, %v805_v56  ;;  %7713 = vmatmul.mubr.msk.f32.gmra.mxu1 %vm813_vm2, %v975_v57 }
 0x12e   : > { %7746 = vmatprep.mubr.msk.f32.mxu1 %vm9056_vm0, %v12259_v1  ;;  %7717 = vmatprep.mubr.msk.f32.mxu0 %vm9056_vm0, %v12259_v1 }
 0x130   : > { %v1305_v60 = vpop.trf.xlu0  ;;  %v1136_v61 = vpop.trf.xlu1 }
 0x131   : > { %7747 = vmatmul.mubr.msk.f32.vlgmr.msra.gmra.mxu1 %vm813_vm2, %v1305_v60  ;;  %7718 = vmatmul.mubr.msk.f32.vlgmr.msra.gmra.mxu0 %vm813_vm2, %v1136_v61 }
 0x132   : > { %7749 = vmatprep.mubr.msk.f32.mxu1 %vm9056_vm0, %v12259_v1  ;;  %7720 = vmatprep.mubr.msk.f32.mxu0 %vm9056_vm0, %v12259_v1 }
 0x133   : > { %479 = vbcast.lane.b32.xlu1 %v9108_v9, 296 }
 0x134   : > { %v1306_v62 = vpop.trf.xlu0  ;;  %v1137_v63 = vpop.trf.xlu1 }
 0x135   : > { %7750 = vmatmul.mubr.msk.f32.gmra.mxu1 %vm813_vm2, %v1306_v62  ;;  %7721 = vmatmul.mubr.msk.f32.gmra.mxu0 %vm813_vm2, %v1137_v63 }
 0x136   : > { %7752 = vmatprep.mubr.msk.f32.mxu1 %vm9056_vm0, %v12259_v1  ;;  %7723 = vmatprep.mubr.msk.f32.mxu0 %vm9056_vm0, %v12259_v1 }
 0x137   : > { %428 = vbcast.lane.b32.xlu1 %v9111_v10, 296 }
 0x138   : > { %v1307_v0 = vpop.trf.xlu0  ;;  %v1138_v2 = vpop.trf.xlu1 }
 0x139   : > { %7753 = vmatmul.mubr.msk.f32.gmra.mxu1 %vm813_vm2, %v1307_v0  ;;  %7724 = vmatmul.mubr.msk.f32.gmra.mxu0 %vm813_vm2, %v1138_v2 }
 0x13a   : > { %7755 = vmatprep.mubr.msk.f32.mxu1 %vm9056_vm0, %v12259_v1  ;;  %7726 = vmatprep.mubr.msk.f32.mxu0 %vm9056_vm0, %v12259_v1 }
 0x13b   : > { %602 = vbcast.lane.b32.xlu1 %v9122_v13, 296 }
 0x13c   : > { %309 = vbcast.lane.b32.xlu0 %v9100_v7, 296  ;;  %v1308_v3 = vpop.trf.xlu0  ;;  %v1139_v6 = vpop.trf.xlu1 }
 0x13d   : > { %7756 = vmatmul.mubr.msk.f32.gmra.mxu1 %vm813_vm2, %v1308_v3  ;;  %7727 = vmatmul.mubr.msk.f32.gmra.mxu0 %vm813_vm2, %v1139_v6 }
 0x13e   : > { %7758 = vmatprep.mubr.msk.f32.mxu1 %vm9056_vm0, %v12259_v1  ;;  %7729 = vmatprep.mubr.msk.f32.mxu0 %vm9056_vm0, %v12259_v1 }
 0x140   : > { %258 = vbcast.lane.b32.xlu0 %v9103_v8, 296  ;;  %v1309_v11 = vpop.trf.xlu0  ;;  %v1140_v14 = vpop.trf.xlu1 }
 0x141   : > { %7759 = vmatmul.mubr.msk.f32.gmra.mxu1 %vm813_vm2, %v1309_v11  ;;  %7730 = vmatmul.mubr.msk.f32.gmra.mxu0 %vm813_vm2, %v1140_v14 }
 0x142   : > { %7761 = vmatprep.mubr.msk.f32.mxu1 %vm9056_vm0, %v12259_v1  ;;  %7732 = vmatprep.mubr.msk.f32.mxu0 %vm9056_vm0, %v12259_v1 }
 0x144   : > { %653 = vbcast.lane.b32.xlu0 %v9119_v12, 296  ;;  %v1310_v15 = vpop.trf.xlu0  ;;  %v1141_v16 = vpop.trf.xlu1 }
 0x145   : > { %7762 = vmatmul.mubr.msk.f32.gmra.mxu1 %vm813_vm2, %v1310_v15  ;;  %7733 = vmatmul.mubr.msk.f32.gmra.mxu0 %vm813_vm2, %v1141_v16 }
 0x146   : > { %7764 = vmatprep.mubr.msk.f32.mxu1 %vm9056_vm0, %v12259_v1  ;;  %7735 = vmatprep.mubr.msk.f32.mxu0 %vm9056_vm0, %v12259_v1 }
 0x148   : > { %v1311_v17 = vpop.trf.xlu0  ;;  %v1142_v18 = vpop.trf.xlu1 }
 0x149   : > { %7765 = vmatmul.mubr.msk.f32.gmra.mxu1 %vm813_vm2, %v1311_v17  ;;  %7736 = vmatmul.mubr.msk.f32.gmra.mxu0 %vm813_vm2, %v1142_v18 }
 0x14a   : > { %7767 = vmatprep.mubr.msk.f32.mxu1 %vm9056_vm0, %v12259_v1  ;;  %7738 = vmatprep.mubr.msk.f32.mxu0 %vm9056_vm0, %v12259_v1 }
 0x14c   : > { %v1312_v19 = vpop.trf.xlu0  ;;  %v1143_v20 = vpop.trf.xlu1 }
 0x14d   : > { %7768 = vmatmul.mubr.msk.f32.gmra.mxu1 %vm813_vm2, %v1312_v19  ;;  %7739 = vmatmul.mubr.msk.f32.gmra.mxu0 %vm813_vm2, %v1143_v20 }
 0x14e   : > { %7770 = vmatprep.mubr.msk.f32.mxu1 %vm9056_vm0, %v12259_v1  ;;  %7741 = vmatprep.mubr.msk.f32.mxu0 %vm9056_vm0, %v12259_v1 }
 0x150   : > { %v1313_v21 = vpop.trf.xlu0  ;;  %v1144_v22 = vpop.trf.xlu1 }
 0x151   : > { %7771 = vmatmul.mubr.msk.f32.gmra.mxu1 %vm813_vm2, %v1313_v21  ;;  %7742 = vmatmul.mubr.msk.f32.gmra.mxu0 %vm813_vm2, %v1144_v22 }
 0x152   : > { %7775 = vmatprep.mubr.msk.f32.mxu0 %vm9056_vm0, %v12259_v1  ;;  %7804 = vmatprep.mubr.msk.f32.mxu1 %vm9056_vm0, %v12259_v1 }
 0x154   : > { %v1936_v24 = vpop.trf.xlu1  ;;  %v2105_v25 = vpop.trf.xlu0 }
 0x158   : > { %v9307_v28 = vpop.trf.xlu1  ;;  %v9309_v29 = vpop.trf.xlu0 }
 0x15c   : > { %v9311_v30 = vpop.trf.xlu1  ;;  %v9313_v31 = vpop.trf.xlu0 }
 0x160   : > { %v9315_v32 = vpop.trf.xlu1  ;;  %v9317_v33 = vpop.trf.xlu0 }
 0x164   : > { %v9319_v34 = vpop.trf.xlu1  ;;  %v9321_v35 = vpop.trf.xlu0 }
 0x168   : > { %v9323_v36 = vpop.trf.xlu1  ;;  %v9325_v37 = vpop.trf.xlu0 }
 0x16c   : > { %v9327_v38 = vpop.trf.xlu1  ;;  %v9329_v39 = vpop.trf.xlu0 }
 0x170   : > { %v9331_v41 = vpop.trf.xlu1  ;;  %v9333_v42 = vpop.trf.xlu0 }
 0x174   : > { %v9335_v40 = vpop.trf.xlu1  ;;  %v9337_v43 = vpop.trf.xlu0 }
 0x178   : > { %v9339_v44 = vpop.trf.xlu1  ;;  %v9341_v45 = vpop.trf.xlu0 }
 0x17c   : > { %v9343_v46 = vpop.trf.xlu1  ;;  %v9345_v47 = vpop.trf.xlu0 }
 0x180   : > { %v9347_v48 = vpop.trf.xlu1  ;;  %v9349_v49 = vpop.trf.xlu0 }
 0x184   : > { %v9351_v50 = vpop.trf.xlu1  ;;  %v9353_v51 = vpop.trf.xlu0 }
 0x188   : > { %v9355_v52 = vpop.trf.xlu1  ;;  %v9357_v53 = vpop.trf.xlu0 }
 0x18c   : > { %v9359_v54 = vpop.trf.xlu1  ;;  %v9361_v55 = vpop.trf.xlu0 }
 0x190   : > { %v9363_v56 = vpop.trf.xlu1  ;;  %v9365_v57 = vpop.trf.xlu0 }
 0x194   : > { %v9367_v60 = vpop.trf.xlu1  ;;  %v9369_v61 = vpop.trf.xlu0 }
 0x198   : > { %v9371_v62 = vpop.trf.xlu1  ;;  %v9373_v63 = vpop.trf.xlu0 }
 0x1a5   : > { %v480_v0 = vpop.permute.xlu1 %479 }
 0x1a6   : > { %v522_v6 = vmul.f32 %v9162_v27, %v480_v0 }
 0x1a9   : > { %v429_v3 = vpop.permute.xlu1 %428 }
 0x1aa   : > { %v510_v14 = vmul.f32 %v9162_v27, %v429_v3  ;;  %v12390_v3 = vmov 0.0  }
 0x1ad   : > { %v603_v19 = vpop.permute.xlu1 %602 }
 0x1ae   : > { %v310_v2 = vpop.permute.xlu0 %309 }
 0x1af   : > { %v372_v11 = vmul.f32 %v9159_v26, %v310_v2  ;;  %v396_v18 = vmul.f32 %v9179_v59, %v310_v2 }
 0x1b1   : > { %v546_v21 = vadd.f32 %v522_v6, %v372_v11  ;;  %v570_v5 = vadd.f32 %v522_v6, %v396_v18 }
 0x1b2   : > { %v259_v15 = vpop.permute.xlu0 %258 }
 0x1b3   : > { %v360_v16 = vmul.f32 %v9156_v23, %v259_v15  ;;  %v384_v17 = vmul.f32 %v9176_v58, %v259_v15 }
 0x1b5   : > { %v534_v20 = vadd.f32 %v510_v14, %v360_v16  ;;  %v558_v22 = vadd.f32 %v510_v14, %v384_v17 }
 0x1b6   : > { %v654_v1 = vpop.permute.xlu0 %653 }
 0x1b7   : > { %v684_v13 = vadd.f32 %v603_v19, %v534_v20  ;;  %v696_v4 = vadd.f32 %v654_v1, %v546_v21  ;;  %v708_v0 = vadd.f32 %v603_v19, %v558_v22  ;;  %v720_v26 = vadd.f32 %v654_v1, %v570_v5 }
 0x1b9   : > { %7774 = vmatpush3.msra.mxu0 %v684_v13  ;;  %7803 = vmatpush3.msra.mxu1 %v696_v4 }
 0x1ba   : > { %7776 = vmatmul.mubr.msk.f32.vlgmr.msra.gmra.mxu0 %vm813_vm2, %v1936_v24  ;;  %7805 = vmatmul.mubr.msk.f32.vlgmr.msra.gmra.mxu1 %vm813_vm2, %v2105_v25 }
 0x1bb   : > { %7831 = vmatprep.subr.mxu0 %v12390_v3  ;;  %7860 = vmatprep.subr.mxu1 %v12390_v3 }
 0x1bc   : > { %7832 = vmatpush3.msra.mxu0 %v708_v0  ;;  %7861 = vmatpush3.msra.mxu1 %v720_v26 }
 0x1bd   : > { %7778 = vmatprep.mubr.msk.f32.mxu0 %vm9056_vm0, %v12390_v3  ;;  %7807 = vmatprep.mubr.msk.f32.mxu1 %vm9056_vm0, %v12390_v3 }
 0x1be   : > { %7779 = vmatmul.mubr.msk.f32.gmra.mxu0 %vm813_vm2, %v9307_v28  ;;  %7808 = vmatmul.mubr.msk.f32.gmra.mxu1 %vm813_vm2, %v9309_v29 }
 0x1bf   : > { %7781 = vmatprep.mubr.msk.f32.mxu0 %vm9056_vm0, %v12390_v3  ;;  %7810 = vmatprep.mubr.msk.f32.mxu1 %vm9056_vm0, %v12390_v3 }
 0x1c0   : > { %7910 = vmatprep.subr.mxu1 %v12390_v3  ;;  %7889 = vmatprep.subr.mxu0 %v12390_v3 }
 0x1c2   : > { %7782 = vmatmul.mubr.msk.f32.gmra.mxu0 %vm813_vm2, %v9311_v30  ;;  %7811 = vmatmul.mubr.msk.f32.gmra.mxu1 %vm813_vm2, %v9313_v31 }
 0x1c3   : > { %7784 = vmatprep.mubr.msk.f32.mxu0 %vm9056_vm0, %v12390_v3  ;;  %7813 = vmatprep.mubr.msk.f32.mxu1 %vm9056_vm0, %v12390_v3 }
 0x1c6   : > { %7785 = vmatmul.mubr.msk.f32.gmra.mxu0 %vm813_vm2, %v9315_v32  ;;  %7814 = vmatmul.mubr.msk.f32.gmra.mxu1 %vm813_vm2, %v9317_v33 }
 0x1c7   : > { %7787 = vmatprep.mubr.msk.f32.mxu0 %vm9056_vm0, %v12390_v3  ;;  %7816 = vmatprep.mubr.msk.f32.mxu1 %vm9056_vm0, %v12390_v3 }
 0x1ca   : > { %7788 = vmatmul.mubr.msk.f32.gmra.mxu0 %vm813_vm2, %v9319_v34  ;;  %7817 = vmatmul.mubr.msk.f32.gmra.mxu1 %vm813_vm2, %v9321_v35 }
 0x1cb   : > { %7790 = vmatprep.mubr.msk.f32.mxu0 %vm9056_vm0, %v12390_v3  ;;  %7819 = vmatprep.mubr.msk.f32.mxu1 %vm9056_vm0, %v12390_v3 }
 0x1cd   : > { %v907_v1 = vpop.f32.mrf.mxu0  ;;  %v1076_v4 = vpop.f32.mrf.mxu1 }
 0x1ce   : > { %v9423_v5 = vmul.f32 0.35355338, %v907_v1  ;;  %v9425_v13 = vmul.f32 0.35355338, %v1076_v4  ;;  %7791 = vmatmul.mubr.msk.f32.gmra.mxu0 %vm813_vm2, %v9323_v36  ;;  %7820 = vmatmul.mubr.msk.f32.gmra.mxu1 %vm813_vm2, %v9325_v37 }
 0x1cf   : > { %v7661_v26 = vpop.f32.mrf.mxu0  ;;  %v7690_v24 = vpop.f32.mrf.mxu1  ;;  %7793 = vmatprep.mubr.msk.f32.mxu0 %vm9056_vm0, %v12390_v3  ;;  %7822 = vmatprep.mubr.msk.f32.mxu1 %vm9056_vm0, %v12390_v3 }
 0x1d0   : > { %12391 = vst [vmem:[#allocation15_spill] sm:$0xff] %v9423_v5  ;;  %12392 = vst [vmem:[#allocation16_spill] sm:$0xff] %v9425_v13  ;;  %v1523_v25 = vsel %vm1494_vm3, %v9425_v13, -inf  ;;  %v1495_v31 = vsel %vm1494_vm3, %v9423_v5, -inf }
 0x1d1   : > { %v912_v28 = vpop.f32.mrf.mxu0  ;;  %1524 = vmax.xlane.f32.xlu1 %v1523_v25  ;;  %v1081_v29 = vpop.f32.mrf.mxu1 }
 0x1d2   : > { %v9437_v30 = vmul.f32 0.35355338, %v1081_v29  ;;  %7794 = vmatmul.mubr.msk.f32.gmra.mxu0 %vm813_vm2, %v9327_v38  ;;  %7823 = vmatmul.mubr.msk.f32.gmra.mxu1 %vm813_vm2, %v9329_v39  ;;  %v9449_v36 = vmul.f32 0.35355338, %v912_v28 }
 0x1d3   : > { %v7664_v32 = vpop.f32.mrf.mxu0  ;;  %v7693_v33 = vpop.f32.mrf.mxu1  ;;  %7796 = vmatprep.mubr.msk.f32.mxu0 %vm9056_vm0, %v12390_v3  ;;  %7825 = vmatprep.mubr.msk.f32.mxu1 %vm9056_vm0, %v12390_v3 }
 0x1d4   : > { %12393 = vst [vmem:[#allocation17_spill] sm:$0xff] %v9437_v30  ;;  %v1526_v37 = vsel %vm1494_vm3, %v9437_v30, -inf }
 0x1d5   : > { %v917_v34 = vpop.f32.mrf.mxu0  ;;  %1496 = vmax.xlane.f32.xlu1 %v1495_v31  ;;  %v1086_v35 = vpop.f32.mrf.mxu1 }
 0x1d6   : > { %7797 = vmatmul.mubr.msk.f32.gmra.mxu0 %vm813_vm2, %v9331_v41  ;;  %7826 = vmatmul.mubr.msk.f32.gmra.mxu1 %vm813_vm2, %v9333_v42  ;;  %v9461_v11 = vmul.f32 0.35355338, %v1086_v35  ;;  %v1498_v41 = vsel %vm1494_vm3, %v9449_v36, -inf  ;;  %v9475_v17 = vmul.f32 0.35355338, %v917_v34 }
 0x1d7   : > { %v7667_v38 = vpop.f32.mrf.mxu0  ;;  %v7696_v39 = vpop.f32.mrf.mxu1  ;;  %7799 = vmatprep.mubr.msk.f32.mxu0 %vm9056_vm0, %v12390_v3  ;;  %7828 = vmatprep.mubr.msk.f32.mxu1 %vm9056_vm0, %v12390_v3 }
 0x1d8   : > { %12394 = vst [vmem:[#allocation18_spill] sm:$0xff] %v9461_v11 }
 0x1d9   : > { %v922_v2 = vpop.f32.mrf.mxu0  ;;  %1527 = vmax.xlane.f32.xlu1 %v1526_v37  ;;  %v1091_v6 = vpop.f32.mrf.mxu1 }
 0x1da   : > { %7800 = vmatmul.mubr.msk.f32.gmra.mxu0 %vm813_vm2, %v9335_v40  ;;  %7829 = vmatmul.mubr.msk.f32.gmra.mxu1 %vm813_vm2, %v9337_v43  ;;  %v1529_v40 = vsel %vm1494_vm3, %v9461_v11, -inf  ;;  %v9489_v21 = vmul.f32 0.35355338, %v1091_v6  ;;  %v9505_v26 = vmul.f32 0.35355338, %v922_v2 }
 0x1db   : > { %v7670_v42 = vpop.f32.mrf.mxu0  ;;  %v7699_v14 = vpop.f32.mrf.mxu1  ;;  %7833 = vmatprep.mubr.msk.f32.mxu0 %vm9056_vm0, %v12390_v3  ;;  %7862 = vmatprep.mubr.msk.f32.mxu1 %vm9056_vm0, %v12390_v3 }
 0x1dc   : > { %12395 = vst [vmem:[#allocation19_spill] sm:$0xff] %v9489_v21  ;;  %v1532_v24 = vsel %vm1494_vm3, %v9489_v21, -inf  ;;  %v1504_v33 = vsel %vm1494_vm3, %v9505_v26, -inf }
 0x1dd   : > { %v9473_v15 = vpop.f32.mrf.mxu0  ;;  %1499 = vmax.xlane.f32.xlu1 %v1498_v41  ;;  %v1096_v16 = vpop.f32.mrf.mxu1 }
 0x1de   : > { %7834 = vmatmul.mubr.msk.f32.vlgmr.msra.gmra.mxu0 %vm813_vm2, %v9339_v44  ;;  %7863 = vmatmul.mubr.msk.f32.vlgmr.msra.gmra.mxu1 %vm813_vm2, %v9341_v45  ;;  %v1501_v45 = vsel %vm1494_vm3, %v9475_v17, -inf  ;;  %v9521_v32 = vmul.f32 0.35355338, %v1096_v16  ;;  %v9550_v41 = vmul.f32 0.35355338, %v9473_v15 }
 0x1df   : > { %v7673_v43 = vpop.f32.mrf.mxu0  ;;  %v7702_v18 = vpop.f32.mrf.mxu1  ;;  %7836 = vmatprep.mubr.msk.f32.mxu0 %vm9056_vm0, %v12390_v3  ;;  %7865 = vmatprep.mubr.msk.f32.mxu1 %vm9056_vm0, %v12390_v3 }
 0x1e0   : > { %12396 = vst [vmem:[#allocation20_spill] sm:$0xff] %v9521_v32  ;;  %v1535_v39 = vsel %vm1494_vm3, %v9521_v32, -inf }
 0x1e1   : > { %v932_v19 = vpop.f32.mrf.mxu0  ;;  %1530 = vmax.xlane.f32.xlu1 %v1529_v40  ;;  %v9487_v20 = vpop.f32.mrf.mxu1  ;;  %v1507_v40 = vsel %vm1494_vm3, %v9550_v41, -inf }
 0x1e2   : > { %v9491_v44 = vmul.f32 0.35355338, %v932_v19  ;;  %7837 = vmatmul.mubr.msk.f32.gmra.mxu0 %vm813_vm2, %v9343_v46  ;;  %7866 = vmatmul.mubr.msk.f32.gmra.mxu1 %vm813_vm2, %v9345_v47  ;;  %v9567_v16 = vmul.f32 0.35355338, %v9487_v20 }
 0x1e3   : > { %v7676_v22 = vpop.f32.mrf.mxu0  ;;  %v7705_v0 = vpop.f32.mrf.mxu1  ;;  %7839 = vmatprep.mubr.msk.f32.mxu0 %vm9056_vm0, %v12390_v3  ;;  %7868 = vmatprep.mubr.msk.f32.mxu1 %vm9056_vm0, %v12390_v3 }
 0x1e4   : > { %v1510_v1 = vsel %vm1494_vm3, %v9491_v44, -inf  ;;  %12399 = vst [vmem:[#allocation23_spill] sm:$0xff] %v9567_v16  ;;  %v1538_v20 = vsel %vm1494_vm3, %v9567_v16, -inf }
 0x1e5   : > { %v937_v4 = vpop.f32.mrf.mxu0  ;;  %1511 = vmax.xlane.f32.xlu0 %v1510_v1  ;;  %1502 = vmax.xlane.f32.xlu1 %v1501_v45  ;;  %v1106_v46 = vpop.f32.mrf.mxu1 }
 0x1e6   : > { %v9507_v47 = vmul.f32 0.35355338, %v937_v4  ;;  %7840 = vmatmul.mubr.msk.f32.gmra.mxu0 %vm813_vm2, %v9347_v48  ;;  %7869 = vmatmul.mubr.msk.f32.gmra.mxu1 %vm813_vm2, %v9349_v49  ;;  %v9583_v19 = vmul.f32 0.35355338, %v1106_v46 }
 0x1e7   : > { %v7679_v25 = vpop.f32.mrf.mxu0  ;;  %v7708_v28 = vpop.f32.mrf.mxu1  ;;  %7842 = vmatprep.mubr.msk.f32.mxu0 %vm9056_vm0, %v12390_v3  ;;  %7871 = vmatprep.mubr.msk.f32.mxu1 %vm9056_vm0, %v12390_v3 }
 0x1e8   : > { %v1513_v29 = vsel %vm1494_vm3, %v9507_v47, -inf  ;;  %12400 = vst [vmem:[#allocation24_spill] sm:$0xff] %v9583_v19  ;;  %v1541_v1 = vsel %vm1494_vm3, %v9583_v19, -inf }
 0x1e9   : > { %v942_v31 = vpop.f32.mrf.mxu0  ;;  %1514 = vmax.xlane.f32.xlu0 %v1513_v29  ;;  %1533 = vmax.xlane.f32.xlu1 %v1532_v24  ;;  %v1111_v48 = vpop.f32.mrf.mxu1 }
 0x1ea   : > { %v9523_v49 = vmul.f32 0.35355338, %v942_v31  ;;  %7843 = vmatmul.mubr.msk.f32.gmra.mxu0 %vm813_vm2, %v9351_v50  ;;  %7872 = vmatmul.mubr.msk.f32.gmra.mxu1 %vm813_vm2, %v9353_v51  ;;  %v9599_v0 = vmul.f32 0.35355338, %v1111_v48 }
 0x1eb   : > { %v7682_v34 = vpop.f32.mrf.mxu0  ;;  %v7711_v35 = vpop.f32.mrf.mxu1  ;;  %7845 = vmatprep.mubr.msk.f32.mxu0 %vm9056_vm0, %v12390_v3  ;;  %7874 = vmatprep.mubr.msk.f32.mxu1 %vm9056_vm0, %v12390_v3 }
 0x1ec   : > { %v1516_v37 = vsel %vm1494_vm3, %v9523_v49, -inf  ;;  %12401 = vst [vmem:[#allocation25_spill] sm:$0xff] %v9599_v0  ;;  %v1544_v25 = vsel %vm1494_vm3, %v9599_v0, -inf }
 0x1ed   : > { %v947_v38 = vpop.f32.mrf.mxu0  ;;  %1517 = vmax.xlane.f32.xlu0 %v1516_v37  ;;  %1505 = vmax.xlane.f32.xlu1 %v1504_v33  ;;  %v1116_v50 = vpop.f32.mrf.mxu1 }
 0x1ee   : > { %v9537_v51 = vmul.f32 0.35355338, %v947_v38  ;;  %7846 = vmatmul.mubr.msk.f32.gmra.mxu0 %vm813_vm2, %v9355_v52  ;;  %7875 = vmatmul.mubr.msk.f32.gmra.mxu1 %vm813_vm2, %v9357_v53  ;;  %v9615_v24 = vmul.f32 0.35355338, %v1116_v50 }
 0x1ef   : > { %v7714_v2 = vpop.f32.mrf.mxu1  ;;  %7848 = vmatprep.mubr.msk.f32.mxu0 %vm9056_vm0, %v12390_v3  ;;  %7877 = vmatprep.mubr.msk.f32.mxu1 %vm9056_vm0, %v12390_v3  ;;  %v7685_v6 = vpop.f32.mrf.mxu0 }
 0x1f0   : > { %v1520_v52 = vsel %vm1519_vm4, %v9537_v51, -inf  ;;  %12402 = vst [vmem:[#allocation26_spill] sm:$0xff] %v9615_v24  ;;  %v1547_v31 = vsel %vm1519_vm4, %v9615_v24, -inf }
 0x1f1   : > { %1521 = vmax.xlane.f32.xlu0 %v1520_v52  ;;  %1536 = vmax.xlane.f32.xlu1 %v1535_v39  ;;  %v9554_v53 = vpop.f32.mrf.mxu1  ;;  %v9556_v42 = vpop.f32.mrf.mxu0 }
 0x1f2   : > { %12397 = vst [vmem:[#allocation21_spill] sm:$0xff] %v9554_v53  ;;  %12398 = vst [vmem:[#allocation22_spill] sm:$0xff] %v9556_v42  ;;  %7849 = vmatmul.mubr.msk.f32.gmra.mxu0 %vm813_vm2, %v9359_v54  ;;  %7878 = vmatmul.mubr.msk.f32.gmra.mxu1 %vm813_vm2, %v9361_v55 }
 0x1f3   : > { %v7748_v14 = vpop.f32.mrf.mxu1  ;;  %7851 = vmatprep.mubr.msk.f32.mxu0 %vm9056_vm0, %v12390_v3  ;;  %7880 = vmatprep.mubr.msk.f32.mxu1 %vm9056_vm0, %v12390_v3  ;;  %v7719_v15 = vpop.f32.mrf.mxu0 }
 0x1f5   : > { %1508 = vmax.xlane.f32.xlu1 %v1507_v40  ;;  %v9571_v43 = vpop.f32.mrf.mxu1  ;;  %v9573_v54 = vpop.f32.mrf.mxu0 }
 0x1f6   : > { %7852 = vmatmul.mubr.msk.f32.gmra.mxu0 %vm813_vm2, %v9363_v56  ;;  %7881 = vmatmul.mubr.msk.f32.gmra.mxu1 %vm813_vm2, %v9365_v57 }
 0x1f7   : > { %v7751_v55 = vpop.f32.mrf.mxu1  ;;  %7854 = vmatprep.mubr.msk.f32.mxu0 %vm9056_vm0, %v12390_v3  ;;  %7883 = vmatprep.mubr.msk.f32.mxu1 %vm9056_vm0, %v12390_v3  ;;  %v7722_v18 = vpop.f32.mrf.mxu0 }
 0x1f9   : > { %1539 = vmax.xlane.f32.xlu1 %v1538_v20  ;;  %v9587_v45 = vpop.f32.mrf.mxu1  ;;  %v9589_v56 = vpop.f32.mrf.mxu0 }
 0x1fa   : > { %7855 = vmatmul.mubr.msk.f32.gmra.mxu0 %vm813_vm2, %v9367_v60  ;;  %7884 = vmatmul.mubr.msk.f32.gmra.mxu1 %vm813_vm2, %v9369_v61 }
 0x1fb   : > { %v7754_v57 = vpop.f32.mrf.mxu1  ;;  %7857 = vmatprep.mubr.msk.f32.mxu0 %vm9056_vm0, %v12390_v3  ;;  %7886 = vmatprep.mubr.msk.f32.mxu1 %vm9056_vm0, %v12390_v3  ;;  %v7725_v22 = vpop.f32.mrf.mxu0 }
 0x1fd   : > { %1542 = vmax.xlane.f32.xlu1 %v1541_v1  ;;  %v9603_v4 = vpop.f32.mrf.mxu1  ;;  %v9605_v60 = vpop.f32.mrf.mxu0 }
 0x1fe   : > { %7858 = vmatmul.mubr.msk.f32.gmra.mxu0 %vm813_vm2, %v9371_v62  ;;  %7887 = vmatmul.mubr.msk.f32.gmra.mxu1 %vm813_vm2, %v9373_v63 }
 0x1ff   : > { %v7757_v61 = vpop.f32.mrf.mxu1  ;;  %v7728_v46 = vpop.f32.mrf.mxu0  ;;  %7928 = vmatprep.mubr.msk.f32.mxu1 %vm9056_vm0, %v12390_v3  ;;  %7907 = vmatprep.mubr.msk.f32.mxu0 %vm9056_vm0, %v12390_v3 }
 0x201   : > { %1545 = vmax.xlane.f32.xlu1 %v1544_v25  ;;  %v9619_v28 = vpop.f32.mrf.mxu1  ;;  %v9621_v62 = vpop.f32.mrf.mxu0 }
 0x203   : > { %v7760_v29 = vpop.f32.mrf.mxu1  ;;  %v7731_v63 = vpop.f32.mrf.mxu0 }
 0x205   : > { %1548 = vmax.xlane.f32.xlu1 %v1547_v31  ;;  %v9625_v48 = vpop.f32.mrf.mxu1  ;;  %v9627_v33 = vpop.f32.mrf.mxu0 }
 0x207   : > { %v7763_v34 = vpop.f32.mrf.mxu1  ;;  %v7734_v35 = vpop.f32.mrf.mxu0 }
 0x209   : > { %v1444_v37 = vpop.f32.mrf.mxu1  ;;  %v9629_v38 = vpop.f32.mrf.mxu0 }
 0x20a   : > { %v9631_v50 = vmul.f32 0.35355338, %v1444_v37 }
 0x20b   : > { %v7766_v39 = vpop.f32.mrf.mxu1  ;;  %v7737_v2 = vpop.f32.mrf.mxu0 }
 0x20c   : > { %12403 = vst [vmem:[#allocation27_spill] sm:$0xff] %v9631_v50  ;;  %v1595_v6 = vsel %vm1494_vm3, %v9631_v50, -inf }
 0x20d   : > { %1596 = vmax.xlane.f32.xlu1 %v1595_v6  ;;  %v1449_v52 = vpop.f32.mrf.mxu1  ;;  %v1280_v14 = vpop.f32.mrf.mxu0 }
 0x20e   : > { %v9635_v15 = vmul.f32 0.35355338, %v1449_v52  ;;  %v9637_v40 = vmul.f32 0.35355338, %v1280_v14 }
 0x20f   : > { %v7769_v55 = vpop.f32.mrf.mxu1  ;;  %v7740_v18 = vpop.f32.mrf.mxu0 }
 0x210   : > { %12404 = vst [vmem:[#allocation28_spill] sm:$0xff] %v9635_v15  ;;  %12405 = vst [vmem:[#allocation29_spill] sm:$0xff] %v9637_v40  ;;  %v1598_v20 = vsel %vm1494_vm3, %v9635_v15, -inf  ;;  %v1571_v1 = vsel %vm1494_vm3, %v9637_v40, -inf }
 0x211   : > { %1599 = vmax.xlane.f32.xlu1 %v1598_v20  ;;  %v1454_v57 = vpop.f32.mrf.mxu1  ;;  %v1285_v22 = vpop.f32.mrf.mxu0 }
 0x212   : > { %v9643_v61 = vmul.f32 0.35355338, %v1454_v57  ;;  %v9645_v29 = vmul.f32 0.35355338, %v1285_v22 }
 0x213   : > { %v7743_v46 = vpop.f32.mrf.mxu0  ;;  %v7772_v25 = vpop.f32.mrf.mxu1 }
 0x214   : > { %12406 = vst [vmem:[#allocation30_spill] sm:$0xff] %v9643_v61  ;;  %12407 = vst [vmem:[#allocation31_spill] sm:$0xff] %v9645_v29  ;;  %v1601_v63 = vsel %vm1519_vm4, %v9643_v61, -inf  ;;  %v1574_v31 = vsel %vm1519_vm4, %v9645_v29, -inf }
 0x215   : > { %1572 = vmax.xlane.f32.xlu1 %v1571_v1 }
 0x219   : > { %1602 = vmax.xlane.f32.xlu1 %v1601_v63 }
 0x21d   : > { %1575 = vmax.xlane.f32.xlu1 %v1574_v31 }
 0x27a   : > { %v2045_v34 = vpop.f32.mrf.mxu0  ;;  %v2214_v37 = vpop.f32.mrf.mxu1 }
 0x27b   : > { %v9651_v35 = vmul.f32 0.35355338, %v2045_v34  ;;  %v9653_v39 = vmul.f32 0.35355338, %v2214_v37 }
 0x27c   : > { %v7777_v2 = vpop.f32.mrf.mxu0  ;;  %v7806_v6 = vpop.f32.mrf.mxu1 }
 0x27d   : > { %v2632_v52 = vsel %vm1494_vm3, %v9651_v35, -inf  ;;  %v2659_v55 = vsel %vm1494_vm3, %v9653_v39, -inf }
 0x27e   : > { %2633 = vmax.xlane.f32.xlu0 %v2632_v52  ;;  %v2050_v14 = vpop.f32.mrf.mxu0  ;;  %2660 = vmax.xlane.f32.xlu1 %v2659_v55  ;;  %v2219_v20 = vpop.f32.mrf.mxu1 }
 0x27f   : > { %v9659_v18 = vmul.f32 0.35355338, %v2050_v14  ;;  %v9661_v57 = vmul.f32 0.35355338, %v2219_v20 }
 0x280   : > { %v7780_v22 = vpop.f32.mrf.mxu0  ;;  %v7809_v1 = vpop.f32.mrf.mxu1 }
 0x281   : > { %v2635_v46 = vsel %vm1494_vm3, %v9659_v18, -inf  ;;  %v2662_v63 = vsel %vm1494_vm3, %v9661_v57, -inf }
 0x282   : > { %2636 = vmax.xlane.f32.xlu0 %v2635_v46  ;;  %v2055_v25 = vpop.f32.mrf.mxu0  ;;  %2663 = vmax.xlane.f32.xlu1 %v2662_v63  ;;  %v2224_v34 = vpop.f32.mrf.mxu1 }
 0x283   : > { %v9667_v31 = vmul.f32 0.35355338, %v2055_v25  ;;  %v9669_v37 = vmul.f32 0.35355338, %v2224_v34 }
 0x284   : > { %v7783_v2 = vpop.f32.mrf.mxu0  ;;  %v7812_v6 = vpop.f32.mrf.mxu1 }
 0x285   : > { %v2638_v52 = vsel %vm1494_vm3, %v9667_v31, -inf  ;;  %v2665_v55 = vsel %vm1494_vm3, %v9669_v37, -inf }
 0x286   : > { %2639 = vmax.xlane.f32.xlu0 %v2638_v52  ;;  %v2060_v14 = vpop.f32.mrf.mxu0  ;;  %2666 = vmax.xlane.f32.xlu1 %v2665_v55  ;;  %v2229_v22 = vpop.f32.mrf.mxu1 }
 0x287   : > { %v9675_v20 = vmul.f32 0.35355338, %v2060_v14  ;;  %v9677_v1 = vmul.f32 0.35355338, %v2229_v22 }
 0x288   : > { %v7786_v46 = vpop.f32.mrf.mxu0  ;;  %v7815_v25 = vpop.f32.mrf.mxu1 }
 0x289   : > { %v2641_v63 = vsel %vm1494_vm3, %v9675_v20, -inf  ;;  %v2668_v2 = vsel %vm1494_vm3, %v9677_v1, -inf }
 0x28a   : > { %2642 = vmax.xlane.f32.xlu0 %v2641_v63  ;;  %v2065_v34 = vpop.f32.mrf.mxu0  ;;  %2669 = vmax.xlane.f32.xlu1 %v2668_v2  ;;  %v2234_v52 = vpop.f32.mrf.mxu1 }
 0x28b   : > { %v9683_v6 = vmul.f32 0.35355338, %v2065_v34  ;;  %v9685_v14 = vmul.f32 0.35355338, %v2234_v52 }
 0x28c   : > { %v7789_v55 = vpop.f32.mrf.mxu0  ;;  %v7818_v58 = vpop.f32.mrf.mxu1 }
 0x28d   : > { %v2644_v22 = vsel %vm1494_vm3, %v9683_v6, -inf  ;;  %v2671_v25 = vsel %vm1494_vm3, %v9685_v14, -inf }
 0x28e   : > { %2645 = vmax.xlane.f32.xlu0 %v2644_v22  ;;  %v2070_v46 = vpop.f32.mrf.mxu0  ;;  %2672 = vmax.xlane.f32.xlu1 %v2671_v25  ;;  %v2239_v23 = vpop.f32.mrf.mxu1 }
 0x28f   : > { %v9691_v63 = vmul.f32 0.35355338, %v2070_v46  ;;  %v9693_v34 = vmul.f32 0.35355338, %v2239_v23 }
 0x290   : > { %v7792_v2 = vpop.f32.mrf.mxu0  ;;  %v7821_v15 = vpop.f32.mrf.mxu1 }
 0x291   : > { %v2647_v52 = vsel %vm1494_vm3, %v9691_v63, -inf  ;;  %v2674_v55 = vsel %vm1494_vm3, %v9693_v34, -inf }
 0x292   : > { %2648 = vmax.xlane.f32.xlu0 %v2647_v52  ;;  %v2075_v58 = vpop.f32.mrf.mxu0  ;;  %2675 = vmax.xlane.f32.xlu1 %v2674_v55  ;;  %v2244_v61 = vpop.f32.mrf.mxu1 }
 0x293   : > { %v9699_v22 = vmul.f32 0.35355338, %v2075_v58  ;;  %v9701_v46 = vmul.f32 0.35355338, %v2244_v61  ;;  %v9709_v55 = vpop.xlane.xlu1 %1524 }
 0x294   : > { %v7795_v25 = vpop.f32.mrf.mxu0  ;;  %v7824_v13 = vpop.f32.mrf.mxu1  ;;  %12408 = vst [vmem:[#allocation32_spill] sm:$0xff] %v9709_v55 }
 0x295   : > { %v2650_v23 = vsel %vm1494_vm3, %v9699_v22, -inf  ;;  %v2677_v2 = vsel %vm1494_vm3, %v9701_v46, -inf }
 0x296   : > { %2651 = vmax.xlane.f32.xlu0 %v2650_v23  ;;  %v2080_v15 = vpop.f32.mrf.mxu0  ;;  %2678 = vmax.xlane.f32.xlu1 %v2677_v2  ;;  %v2249_v52 = vpop.f32.mrf.mxu1 }
 0x297   : > { %v9707_v30 = vmul.f32 0.35355338, %v2249_v52  ;;  %v9711_v61 = vmul.f32 0.35355338, %v2080_v15  ;;  %v9723_v55 = vpop.xlane.xlu1 %1496 }
 0x298   : > { %v7798_v58 = vpop.f32.mrf.mxu0  ;;  %v7827_v50 = vpop.f32.mrf.mxu1  ;;  %12409 = vst [vmem:[#allocation33_spill] sm:$0xff] %v9723_v55 }
 0x299   : > { %v2680_v13 = vsel %vm1494_vm3, %v9707_v30, -inf  ;;  %v2653_v15 = vsel %vm1494_vm3, %v9711_v61, -inf }
 0x29a   : > { %v2085_v25 = vpop.f32.mrf.mxu0  ;;  %2681 = vmax.xlane.f32.xlu0 %v2680_v13  ;;  %v2254_v23 = vpop.f32.mrf.mxu1 }
 0x29b   : > { %v9715_v11 = vmul.f32 0.35355338, %v2085_v25  ;;  %v9719_v52 = vmul.f32 0.35355338, %v2254_v23 }
 0x29c   : > { %v7801_v21 = vpop.f32.mrf.mxu0  ;;  %v7830_v3 = vpop.f32.mrf.mxu1 }
 0x29d   : > { %v2656_v2 = vsel %vm1519_vm4, %v9715_v11, -inf  ;;  %v2683_v23 = vsel %vm1519_vm4, %v9719_v52, -inf }
 0x29e   : > { %v2383_v50 = vpop.f32.mrf.mxu0  ;;  %2657 = vmax.xlane.f32.xlu1 %v2656_v2  ;;  %2654 = vmax.xlane.f32.xlu0 %v2653_v15  ;;  %v2552_v58 = vpop.f32.mrf.mxu1 }
 0x29f   : > { %v9725_v25 = vmul.f32 0.35355338, %v2552_v58  ;;  %v9727_v21 = vmul.f32 0.35355338, %v2383_v50  ;;  %v9735_v58 = vpop.xlane.xlu1 %1527 }
 0x2a0   : > { %v7835_v13 = vpop.f32.mrf.mxu0  ;;  %v7864_v32 = vpop.f32.mrf.mxu1  ;;  %12413 = vst [vmem:[#allocation37_spill] sm:$0xff] %v9735_v58 }
 0x2a1   : > { %12410 = vst [vmem:[#allocation34_spill] sm:$0xff] %v9725_v25  ;;  %12411 = vst [vmem:[#allocation35_spill] sm:$0xff] %v9727_v21  ;;  %v2713_v2 = vsel %vm1494_vm3, %v9725_v25, -inf  ;;  %v2686_v50 = vsel %vm1494_vm3, %v9727_v21, -inf }
 0x2a2   : > { %v2388_v3 = vpop.f32.mrf.mxu0  ;;  %2684 = vmax.xlane.f32.xlu0 %v2683_v23  ;;  %2714 = vmax.xlane.f32.xlu1 %v2713_v2  ;;  %v2557_v16 = vpop.f32.mrf.mxu1 }
 0x2a3   : > { %v9733_v15 = vmul.f32 0.35355338, %v2557_v16  ;;  %v9737_v13 = vmul.f32 0.35355338, %v2388_v3 }
 0x2a4   : > { %v7838_v19 = vpop.f32.mrf.mxu0  ;;  %v7867_v0 = vpop.f32.mrf.mxu1 }
 0x2a5   : > { %12412 = vst [vmem:[#allocation36_spill] sm:$0xff] %v9733_v15  ;;  %12414 = vst [vmem:[#allocation38_spill] sm:$0xff] %v9737_v13  ;;  %v2716_v24 = vsel %vm1494_vm3, %v9733_v15, -inf  ;;  %v2689_v3 = vsel %vm1494_vm3, %v9737_v13, -inf  ;;  %v9751_v15 = vpop.xlane.xlu1 %1499 }
 0x2a6   : > { %v2393_v32 = vpop.f32.mrf.mxu0  ;;  %2687 = vmax.xlane.f32.xlu0 %v2686_v50  ;;  %2717 = vmax.xlane.f32.xlu1 %v2716_v24  ;;  %v2562_v23 = vpop.f32.mrf.mxu1 }
 0x2a7   : > { %v9743_v2 = vmul.f32 0.35355338, %v2562_v23  ;;  %v9745_v19 = vmul.f32 0.35355338, %v2393_v32 }
 0x2a8   : > { %v7841_v16 = vpop.f32.mrf.mxu0  ;;  %v7870_v25 = vpop.f32.mrf.mxu1 }
 0x2a9   : > { %12415 = vst [vmem:[#allocation39_spill] sm:$0xff] %v9743_v2  ;;  %12416 = vst [vmem:[#allocation40_spill] sm:$0xff] %v9745_v19  ;;  %v2719_v58 = vsel %vm1494_vm3, %v9743_v2, -inf  ;;  %v2692_v32 = vsel %vm1494_vm3, %v9745_v19, -inf }
 0x2aa   : > { %v2398_v0 = vpop.f32.mrf.mxu0  ;;  %2690 = vmax.xlane.f32.xlu0 %v2689_v3  ;;  %2720 = vmax.xlane.f32.xlu1 %v2719_v58  ;;  %v2567_v21 = vpop.f32.mrf.mxu1 }
 0x2ab   : > { %v9753_v24 = vmul.f32 0.35355338, %v2567_v21  ;;  %v9755_v16 = vmul.f32 0.35355338, %v2398_v0  ;;  %v9763_v21 = vpop.xlane.xlu1 %1530 }
 0x2ac   : > { %v7844_v50 = vpop.f32.mrf.mxu0  ;;  %v7873_v23 = vpop.f32.mrf.mxu1  ;;  %12420 = vst [vmem:[#allocation44_spill] sm:$0xff] %v9763_v21 }
 0x2ad   : > { %12417 = vst [vmem:[#allocation41_spill] sm:$0xff] %v9753_v24  ;;  %12418 = vst [vmem:[#allocation42_spill] sm:$0xff] %v9755_v16  ;;  %v2722_v13 = vsel %vm1494_vm3, %v9753_v24, -inf  ;;  %v2695_v23 = vsel %vm1494_vm3, %v9755_v16, -inf }
 0x2ae   : > { %v2403_v25 = vpop.f32.mrf.mxu0  ;;  %2693 = vmax.xlane.f32.xlu0 %v2692_v32  ;;  %2723 = vmax.xlane.f32.xlu1 %v2722_v13  ;;  %v2572_v3 = vpop.f32.mrf.mxu1 }
 0x2af   : > { %v9761_v58 = vmul.f32 0.35355338, %v2572_v3  ;;  %v9765_v50 = vmul.f32 0.35355338, %v2403_v25  ;;  %v9779_v40 = vpop.xlane.xlu1 %1502 }
 0x2b0   : > { %v7847_v42 = vpop.f32.mrf.mxu0  ;;  %v7876_v2 = vpop.f32.mrf.mxu1 }
 0x2b1   : > { %12419 = vst [vmem:[#allocation43_spill] sm:$0xff] %v9761_v58  ;;  %v2725_v19 = vsel %vm1494_vm3, %v9761_v58, -inf  ;;  %v2698_v25 = vsel %vm1494_vm3, %v9765_v50, -inf }
 0x2b2   : > { %v2408_v0 = vpop.f32.mrf.mxu0  ;;  %2696 = vmax.xlane.f32.xlu0 %v2695_v23  ;;  %2726 = vmax.xlane.f32.xlu1 %v2725_v19  ;;  %v2577_v32 = vpop.f32.mrf.mxu1 }
 0x2b3   : > { %v9771_v13 = vmul.f32 0.35355338, %v2577_v32  ;;  %v9773_v42 = vmul.f32 0.35355338, %v2408_v0 }
 0x2b4   : > { %v7850_v3 = vpop.f32.mrf.mxu0  ;;  %v7879_v53 = vpop.f32.mrf.mxu1 }
 0x2b5   : > { %v2728_v21 = vsel %vm1494_vm3, %v9771_v13, -inf  ;;  %v2701_v0 = vsel %vm1494_vm3, %v9773_v42, -inf }
 0x2b6   : > { %v2413_v2 = vpop.f32.mrf.mxu0  ;;  %2699 = vmax.xlane.f32.xlu0 %v2698_v25  ;;  %2729 = vmax.xlane.f32.xlu1 %v2728_v21  ;;  %v2582_v16 = vpop.f32.mrf.mxu1 }
 0x2b7   : > { %v9781_v19 = vmul.f32 0.35355338, %v2582_v16  ;;  %v9783_v3 = vmul.f32 0.35355338, %v2413_v2  ;;  %v9791_v16 = vpop.xlane.xlu1 %1533 }
 0x2b8   : > { %v7853_v23 = vpop.f32.mrf.mxu0  ;;  %v7882_v32 = vpop.f32.mrf.mxu1  ;;  %12421 = vst [vmem:[#allocation45_spill] sm:$0xff] %v9791_v16 }
 0x2b9   : > { %v2731_v24 = vsel %vm1494_vm3, %v9781_v19, -inf  ;;  %v2704_v32 = vsel %vm1494_vm3, %v9783_v3, -inf }
 0x2ba   : > { %v2418_v53 = vpop.f32.mrf.mxu0  ;;  %2702 = vmax.xlane.f32.xlu0 %v2701_v0  ;;  %2732 = vmax.xlane.f32.xlu1 %v2731_v24  ;;  %v2587_v25 = vpop.f32.mrf.mxu1 }
 0x2bb   : > { %v9789_v21 = vmul.f32 0.35355338, %v2587_v25  ;;  %v9793_v23 = vmul.f32 0.35355338, %v2418_v53  ;;  %v9808_v16 = vpop.xlane.xlu1 %1505 }
 0x2bc   : > { %v7856_v29 = vpop.f32.mrf.mxu0  ;;  %v7885_v5 = vpop.f32.mrf.mxu1 }
 0x2bd   : > { %v2734_v55 = vsel %vm1494_vm3, %v9789_v21, -inf  ;;  %v9802_v5 = vmul.f32 0.35355338, %v9629_v38  ;;  %v2707_v29 = vsel %vm1494_vm3, %v9793_v23, -inf  ;;  %v9816_v38 = vmul.f32 0.35355338, %v9627_v33 }
 0x2be   : > { %v2423_v2 = vpop.f32.mrf.mxu0  ;;  %2705 = vmax.xlane.f32.xlu0 %v2704_v32  ;;  %2735 = vmax.xlane.f32.xlu1 %v2734_v55  ;;  %v2592_v0 = vpop.f32.mrf.mxu1  ;;  %v9811_v55 = vmul.f32 0.35355338, %v9625_v48 }
 0x2bf   : > { %v9799_v24 = vmul.f32 0.35355338, %v2592_v0  ;;  %12422 = vst [vmem:[#allocation46_spill] sm:$0xff] %v9802_v5  ;;  %v1568_v32 = vsel %vm1494_vm3, %v9802_v5, -inf  ;;  %12424 = vst [vmem:[#allocation48_spill] sm:$0xff] %v9816_v38  ;;  %v1565_v48 = vsel %vm1494_vm3, %v9816_v38, -inf }
 0x2c0   : > { %v7859_v25 = vpop.f32.mrf.mxu0  ;;  %v7888_v58 = vpop.f32.mrf.mxu1  ;;  %12423 = vst [vmem:[#allocation47_spill] sm:$0xff] %v9811_v55  ;;  %v1592_v0 = vsel %vm1494_vm3, %v9811_v55, -inf }
 0x2c1   : > { %v2737_v53 = vsel %vm1519_vm4, %v9799_v24, -inf  ;;  %v9818_v58 = vpop.xlane.xlu1 %1536  ;;  %v9823_v25 = vmul.f32 0.35355338, %v9619_v28 }
 0x2c2   : > { %2708 = vmax.xlane.f32.xlu0 %v2707_v29  ;;  %2738 = vmax.xlane.f32.xlu1 %v2737_v53  ;;  %12425 = vst [vmem:[#allocation49_spill] sm:$0xff] %v9818_v58  ;;  %v9830_v53 = vmul.f32 0.35355338, %v9621_v62 }
 0x2c3   : > { %12426 = vst [vmem:[#allocation50_spill] sm:$0xff] %v9823_v25  ;;  %v1589_v33 = vsel %vm1494_vm3, %v9823_v25, -inf }
 0x2c4   : > { %12427 = vst [vmem:[#allocation51_spill] sm:$0xff] %v9830_v53  ;;  %v1562_v28 = vsel %vm1494_vm3, %v9830_v53, -inf }
 0x2c5   : > { %v9827_v29 = vpop.xlane.xlu1 %1508 }
 0x2c6   : > { %1569 = vmax.xlane.f32.xlu1 %v1568_v32  ;;  %v9835_v32 = vmul.f32 0.35355338, %v9603_v4 }
 0x2c8   : > { %12428 = vst [vmem:[#allocation52_spill] sm:$0xff] %v9835_v32  ;;  %v1586_v62 = vsel %vm1494_vm3, %v9835_v32, -inf }
 0x2ca   : > { %1593 = vmax.xlane.f32.xlu1 %v1592_v0  ;;  %v9837_v0 = vpop.xlane.xlu1 %1539 }
 0x2cb   : > { %12429 = vst [vmem:[#allocation53_spill] sm:$0xff] %v9837_v0 }
 0x2ce   : > { %1566 = vmax.xlane.f32.xlu1 %v1565_v48  ;;  %v9843_v48 = vmul.f32 0.35355338, %v9605_v60  ;;  %v9847_v25 = vpop.xlane.xlu1 %1542  ;;  %v9859_v60 = vpop.xlane.xlu0 %1511 }
 0x2cf   : > { %12431 = vst [vmem:[#allocation55_spill] sm:$0xff] %v9847_v25 }
 0x2d0   : > { %12430 = vst [vmem:[#allocation54_spill] sm:$0xff] %v9843_v48  ;;  %v1559_v4 = vsel %vm1494_vm3, %v9843_v48, -inf }
 0x2d2   : > { %1590 = vmax.xlane.f32.xlu1 %v1589_v33  ;;  %v9852_v33 = vpop.xlane.xlu1 %1545 }
 0x2d3   : > { %12432 = vst [vmem:[#allocation56_spill] sm:$0xff] %v9852_v33  ;;  %v9888_v33 = vmul.f32 0.35355338, %v9587_v45 }
 0x2d5   : > { %12440 = vst [vmem:[#allocation64_spill] sm:$0xff] %v9888_v33 }
 0x2d6   : > { %1563 = vmax.xlane.f32.xlu1 %v1562_v28  ;;  %v9854_v28 = vpop.xlane.xlu1 %1548 }
 0x2d7   : > { %12433 = vst [vmem:[#allocation57_spill] sm:$0xff] %v9854_v28 }
 0x2d8   : > { %495 = vbcast.lane.b32.xlu0 %v9108_v9, 328 }
 0x2da   : > { %1587 = vmax.xlane.f32.xlu1 %v1586_v62  ;;  %v9856_v55 = vpop.xlane.xlu1 %1596  ;;  %v9864_v62 = vmul.f32 0.35355338, %v9571_v43 }
 0x2db   : > { %12434 = vst [vmem:[#allocation58_spill] sm:$0xff] %v9856_v55 }
 0x2dc   : > { %444 = vbcast.lane.b32.xlu0 %v9111_v10, 328  ;;  %12436 = vst [vmem:[#allocation60_spill] sm:$0xff] %v9864_v62  ;;  %v9866_v10 = vpop.xlane.xlu0 %1514  ;;  %v1580_v48 = vsel %vm1494_vm3, %v9864_v62, -inf }
 0x2de   : > { %1560 = vmax.xlane.f32.xlu1 %v1559_v4  ;;  %v9861_v5 = vpop.xlane.xlu1 %1599  ;;  %v9870_v4 = vmul.f32 0.35355338, %v2423_v2 }
 0x2df   : > { %12435 = vst [vmem:[#allocation59_spill] sm:$0xff] %v9861_v5 }
 0x2e0   : > { %v9874_v53 = vpop.xlane.xlu0 %1517  ;;  %v2710_v38 = vsel %vm1519_vm4, %v9870_v4, -inf }
 0x2e2   : > { %v9868_v32 = vpop.xlane.xlu1 %1572 }
 0x2e3   : > { %12437 = vst [vmem:[#allocation61_spill] sm:$0xff] %v9868_v32 }
 0x2e4   : > { %v9880_v43 = vpop.xlane.xlu0 %1521 }
 0x2ef   : > { %325 = vbcast.lane.b32.xlu1 %v9100_v7, 328  ;;  %v9876_v7 = vpop.xlane.xlu1 %1602 }
 0x2f0   : > { %12438 = vst [vmem:[#allocation62_spill] sm:$0xff] %v9876_v7 }
 0x2f3   : > { %v9882_v5 = vpop.xlane.xlu1 %1575 }
 0x2f4   : > { %12439 = vst [vmem:[#allocation63_spill] sm:$0xff] %v9882_v5 }
 0x2fb   : > { %1581 = vmax.xlane.f32.xlu0 %v1580_v48 }
 0x2ff   : > { %2711 = vmax.xlane.f32.xlu0 %v2710_v38 }
 0x307   : > { %v2634_v55 = vpop.xlane.xlu0 %2633  ;;  %v2661_v58 = vpop.xlane.xlu1 %2660 }
 0x308   : > { %v2740_v2 = vsub.f32 %v9651_v35, %v2634_v55  ;;  %v2749_v9 = vsub.f32 %v9653_v39, %v2661_v58 }
 0x30a   : > { %v2794_v62 = vmul.f32 1.442695, %v2749_v9  ;;  %v2776_v48 = vmul.f32 1.442695, %v2740_v2  ;;  %v1583_v9 = vsel %vm1494_vm3, %v9888_v33, -inf }
 0x30b   : > { %v2637_v0 = vpop.xlane.xlu0 %2636  ;;  %v2664_v25 = vpop.xlane.xlu1 %2663 }
 0x30c   : > { %8470 = vpow2.f32 %v2794_v62  ;;  %v2750_v7 = vsub.f32 %v9661_v57, %v2664_v25  ;;  %v2741_v28 = vsub.f32 %v9659_v18, %v2637_v0 }
 0x30d   : > { %8472 = vpow2.f32 %v2776_v48 }
 0x30e   : > { %v2796_v38 = vmul.f32 1.442695, %v2750_v7  ;;  %v2778_v35 = vmul.f32 1.442695, %v2741_v28 }
 0x30f   : > { %v2640_v32 = vpop.xlane.xlu0 %2639  ;;  %v2667_v5 = vpop.xlane.xlu1 %2666 }
 0x310   : > { %8474 = vpow2.f32 %v2796_v38  ;;  %v2751_v39 = vsub.f32 %v9669_v37, %v2667_v5  ;;  %v2742_v45 = vsub.f32 %v9667_v31, %v2640_v32 }
 0x311   : > { %8476 = vpow2.f32 %v2778_v35 }
 0x312   : > { %v2798_v57 = vmul.f32 1.442695, %v2751_v39  ;;  %v2780_v18 = vmul.f32 1.442695, %v2742_v45 }
 0x313   : > { %v2643_v55 = vpop.xlane.xlu0 %2642  ;;  %v2670_v58 = vpop.xlane.xlu1 %2669  ;;  %1584 = vmax.xlane.f32.xlu1 %v1583_v9 }
 0x314   : > { %8478 = vpow2.f32 %v2798_v57  ;;  %v2752_v0 = vsub.f32 %v9677_v1, %v2670_v58  ;;  %v2743_v31 = vsub.f32 %v9675_v20, %v2643_v55 }
 0x315   : > { %8480 = vpow2.f32 %v2780_v18 }
 0x316   : > { %v2800_v48 = vmul.f32 1.442695, %v2752_v0  ;;  %v2782_v1 = vmul.f32 1.442695, %v2743_v31 }
 0x317   : > { %v2646_v25 = vpop.xlane.xlu0 %2645  ;;  %v2673_v7 = vpop.xlane.xlu1 %2672 }
 0x318   : > { %8482 = vpow2.f32 %v2800_v48  ;;  %v2753_v39 = vsub.f32 %v9685_v14, %v2673_v7  ;;  %v2744_v55 = vsub.f32 %v9683_v6, %v2646_v25 }
 0x319   : > { %v9895_v62 = vpop.eup %8470  ;;  %8484 = vpow2.f32 %v2782_v1 }
 0x31a   : > { %12441 = vst [vmem:[#allocation65_spill] sm:$0xff] %v9895_v62  ;;  %v2875_v37 = vsel %vm1494_vm3, %v9895_v62, 0.0  ;;  %v9900_v28 = vpop.eup %8472  ;;  %v2802_v20 = vmul.f32 1.442695, %v2753_v39 }
 0x31b   : > { %v2649_v5 = vpop.xlane.xlu0 %2648  ;;  %12442 = vst [vmem:[#allocation66_spill] sm:$0xff] %v9900_v28  ;;  %2876 = vadd.xlane.f32.xlu0 %v2875_v37  ;;  %v2676_v2 = vpop.xlane.xlu1 %2675  ;;  %v2848_v32 = vsel %vm1494_vm3, %v9900_v28, 0.0  ;;  %v2784_v37 = vmul.f32 1.442695, %v2744_v55 }
 0x31c   : > { %8486 = vpow2.f32 %v2802_v20  ;;  %v2754_v48 = vsub.f32 %v9693_v34, %v2676_v2  ;;  %v2745_v39 = vsub.f32 %v9691_v63, %v2649_v5 }
 0x31d   : > { %v9905_v35 = vpop.eup %8474  ;;  %8488 = vpow2.f32 %v2784_v37 }
 0x31e   : > { %v2878_v58 = vsel %vm1494_vm3, %v9905_v35, 0.0  ;;  %v9910_v57 = vpop.eup %8476  ;;  %v2804_v25 = vmul.f32 1.442695, %v2754_v48  ;;  %v2786_v2 = vmul.f32 1.442695, %v2745_v39 }
 0x31f   : > { %v2652_v38 = vpop.xlane.xlu0 %2651  ;;  %2849 = vadd.xlane.f32.xlu0 %v2848_v32  ;;  %v2679_v9 = vpop.xlane.xlu1 %2678  ;;  %12443 = vst [vmem:[#allocation67_spill] sm:$0xff] %v9910_v57  ;;  %v2851_v0 = vsel %vm1494_vm3, %v9910_v57, 0.0 }
 0x320   : > { %8490 = vpow2.f32 %v2804_v25 }
 0x321   : > { %v9918_v14 = vpop.eup %8478  ;;  %8492 = vpow2.f32 %v2786_v2 }
 0x322   : > { %v2881_v31 = vsel %vm1494_vm3, %v9918_v14, 0.0  ;;  %v9923_v32 = vpop.eup %8480 }
 0x323   : > { %2879 = vadd.xlane.f32.xlu0 %v2878_v58  ;;  %v2682_v45 = vpop.xlane.xlu0 %2681  ;;  %v2854_v58 = vsel %vm1494_vm3, %v9923_v32, 0.0 }
 0x324   : > { %274 = vbcast.lane.b32.xlu1 %v9103_v8, 328 }
 0x325   : > { %v9930_v20 = vpop.eup %8482 }
 0x326   : > { %v2884_v37 = vsel %vm1494_vm3, %v9930_v20, 0.0  ;;  %v9939_v48 = vpop.eup %8484 }
 0x327   : > { %v9914_v18 = vpop.xlane.xlu1 %2657  ;;  %2852 = vadd.xlane.f32.xlu0 %v2851_v0  ;;  %v2655_v7 = vpop.xlane.xlu0 %2654  ;;  %v2755_v0 = vsub.f32 %v9701_v46, %v2679_v9  ;;  %v2857_v25 = vsel %vm1494_vm3, %v9939_v48, 0.0 }
 0x329   : > { %v9948_v39 = vpop.eup %8486 }
 0x32a   : > { %v2887_v2 = vsel %vm1494_vm3, %v9948_v39, 0.0 }
 0x32b   : > { %v9925_v1 = vpop.xlane.xlu1 %2714  ;;  %2882 = vadd.xlane.f32.xlu0 %v2881_v31  ;;  %v2685_v6 = vpop.xlane.xlu0 %2684  ;;  %v2806_v31 = vmul.f32 1.442695, %v2755_v0 }
 0x32c   : > { %v9957_v0 = vpop.eup %8488  ;;  %v2757_v28 = vsub.f32 %v9719_v52, %v2685_v6 }
 0x32d   : > { %8494 = vpow2.f32 %v2806_v31  ;;  %v2860_v31 = vsel %vm1494_vm3, %v9957_v0, 0.0 }
 0x32f   : > { %v9932_v55 = vpop.xlane.xlu1 %2717  ;;  %2855 = vadd.xlane.f32.xlu0 %v2854_v58  ;;  %v9934_v34 = vpop.xlane.xlu0 %2687  ;;  %v2746_v58 = vsub.f32 %v9699_v22, %v2652_v38 }
 0x331   : > { %v2788_v33 = vmul.f32 1.442695, %v2746_v58  ;;  %v9966_v58 = vpop.eup %8490 }
 0x332   : > { %v9971_v62 = vpop.eup %8492 }
 0x333   : > { %v9941_v63 = vpop.xlane.xlu1 %2720  ;;  %2885 = vadd.xlane.f32.xlu0 %v2884_v37  ;;  %v9943_v5 = vpop.xlane.xlu0 %2690  ;;  %v2756_v37 = vsub.f32 %v9707_v30, %v2682_v45  ;;  %8496 = vpow2.f32 %v2788_v33  ;;  %v9974_v33 = vmul.f32 0.35355338, %v9589_v56  ;;  %v2863_v52 = vsel %vm1494_vm3, %v9971_v62, 0.0 }
 0x335   : > { %v2808_v8 = vmul.f32 1.442695, %v2756_v37  ;;  %12444 = vst [vmem:[#allocation68_spill] sm:$0xff] %v9974_v33  ;;  %v2748_v37 = vsub.f32 %v9715_v11, %v9914_v18  ;;  %v1556_v56 = vsel %vm1494_vm3, %v9974_v33, -inf }
 0x337   : > { %v9950_v46 = vpop.xlane.xlu1 %2723  ;;  %2858 = vadd.xlane.f32.xlu0 %v2857_v25  ;;  %v9952_v9 = vpop.xlane.xlu0 %2693  ;;  %v2747_v25 = vsub.f32 %v9711_v61, %v2655_v7  ;;  %8498 = vpow2.f32 %v2808_v8  ;;  %v2810_v8 = vmul.f32 1.442695, %v2757_v28  ;;  %v2792_v57 = vmul.f32 1.442695, %v2748_v37 }
 0x339   : > { %v2790_v45 = vmul.f32 1.442695, %v2747_v25 }
 0x33a   : > { %v9982_v6 = vpop.eup %8494 }
 0x33b   : > { %v9959_v22 = vpop.xlane.xlu1 %2726  ;;  %2888 = vadd.xlane.f32.xlu0 %v2887_v2  ;;  %v9961_v38 = vpop.xlane.xlu0 %2696  ;;  %v2890_v2 = vsel %vm1494_vm3, %v9966_v58, 0.0  ;;  %8500 = vpow2.f32 %v2790_v45  ;;  %v2893_v11 = vsel %vm1494_vm3, %v9982_v6, 0.0 }
 0x33c   : > { %8502 = vpow2.f32 %v2810_v8 }
 0x33d   : > { %8504 = vpow2.f32 %v2792_v57 }
 0x33f   : > { %v2730_v30 = vpop.xlane.xlu1 %2729  ;;  %2861 = vadd.xlane.f32.xlu0 %v2860_v31  ;;  %v9976_v61 = vpop.xlane.xlu0 %2699 }
 0x340   : > { %v9991_v28 = vpop.eup %8496 }
 0x343   : > { %v2733_v7 = vpop.xlane.xlu1 %2732  ;;  %2891 = vadd.xlane.f32.xlu0 %v2890_v2  ;;  %v9986_v31 = vpop.xlane.xlu0 %2702  ;;  %v2772_v2 = vsub.f32 %v9771_v13, %v2730_v30 }
 0x344   : > { %v9996_v33 = vpop.eup %8498 }
 0x345   : > { %v2840_v45 = vmul.f32 1.442695, %v2772_v2 }
 0x347   : > { %v2736_v25 = vpop.xlane.xlu1 %2735  ;;  %2864 = vadd.xlane.f32.xlu0 %v2863_v52  ;;  %v2773_v52 = vsub.f32 %v9781_v19, %v2733_v7  ;;  %v2706_v37 = vpop.xlane.xlu0 %2705  ;;  %8506 = vpow2.f32 %v2840_v45  ;;  %v181_v45 = vld [vmem:[%s12257_s2] sm:$0x3] }
 0x348   : > { %1557 = vmax.xlane.f32.xlu1 %v1556_v56  ;;  %v2866_v56 = vsel %vm1494_vm3, %v9991_v28, 0.0  ;;  %v2764_v30 = vsub.f32 %v9783_v3, %v2706_v37  ;;  %v10003_v57 = vpop.eup %8500  ;;  %v2774_v19 = vsub.f32 %v9789_v21, %v2736_v25  ;;  %v12448_v37 = vld [vmem:[#allocation3_spill] sm:$0xff] }
 0x349   : > { %v2842_v13 = vmul.f32 1.442695, %v2773_v52  ;;  %v10013_v3 = vpop.eup %8502 }
 0x34a   : > { %v2824_v7 = vmul.f32 1.442695, %v2764_v30  ;;  %v2844_v21 = vmul.f32 1.442695, %v2774_v19  ;;  %v2899_v30 = vsel %vm1519_vm4, %v10013_v3, 0.0 }
 0x34b   : > { %v2739_v18 = vpop.xlane.xlu1 %2738  ;;  %2894 = vadd.xlane.f32.xlu0 %v2893_v11  ;;  %v2896_v11 = vsel %vm1494_vm3, %v9996_v33, 0.0  ;;  %8508 = vpow2.f32 %v2842_v13  ;;  %v2709_v52 = vpop.xlane.xlu0 %2708  ;;  %v10019_v13 = vrot.slane %v181_v45, %v12448_v37 }
 0x34c   : > { %8510 = vpow2.f32 %v2824_v7  ;;  %v2765_v25 = vsub.f32 %v9793_v23, %v2709_v52 }
 0x34d   : > { %12449 = vst [vmem:[#allocation3_spill] sm:$0xff] %v10019_v13  ;;  %8512 = vpow2.f32 %v2844_v21 }
 0x34f   : > { %v9998_v8 = vpop.xlane.xlu1 %1569  ;;  %2867 = vadd.xlane.f32.xlu0 %v2866_v56 }
 0x350   : > { %12445 = vst [vmem:[#allocation69_spill] sm:$0xff] %v9998_v8  ;;  %v2869_v8 = vsel %vm1494_vm3, %v10003_v57, 0.0 }
 0x353   : > { %v10005_v2 = vpop.xlane.xlu1 %1593  ;;  %2897 = vadd.xlane.f32.xlu0 %v2896_v11  ;;  %v10024_v11 = vpop.eup %8504 }
 0x354   : > { %12446 = vst [vmem:[#allocation70_spill] sm:$0xff] %v10005_v2  ;;  %v2872_v19 = vsel %vm1519_vm4, %v10024_v11, 0.0  ;;  %v10032_v7 = vpop.eup %8506 }
 0x355   : > { %v2944_v37 = vsel %vm1494_vm3, %v10032_v7, 0.0 }
 0x357   : > { %v10015_v56 = vpop.xlane.xlu1 %1566  ;;  %2870 = vadd.xlane.f32.xlu0 %v2869_v8  ;;  %v2775_v8 = vsub.f32 %v9799_v24, %v2739_v18 }
 0x358   : > { %12447 = vst [vmem:[#allocation71_spill] sm:$0xff] %v10015_v56  ;;  %v2826_v56 = vmul.f32 1.442695, %v2765_v25  ;;  %v496_v25 = vpop.permute.xlu0 %495 }
 0x359   : > { %669 = vbcast.lane.b32.xlu1 %v9119_v12, 328  ;;  %v2846_v52 = vmul.f32 1.442695, %v2775_v8 }
 0x35a   : > { %8514 = vpow2.f32 %v2826_v56 }
 0x35b   : > { %v10026_v2 = vpop.xlane.xlu1 %1590  ;;  %2900 = vadd.xlane.f32.xlu0 %v2899_v30  ;;  %v10038_v30 = vpop.eup %8508  ;;  %8516 = vpow2.f32 %v2846_v52 }
 0x35c   : > { %12450 = vst [vmem:[#allocation72_spill] sm:$0xff] %v10026_v2  ;;  %v2947_v24 = vsel %vm1494_vm3, %v10038_v30, 0.0  ;;  %v10044_v18 = vpop.eup %8510 }
 0x35d   : > { %755 = vbcast.lane.b32.xlu1 %v10019_v13, 264  ;;  %12453 = vst [vmem:[#allocation75_spill] sm:$0xff] %v10044_v18  ;;  %v2920_v56 = vsel %vm1494_vm3, %v10044_v18, 0.0  ;;  %v10050_v8 = vpop.eup %8512 }
 0x35f   : > { %v10034_v23 = vpop.xlane.xlu1 %1563  ;;  %2873 = vadd.xlane.f32.xlu0 %v2872_v19 }
 0x360   : > { %12451 = vst [vmem:[#allocation73_spill] sm:$0xff] %v10034_v23 }
 0x363   : > { %v10040_v2 = vpop.xlane.xlu1 %1587  ;;  %2945 = vadd.xlane.f32.xlu0 %v2944_v37  ;;  %v10057_v37 = vmul.f32 %v9162_v27, %v496_v25  ;;  %v10073_v25 = vmul.f32 0.35355338, %v9573_v54 }
 0x364   : > { %12452 = vst [vmem:[#allocation74_spill] sm:$0xff] %v10040_v2 }
 0x365   : > { %12457 = vst [vmem:[#allocation79_spill] sm:$0xff] %v10073_v25 }
 0x367   : > { %v10046_v21 = vpop.xlane.xlu1 %1560  ;;  %2948 = vadd.xlane.f32.xlu0 %v2947_v24  ;;  %v2950_v24 = vsel %vm1494_vm3, %v10050_v8, 0.0 }
 0x368   : > { %12454 = vst [vmem:[#allocation76_spill] sm:$0xff] %v10046_v21  ;;  %v10064_v21 = vpop.eup %8514 }
 0x369   : > { %12456 = vst [vmem:[#allocation78_spill] sm:$0xff] %v10064_v21  ;;  %v10068_v18 = vpop.eup %8516 }
 0x36b   : > { %2921 = vadd.xlane.f32.xlu0 %v2920_v56  ;;  %v10052_v19 = vpop.permute.xlu1 %325  ;;  %v2923_v56 = vsel %vm1494_vm3, %v10064_v21, 0.0 }
 0x36c   : > { %v400_v52 = vmul.f32 %v9179_v59, %v10052_v19  ;;  %v2953_v59 = vsel %vm1519_vm4, %v10068_v18, 0.0 }
 0x36e   : > { %v10060_v2 = vadd.f32 %v10057_v37, %v400_v52  ;;  %v10075_v52 = vpop.permute.xlu0 %444 }
 0x36f   : > { %2951 = vadd.xlane.f32.xlu0 %v2950_v24 }
 0x370   : > { %12455 = vst [vmem:[#allocation77_spill] sm:$0xff] %v10060_v2  ;;  %v1553_v2 = vsel %vm1494_vm3, %v10073_v25, -inf  ;;  %v1612_v25 = vsub.f32 %v9537_v51, %v9880_v43  ;;  %v1609_v51 = vsub.f32 %v9491_v44, %v9859_v60 }
 0x373   : > { %2924 = vadd.xlane.f32.xlu0 %v2923_v56  ;;  %v12458_v56 = vld [vmem:[#allocation2_spill] sm:$0xff] }
 0x374   : > { %v10083_v12 = vrot.slane %v181_v45, %v12458_v56  ;;  %v1611_v45 = vsub.f32 %v9523_v49, %v9874_v53  ;;  %v1610_v56 = vsub.f32 %v9507_v47, %v9866_v10  ;;  %v1608_v49 = vsub.f32 %v9550_v41, %v9827_v29 }
 0x375   : > { %v1607_v47 = vsub.f32 %v9505_v26, %v9808_v16  ;;  %v2763_v41 = vsub.f32 %v9773_v42, %v9986_v31 }
 0x376   : > { %12459 = vst [vmem:[#allocation2_spill] sm:$0xff] %v10083_v12  ;;  %v1648_v44 = vmul.f32 1.442695, %v1608_v49  ;;  %v12466_v49 = vld [vmem:[#allocation15_spill] sm:$0xff] }
 0x377   : > { %2954 = vadd.xlane.f32.xlu0 %v2953_v59 }
 0x381   : > { %1554 = vmax.xlane.f32.xlu1 %v1553_v2  ;;  %v2762_v2 = vsub.f32 %v9765_v50, %v9976_v61  ;;  %v1652_v50 = vmul.f32 1.442695, %v1610_v56  ;;  %v1650_v61 = vmul.f32 1.442695, %v1609_v51 }
 0x384   : > { %v10079_v24 = vpop.xlane.xlu0 %1581 }
 0x388   : > { %v2712_v23 = vpop.xlane.xlu0 %2711 }
 0x389   : > { %v2766_v21 = vsub.f32 %v9870_v4, %v2712_v23  ;;  %v2820_v4 = vmul.f32 1.442695, %v2762_v2 }
 0x38b   : > { %v2828_v13 = vmul.f32 1.442695, %v2766_v21 }
 0x38d   : > { %8518 = vpow2.f32 %v2828_v13  ;;  %v1656_v13 = vmul.f32 1.442695, %v1612_v25  ;;  %v12460_v25 = vld [vmem:[#allocation9_spill] sm:$0xff] }
 0x38e   : > { %8520 = vpow2.f32 %v2820_v4  ;;  %v1606_v4 = vsub.f32 %v9475_v17, %v9779_v40  ;;  %v12464_v40 = vld [vmem:[#allocation43_spill] sm:$0xff] }
 0x38f   : > { %8522 = vpow2.f32 %v1656_v13  ;;  %v2822_v13 = vmul.f32 1.442695, %v2763_v41  ;;  %v2771_v51 = vsub.f32 %v12464_v40, %v9959_v22  ;;  %v12468_v22 = vld [vmem:[#allocation63_spill] sm:$0xff] }
 0x390   : > { %v1644_v42 = vmul.f32 1.442695, %v1606_v4 }
 0x392   : > { %736 = vbcast.lane.b32.xlu1 %v10083_v12, 264 }
 0x39a   : > { %v10086_v59 = vpop.eup %8518 }
 0x39b   : > { %v2926_v54 = vsel %vm1519_vm4, %v10086_v59, 0.0  ;;  %v10110_v53 = vpop.eup %8520 }
 0x39c   : > { %2927 = vadd.xlane.f32.xlu0 %v2926_v54  ;;  %v1654_v54 = vmul.f32 1.442695, %v1611_v45  ;;  %v2914_v60 = vsel %vm1494_vm3, %v10110_v53, 0.0  ;;  %v10119_v2 = vpop.eup %8522  ;;  %v1646_v45 = vmul.f32 1.442695, %v1607_v47 }
 0x39d   : > { %12461 = vst [vmem:[#allocation9_spill] sm:$0xff] %v10119_v2  ;;  %v1736_v26 = vsel %vm1519_vm4, %v10119_v2, 0.0 }
 0x39e   : > { %8524 = vpow2.f32 %v1654_v54  ;;  %v1605_v54 = vsub.f32 %v9449_v36, %v9751_v15 }
 0x39f   : > { %8526 = vpow2.f32 %v1652_v50 }
 0x3a0   : > { %8528 = vpow2.f32 %v1650_v61  ;;  %v12465_v61 = vld [vmem:[#allocation33_spill] sm:$0xff] }
 0x3a1   : > { %8530 = vpow2.f32 %v1648_v44  ;;  %v1604_v47 = vsub.f32 %v12466_v49, %v12465_v61  ;;  %v1642_v44 = vmul.f32 1.442695, %v1605_v54  ;;  %v12471_v54 = vld [vmem:[#allocation41_spill] sm:$0xff] }
 0x3a2   : > { %8532 = vpow2.f32 %v1646_v45  ;;  %v12469_v45 = vld [vmem:[#allocation31_spill] sm:$0xff]  ;;  %v12473_v61 = vld [vmem:[#allocation29_spill] sm:$0xff] }
 0x3a3   : > { %8534 = vpow2.f32 %v2822_v13  ;;  %v1640_v4 = vmul.f32 1.442695, %v1604_v47 }
 0x3a4   : > { %v10094_v23 = vpop.xlane.xlu0 %2876  ;;  %8536 = vpow2.f32 %v1644_v42  ;;  %v2770_v42 = vsub.f32 %v12471_v54, %v9950_v46  ;;  %v12477_v54 = vld [vmem:[#allocation21_spill] sm:$0xff] }
 0x3a5   : > { %8538 = vpow2.f32 %v1642_v44 }
 0x3a8   : > { %v10098_v21 = vpop.xlane.xlu0 %2849 }
 0x3ab   : > { %v10129_v16 = vpop.eup %8524 }
 0x3ac   : > { %v10102_v12 = vpop.xlane.xlu0 %2879  ;;  %12462 = vst [vmem:[#allocation80_spill] sm:$0xff] %v10129_v16  ;;  %v1733_v31 = vsel %vm1494_vm3, %v10129_v16, 0.0  ;;  %v10137_v17 = vpop.eup %8526  ;;  %v12495_v16 = vld [vmem:[#allocation25_spill] sm:$0xff] }
 0x3ad   : > { %12463 = vst [vmem:[#allocation81_spill] sm:$0xff] %v10137_v17  ;;  %v1730_v36 = vsel %vm1494_vm3, %v10137_v17, 0.0  ;;  %v10147_v15 = vpop.eup %8528 }
 0x3ae   : > { %12467 = vst [vmem:[#allocation43_spill] sm:$0xff] %v10147_v15  ;;  %v1727_v13 = vsel %vm1494_vm3, %v10147_v15, 0.0 }
 0x3b0   : > { %v10106_v43 = vpop.xlane.xlu0 %2852 }
 0x3b2   : > { %618 = vbcast.lane.b32.xlu0 %v12460_v25, 328 }
 0x3b4   : > { %v10113_v10 = vpop.xlane.xlu0 %2882 }
 0x3b6   : > { %2915 = vadd.xlane.f32.xlu1 %v2914_v60  ;;  %v2838_v60 = vmul.f32 1.442695, %v2771_v51  ;;  %v12472_v51 = vld [vmem:[#allocation61_spill] sm:$0xff] }
 0x3b7   : > { %v1629_v49 = vsub.f32 %v12473_v61, %v12472_v51  ;;  %v10178_v51 = vmul.f32 0.35355338, %v12477_v54  ;;  %v12481_v54 = vld [vmem:[#allocation40_spill] sm:$0xff] }
 0x3b8   : > { %v10123_v29 = vpop.xlane.xlu0 %2855  ;;  %8540 = vpow2.f32 %v2838_v60 }
 0x3b9   : > { %8542 = vpow2.f32 %v1640_v4  ;;  %v1690_v60 = vmul.f32 1.442695, %v1629_v49  ;;  %12478 = vst [vmem:[#allocation31_spill] sm:$0xff] %v10178_v51 }
 0x3ba   : > { %1737 = vadd.xlane.f32.xlu1 %v1736_v26  ;;  %v1630_v26 = vsub.f32 %v12469_v45, %v12468_v22  ;;  %v2836_v22 = vmul.f32 1.442695, %v2770_v42  ;;  %v12475_v45 = vld [vmem:[#allocation42_spill] sm:$0xff]  ;;  %v12479_v42 = vld [vmem:[#allocation39_spill] sm:$0xff] }
 0x3bb   : > { %v2769_v61 = vsub.f32 %v12479_v42, %v9941_v63 }
 0x3bc   : > { %v10131_v56 = vpop.xlane.xlu0 %2885  ;;  %v1692_v47 = vmul.f32 1.442695, %v1630_v26 }
 0x3be   : > { %1734 = vadd.xlane.f32.xlu1 %v1733_v31  ;;  %v10155_v31 = vpop.eup %8530  ;;  %8544 = vpow2.f32 %v1692_v47 }
 0x3bf   : > { %12470 = vst [vmem:[#allocation33_spill] sm:$0xff] %v10155_v31  ;;  %v1724_v44 = vsel %vm1494_vm3, %v10155_v31, 0.0  ;;  %8546 = vpow2.f32 %v2836_v22  ;;  %v1577_v22 = vsel %vm1494_vm3, %v10178_v51, -inf }
 0x3c0   : > { %v10141_v50 = vpop.xlane.xlu0 %2858  ;;  %8548 = vpow2.f32 %v1690_v60 }
 0x3c2   : > { %1731 = vadd.xlane.f32.xlu1 %v1730_v36  ;;  %v10165_v36 = vpop.eup %8532 }
 0x3c3   : > { %12474 = vst [vmem:[#allocation15_spill] sm:$0xff] %v10165_v36  ;;  %v10171_v46 = vpop.eup %8534  ;;  %v1721_v4 = vsel %vm1494_vm3, %v10165_v36, 0.0  ;;  %v2760_v36 = vsub.f32 %v12481_v54, %v9952_v9 }
 0x3c4   : > { %v10149_v41 = vpop.xlane.xlu0 %2888  ;;  %v10175_v26 = vpop.eup %8536  ;;  %v2917_v49 = vsel %vm1494_vm3, %v10171_v46, 0.0 }
 0x3c5   : > { %12476 = vst [vmem:[#allocation63_spill] sm:$0xff] %v10175_v26  ;;  %v1718_v47 = vsel %vm1494_vm3, %v10175_v26, 0.0 }
 0x3c6   : > { %1728 = vadd.xlane.f32.xlu1 %v1727_v13  ;;  %v2761_v13 = vsub.f32 %v12475_v45, %v9961_v38  ;;  %v10188_v45 = vpop.eup %8538 }
 0x3c7   : > { %12480 = vst [vmem:[#allocation41_spill] sm:$0xff] %v10188_v45  ;;  %v1715_v60 = vsel %vm1494_vm3, %v10188_v45, 0.0 }
 0x3c8   : > { %v10159_v40 = vpop.xlane.xlu0 %2861  ;;  %v2818_v38 = vmul.f32 1.442695, %v2761_v13  ;;  %v10194_v13 = vpop.eup %8540 }
 0x3c9   : > { %v10198_v42 = vpop.eup %8542  ;;  %v2941_v51 = vsel %vm1494_vm3, %v10194_v13, 0.0 }
 0x3ca   : > { %1725 = vadd.xlane.f32.xlu1 %v1724_v44  ;;  %8550 = vpow2.f32 %v2818_v38  ;;  %12482 = vst [vmem:[#allocation61_spill] sm:$0xff] %v10198_v42  ;;  %v2816_v38 = vmul.f32 1.442695, %v2760_v36 }
 0x3cb   : > { %v10209_v45 = vpop.eup %8544 }
 0x3cc   : > { %v10169_v15 = vpop.xlane.xlu0 %2891  ;;  %12486 = vst [vmem:[#allocation42_spill] sm:$0xff] %v10209_v45  ;;  %v10215_v36 = vpop.eup %8546 }
 0x3ce   : > { %1722 = vadd.xlane.f32.xlu1 %v1721_v4  ;;  %v2834_v4 = vmul.f32 1.442695, %v2769_v61  ;;  %v12485_v61 = vld [vmem:[#allocation36_spill] sm:$0xff] }
 0x3cf   : > { %v2768_v9 = vsub.f32 %v12485_v61, %v9932_v55  ;;  %v12489_v61 = vld [vmem:[#allocation34_spill] sm:$0xff] }
 0x3d0   : > { %v10182_v44 = vpop.xlane.xlu0 %2864  ;;  %8552 = vpow2.f32 %v2834_v4  ;;  %v10219_v4 = vpop.eup %8548 }
 0x3d1   : > { %2918 = vadd.xlane.f32.xlu0 %v2917_v49  ;;  %v12483_v49 = vld [vmem:[#allocation22_spill] sm:$0xff]  ;;  %8554 = vpow2.f32 %v2816_v38  ;;  %12488 = vst [vmem:[#allocation21_spill] sm:$0xff] %v10219_v4  ;;  %v2938_v38 = vsel %vm1494_vm3, %v10215_v36, 0.0 }
 0x3d2   : > { %1719 = vadd.xlane.f32.xlu1 %v1718_v47  ;;  %v10201_v47 = vmul.f32 0.35355338, %v12483_v49  ;;  %v12487_v49 = vld [vmem:[#allocation38_spill] sm:$0xff] }
 0x3d3   : > { %v2759_v26 = vsub.f32 %v12487_v49, %v9943_v5 }
 0x3d4   : > { %v2895_v63 = vpop.xlane.xlu0 %2894  ;;  %12484 = vst [vmem:[#allocation29_spill] sm:$0xff] %v10201_v47  ;;  %v1550_v55 = vsel %vm1494_vm3, %v10201_v47, -inf  ;;  %v10231_v47 = vpop.xlane.xlu1 %1584 }
 0x3d5   : > { %1578 = vmax.xlane.f32.xlu0 %v1577_v22  ;;  %v1712_v22 = vsel %vm1494_vm3, %v10198_v42, 0.0  ;;  %12491 = vst [vmem:[#allocation39_spill] sm:$0xff] %v10231_v47 }
 0x3d6   : > { %1716 = vadd.xlane.f32.xlu1 %v1715_v60  ;;  %v2832_v60 = vmul.f32 1.442695, %v2768_v9  ;;  %v2767_v9 = vsub.f32 %v12489_v61, %v9925_v1  ;;  %v12492_v61 = vld [vmem:[#allocation57_spill] sm:$0xff] }
 0x3d7   : > { %v10225_v49 = vpop.eup %8550 }
 0x3d8   : > { %v2868_v54 = vpop.xlane.xlu0 %2867  ;;  %8556 = vpow2.f32 %v2832_v60 }
 0x3d9   : > { %2942 = vadd.xlane.f32.xlu0 %v2941_v51  ;;  %v1790_v51 = vsel %vm1519_vm4, %v10209_v45, 0.0  ;;  %v12490_v45 = vld [vmem:[#allocation35_spill] sm:$0xff] }
 0x3da   : > { %1713 = vadd.xlane.f32.xlu1 %v1712_v22  ;;  %v2814_v22 = vmul.f32 1.442695, %v2759_v26  ;;  %v2758_v42 = vsub.f32 %v12490_v45, %v9934_v34  ;;  %v2911_v26 = vsel %vm1494_vm3, %v10225_v49, 0.0 }
 0x3dc   : > { %v2898_v31 = vpop.xlane.xlu0 %2897  ;;  %8558 = vpow2.f32 %v2814_v22  ;;  %v10243_v22 = vpop.permute.xlu1 %274 }
 0x3dd   : > { %1551 = vmax.xlane.f32.xlu0 %v1550_v55  ;;  %v1787_v55 = vsel %vm1494_vm3, %v10219_v4, 0.0  ;;  %v10235_v60 = vpop.eup %8552  ;;  %v2812_v4 = vmul.f32 1.442695, %v2758_v42 }
 0x3de   : > { %1791 = vadd.xlane.f32.xlu1 %v1790_v51  ;;  %v2830_v51 = vmul.f32 1.442695, %v2767_v9  ;;  %v2935_v45 = vsel %vm1494_vm3, %v10235_v60, 0.0  ;;  %v10241_v9 = vpop.eup %8554 }
 0x3e0   : > { %v2871_v5 = vpop.xlane.xlu0 %2870 }
 0x3e1   : > { %2939 = vadd.xlane.f32.xlu0 %v2938_v38  ;;  %v12493_v38 = vld [vmem:[#allocation26_spill] sm:$0xff] }
 0x3e2   : > { %1788 = vadd.xlane.f32.xlu1 %v1787_v55  ;;  %v1621_v17 = vsub.f32 %v12493_v38, %v12492_v61  ;;  %v12494_v55 = vld [vmem:[#allocation56_spill] sm:$0xff]  ;;  %v10253_v61 = vpop.xlane.xlu1 %1557  ;;  %v12497_v38 = vld [vmem:[#allocation55_spill] sm:$0xff] }
 0x3e4   : > { %v2901_v1 = vpop.xlane.xlu0 %2900 }
 0x3e5   : > { %8560 = vrcp.f32 %v2901_v1  ;;  %2912 = vadd.xlane.f32.xlu0 %v2911_v26  ;;  %v1620_v1 = vsub.f32 %v12495_v16, %v12494_v55  ;;  %v1674_v26 = vmul.f32 1.442695, %v1621_v17  ;;  %v12501_v55 = vld [vmem:[#allocation23_spill] sm:$0xff] }
 0x3e6   : > { %8562 = vpow2.f32 %v2830_v51  ;;  %v10251_v51 = vpop.eup %8556 }
 0x3e7   : > { %8564 = vrcp.f32 %v2898_v31  ;;  %v2908_v31 = vsel %vm1494_vm3, %v10241_v9, 0.0  ;;  %12496 = vst [vmem:[#allocation40_spill] sm:$0xff] %v10251_v51  ;;  %v1672_v2 = vmul.f32 1.442695, %v1620_v1  ;;  %v2932_v17 = vsel %vm1494_vm3, %v10251_v51, 0.0  ;;  %v10267_v1 = vpop.permute.xlu1 %669 }
 0x3e8   : > { %v2874_v34 = vpop.xlane.xlu0 %2873  ;;  %v12506_v51 = vmov 0.0  }
 0x3e9   : > { %8566 = vrcp.f32 %v2874_v34  ;;  %2936 = vadd.xlane.f32.xlu0 %v2935_v45  ;;  %v12498_v34 = vld [vmem:[#allocation24_spill] sm:$0xff] }
 0x3ea   : > { %8568 = vpow2.f32 %v2812_v4  ;;  %v1619_v45 = vsub.f32 %v12498_v34, %v12497_v38  ;;  %v12503_v38 = vld [vmem:[#allocation11_spill] sm:$0xff] }
 0x3eb   : > { %8570 = vrcp.f32 %v2871_v5  ;;  %v12500_v5 = vld [vmem:[#allocation53_spill] sm:$0xff]  ;;  %v376_v34 = vmul.f32 %v12503_v38, %v10052_v19 }
 0x3ec   : > { %8572 = vrcp.f32 %v2895_v63  ;;  %v10247_v42 = vpop.xlane.xlu0 %2945  ;;  %v10262_v63 = vpop.eup %8558  ;;  %v1670_v47 = vmul.f32 1.442695, %v1619_v45 }
 0x3ed   : > { %2909 = vadd.xlane.f32.xlu0 %v2908_v31  ;;  %8574 = vpow2.f32 %v1674_v26  ;;  %12499 = vst [vmem:[#allocation22_spill] sm:$0xff] %v10262_v63  ;;  %v1618_v31 = vsub.f32 %v12501_v55, %v12500_v5  ;;  %v12504_v5 = vld [vmem:[#allocation49_spill] sm:$0xff]  ;;  %v12505_v55 = vld [vmem:[#allocation20_spill] sm:$0xff] }
 0x3ee   : > { %8576 = vrcp.f32 %v2868_v54  ;;  %v12502_v54 = vld [vmem:[#allocation6_spill] sm:$0xff] }
 0x3ef   : > { %8578 = vrcp.f32 %v10169_v15 }
 0x3f0   : > { %v10258_v16 = vpop.xlane.xlu0 %2948  ;;  %8580 = vpow2.f32 %v1672_v2  ;;  %v2905_v2 = vsel %vm1494_vm3, %v10262_v63, 0.0  ;;  %v550_v63 = vadd.f32 %v10057_v37, %v376_v34 }
 0x3f1   : > { %2933 = vadd.xlane.f32.xlu0 %v2932_v17  ;;  %8582 = vrcp.f32 %v10182_v44 }
 0x3f2   : > { %v8561_v4 = vpop.eup %8560  ;;  %8584 = vrcp.f32 %v10149_v41  ;;  %v700_v37 = vadd.f32 %v10267_v1, %v550_v63 }
 0x3f3   : > { %491 = vbcast.lane.b32.xlu1 %v12502_v54, 320  ;;  %v3009_v15 = vmul.f32 %v8561_v4, %v10013_v3  ;;  %v10271_v26 = vpop.eup %8562  ;;  %v1617_v3 = vsub.f32 %v12505_v55, %v12504_v5  ;;  %v1668_v4 = vmul.f32 1.442695, %v1618_v31  ;;  %8586 = vpow2.f32 %v1670_v47  ;;  %v10293_v47 = vpop.permute.xlu1 %755 }
 0x3f4   : > { %v10276_v17 = vpop.xlane.xlu0 %2921  ;;  %v8565_v45 = vpop.eup %8564  ;;  %8588 = vrcp.f32 %v10159_v40  ;;  %v12507_v40 = vld [vmem:[#allocation45_spill] sm:$0xff] }
 0x3f5   : > { %2906 = vadd.xlane.f32.xlu0 %v2905_v2  ;;  %7911 = vmatpush3.xpose.msk.msra.mxu1 %vm1494_vm3, %v3009_v15  ;;  %8590 = vrcp.f32 %v10131_v56  ;;  %v2929_v15 = vsel %vm1494_vm3, %v10271_v26, 0.0  ;;  %v3008_v2 = vmul.f32 %v8565_v45, %v9996_v33  ;;  %v1666_v55 = vmul.f32 1.442695, %v1617_v3 }
 0x3f6   : > { %v8567_v44 = vpop.eup %8566  ;;  %7912 = vmatprep.subr.mxu1 %v12506_v51  ;;  %8592 = vpow2.f32 %v1668_v4  ;;  %v770_v45 = vmul.f32 %v10293_v47, %v700_v37 }
 0x3f7   : > { %v10284_v19 = vpop.eup %8568  ;;  %v3000_v41 = vmul.f32 %v8567_v44, %v10024_v11  ;;  %v12508_v11 = vld [vmem:[#allocation19_spill] sm:$0xff]  ;;  %8594 = vrcp.f32 %v10141_v50 }
 0x3f8   : > { %v8571_v38 = vpop.eup %8570  ;;  %v10295_v5 = vpop.xlane.xlu0 %2951  ;;  %v1616_v44 = vsub.f32 %v12508_v11, %v12507_v40  ;;  %8596 = vrcp.f32 %v10113_v10  ;;  %v2902_v63 = vsel %vm1494_vm3, %v10284_v19, 0.0 }
 0x3f9   : > { %v8573_v31 = vpop.eup %8572  ;;  %2930 = vadd.xlane.f32.xlu0 %v2929_v15  ;;  %7890 = vmatpush3.xpose.msk.msra.mxu0 %vm1494_vm3, %v3000_v41  ;;  %v2999_v56 = vmul.f32 %v8571_v38, %v10003_v57  ;;  %v12509_v41 = vld [vmem:[#allocation44_spill] sm:$0xff]  ;;  %v12510_v15 = vld [vmem:[#allocation18_spill] sm:$0xff]  ;;  %8598 = vpow2.f32 %v1666_v55  ;;  %v12512_v38 = vld [vmem:[#allocation27_spill] sm:$0xff] }
 0x3fa   : > { %7913 = vmatpush3.xpose.msk.msra.mxu1 %vm1494_vm3, %v3008_v2  ;;  %7891 = vmatprep.subr.mxu0 %v12506_v51  ;;  %v10303_v33 = vpop.eup %8574  ;;  %v3007_v3 = vmul.f32 %v8573_v31, %v9982_v6  ;;  %v1615_v2 = vsub.f32 %v12510_v15, %v12509_v41  ;;  %v1664_v50 = vmul.f32 1.442695, %v1616_v44  ;;  %v12511_v57 = vld [vmem:[#allocation58_spill] sm:$0xff]  ;;  %8600 = vrcp.f32 %v10123_v29 }
 0x3fb   : > { %7914 = vmatprep.subr.mxu1 %v12506_v51  ;;  %v8577_v34 = vpop.eup %8576  ;;  %v1637_v40 = vsub.f32 %v12512_v38, %v12511_v57  ;;  %8602 = vrcp.f32 %v10102_v12  ;;  %v3035_v44 = vsel %vm1494_vm3, %v770_v45, 0.0  ;;  %v1763_v55 = vsel %vm1519_vm4, %v10303_v33, 0.0  ;;  %v12513_v12 = vld [vmem:[#allocation37_spill] sm:$0xff]  ;;  %v12516_v57 = vld [vmem:[#allocation16_spill] sm:$0xff] }
 0x3fc   : > { %v8579_v4 = vpop.eup %8578  ;;  %v10323_v6 = vpop.xlane.xlu0 %2924  ;;  %v2998_v31 = vmul.f32 %v8577_v34, %v9991_v28  ;;  %8604 = vpow2.f32 %v1664_v50  ;;  %v12514_v34 = vld [vmem:[#allocation17_spill] sm:$0xff] }
 0x3fd   : > { %2903 = vadd.xlane.f32.xlu0 %v2902_v63  ;;  %7892 = vmatpush3.xpose.msk.msra.mxu0 %vm1494_vm3, %v2999_v56  ;;  %v10320_v10 = vpop.eup %8580  ;;  %v3006_v37 = vmul.f32 %v8579_v4, %v9966_v58  ;;  %v1662_v63 = vmul.f32 1.442695, %v1615_v2  ;;  %v1706_v29 = vmul.f32 1.442695, %v1637_v40  ;;  %v1614_v45 = vsub.f32 %v12514_v34, %v12513_v12 }
 0x3fe   : > { %7915 = vmatpush3.xpose.msk.msra.mxu1 %vm1494_vm3, %v3007_v3  ;;  %7893 = vmatprep.subr.mxu0 %v12506_v51  ;;  %v8583_v11 = vpop.eup %8582  ;;  %8606 = vrcp.f32 %v10106_v43  ;;  %v3036_v3 = vrot.slane %v3035_v44, 4  ;;  %v1760_v41 = vsel %vm1494_vm3, %v10320_v10, 0.0  ;;  %v12515_v43 = vld [vmem:[#allocation32_spill] sm:$0xff] }
 0x3ff   : > { %7916 = vmatprep.subr.mxu1 %v12506_v51  ;;  %v8585_v56 = vpop.eup %8584  ;;  %v2997_v58 = vmul.f32 %v8583_v11, %v9971_v62  ;;  %8608 = vrcp.f32 %v10094_v23  ;;  %v1613_v38 = vsub.f32 %v12516_v57, %v12515_v43  ;;  %v1660_v23 = vmul.f32 1.442695, %v1614_v45 }
 0x400   : > { %v10335_v28 = vpop.eup %8586  ;;  %v3005_v15 = vmul.f32 %v8585_v56, %v9948_v39  ;;  %8610 = vpow2.f32 %v1662_v63  ;;  %v2955_v50 = vpop.xlane.xlu0 %2954  ;;  %v3037_v39 = vadd.f32 %v3036_v3, %v3035_v44  ;;  %v12518_v44 = vld [vmem:[#allocation30_spill] sm:$0xff] }
 0x401   : > { %1764 = vadd.xlane.f32.xlu0 %v1763_v55  ;;  %7894 = vmatpush3.xpose.msk.msra.mxu0 %vm1494_vm3, %v2998_v31  ;;  %v8589_v4 = vpop.eup %8588  ;;  %8612 = vpow2.f32 %v1706_v29  ;;  %v1757_v11 = vsel %vm1494_vm3, %v10335_v28, 0.0  ;;  %v1658_v56 = vmul.f32 1.442695, %v1613_v38 }
 0x402   : > { %7917 = vmatpush3.xpose.msk.msra.mxu1 %vm1494_vm3, %v3006_v37  ;;  %7895 = vmatprep.subr.mxu0 %v12506_v51  ;;  %v8591_v2 = vpop.eup %8590  ;;  %8614 = vrcp.f32 %v10098_v21  ;;  %v2996_v40 = vmul.f32 %v8589_v4, %v9957_v0  ;;  %v12517_v0 = vld [vmem:[#allocation62_spill] sm:$0xff]  ;;  %v3038_v29 = vrot.slane %v3037_v39, 2 }
 0x403   : > { %7918 = vmatprep.subr.mxu1 %v12506_v51  ;;  %v10351_v62 = vpop.eup %8592  ;;  %8616 = vrcp.f32 %v2955_v50  ;;  %v3004_v55 = vmul.f32 %v8591_v2, %v9930_v20  ;;  %v1639_v63 = vsub.f32 %v12518_v44, %v12517_v0 }
 0x404   : > { %v8595_v31 = vpop.eup %8594  ;;  %8618 = vpow2.f32 %v1660_v23  ;;  %v1754_v34 = vsel %vm1494_vm3, %v10351_v62, 0.0  ;;  %v3039_v4 = vadd.f32 %v3038_v29, %v3037_v39 }
 0x405   : > { %1761 = vadd.xlane.f32.xlu0 %v1760_v41  ;;  %7896 = vmatpush3.xpose.msk.msra.mxu0 %vm1494_vm3, %v2997_v58  ;;  %v8597_v37 = vpop.eup %8596  ;;  %v2995_v20 = vmul.f32 %v8595_v31, %v9939_v48  ;;  %8620 = vrcp.f32 %v10295_v5  ;;  %v1710_v48 = vmul.f32 1.442695, %v1639_v63  ;;  %v12523_v63 = vld [vmem:[#allocation66_spill] sm:$0xff] }
 0x406   : > { %7919 = vmatpush3.xpose.msk.msra.mxu1 %vm1494_vm3, %v3005_v15  ;;  %7897 = vmatprep.subr.mxu0 %v12506_v51  ;;  %v10362_v21 = vpop.eup %8598  ;;  %v3003_v45 = vmul.f32 %v8597_v37, %v9918_v14  ;;  %8622 = vpow2.f32 %v1658_v56  ;;  %v12519_v15 = vld [vmem:[#allocation59_spill] sm:$0xff]  ;;  %v12520_v14 = vld [vmem:[#allocation28_spill] sm:$0xff]  ;;  %v3040_v23 = vrot.slane %v3039_v4, 1 }
 0x407   : > { %7920 = vmatprep.subr.mxu1 %v12506_v51  ;;  %v8601_v12 = vpop.eup %8600  ;;  %v1638_v2 = vsub.f32 %v12520_v14, %v12519_v15  ;;  %8624 = vrcp.f32 %v10258_v16  ;;  %v1751_v50 = vsel %vm1494_vm3, %v10362_v21, 0.0  ;;  %v12521_v16 = vld [vmem:[#allocation67_spill] sm:$0xff]  ;;  %v12525_v14 = vld [vmem:[#allocation13_spill] sm:$0xff] }
 0x408   : > { %v8603_v3 = vpop.eup %8602  ;;  %v2994_v5 = vmul.f32 %v8601_v12, %v9923_v32  ;;  %8626 = vpow2.f32 %v1710_v48  ;;  %v3041_v0 = vadd.f32 %v3040_v23, %v3039_v4 }
 0x409   : > { %1758 = vadd.xlane.f32.xlu0 %v1757_v11  ;;  %7898 = vmatpush3.xpose.msk.msra.mxu0 %vm1494_vm3, %v2996_v40  ;;  %v10375_v58 = vpop.eup %8604  ;;  %v3002_v43 = vmul.f32 %v8603_v3, %v9905_v35  ;;  %v1708_v35 = vmul.f32 1.442695, %v1638_v2  ;;  %8628 = vrcp.f32 %v10247_v42  ;;  %v12522_v11 = vld [vmem:[#allocation65_spill] sm:$0xff]  ;;  %v388_v2 = vmul.f32 %v12525_v14, %v10243_v22 }
 0x40a   : > { %7921 = vmatpush3.xpose.msk.msra.mxu1 %vm1494_vm3, %v3004_v55  ;;  %7899 = vmatprep.subr.mxu0 %v12506_v51  ;;  %v1748_v31 = vsel %vm1494_vm3, %v10375_v58, 0.0 }
 0x40b   : > { %7922 = vmatprep.subr.mxu1 %v12506_v51  ;;  %v8607_v41 = vpop.eup %8606  ;;  %8630 = vpow2.f32 %v1708_v35 }
 0x40c   : > { %v8609_v57 = vpop.eup %8608  ;;  %v2993_v39 = vmul.f32 %v8607_v41, %v12521_v16  ;;  %v514_v16 = vmul.f32 %v9162_v27, %v10075_v52 }
 0x40d   : > { %1755 = vadd.xlane.f32.xlu0 %v1754_v34  ;;  %7900 = vmatpush3.xpose.msk.msra.mxu0 %vm1494_vm3, %v2995_v20  ;;  %v10386_v38 = vpop.eup %8610  ;;  %v3001_v55 = vmul.f32 %v8609_v57, %v12522_v11 }
 0x40e   : > { %7923 = vmatpush3.xpose.msk.msra.mxu1 %vm1494_vm3, %v3003_v45  ;;  %7901 = vmatprep.subr.mxu0 %v12506_v51  ;;  %v10390_v32 = vpop.eup %8612  ;;  %v1745_v44 = vsel %vm1494_vm3, %v10386_v38, 0.0 }
 0x40f   : > { %7924 = vmatprep.subr.mxu1 %v12506_v51  ;;  %v8615_v40 = vpop.eup %8614  ;;  %v1811_v56 = vsel %vm1494_vm3, %v10390_v32, 0.0 }
 0x410   : > { %v8617_v37 = vpop.eup %8616  ;;  %v2992_v29 = vmul.f32 %v8615_v40, %v12523_v63 }
 0x411   : > { %1752 = vadd.xlane.f32.xlu0 %v1751_v50  ;;  %7902 = vmatpush3.xpose.msk.msra.mxu0 %vm1494_vm3, %v2994_v5  ;;  %v10404_v42 = vpop.eup %8618  ;;  %v3027_v20 = vmul.f32 %v8617_v37, %v10068_v18  ;;  %v12527_v37 = vld [vmem:[#allocation3_spill] sm:$0xff] }
 0x412   : > { %7925 = vmatpush3.xpose.msk.msra.mxu1 %vm1494_vm3, %v3002_v43  ;;  %7903 = vmatprep.subr.mxu0 %v12506_v51  ;;  %v8621_v12 = vpop.eup %8620  ;;  %v1742_v45 = vsel %vm1494_vm3, %v10404_v42, 0.0 }
 0x413   : > { %7926 = vmatprep.subr.mxu1 %v12506_v51  ;;  %v10415_v34 = vpop.eup %8622  ;;  %v3026_v3 = vmul.f32 %v8621_v12, %v10050_v8  ;;  %v12524_v8 = vld [vmem:[#allocation10_spill] sm:$0xff]  ;;  %v12528_v12 = vld [vmem:[#allocation71_spill] sm:$0xff] }
 0x414   : > { %v8625_v18 = vpop.eup %8624  ;;  %v1739_v4 = vsel %vm1494_vm3, %v10415_v34, 0.0  ;;  %v364_v15 = vmul.f32 %v12524_v8, %v10243_v22 }
 0x415   : > { %1749 = vadd.xlane.f32.xlu0 %v1748_v31  ;;  %7904 = vmatpush3.xpose.msk.msra.mxu0 %vm1494_vm3, %v2993_v39  ;;  %v10424_v48 = vpop.eup %8626  ;;  %v3025_v5 = vmul.f32 %v8625_v18, %v10038_v30  ;;  %v10440_v30 = vpop.xlane.xlu1 %1554  ;;  %v12526_v39 = vld [vmem:[#allocation8_spill] sm:$0xff] }
 0x416   : > { %7927 = vmatpush3.xpose.msk.msra.mxu1 %vm1494_vm3, %v3001_v55  ;;  %7905 = vmatprep.subr.mxu0 %v12506_v51  ;;  %v8629_v41 = vpop.eup %8628  ;;  %v1817_v50 = vsel %vm1519_vm4, %v10424_v48, 0.0  ;;  %v538_v40 = vadd.f32 %v514_v16, %v364_v15 }
 0x417   : > { %1812 = vadd.xlane.f32.xlu1 %v1811_v56  ;;  %7952 = vmatprep.subr.mxu1 %v12506_v51  ;;  %v3024_v43 = vmul.f32 %v8629_v41, %v10032_v7  ;;  %v562_v7 = vadd.f32 %v514_v16, %v388_v2  ;;  %v12530_v2 = vld [vmem:[#allocation73_spill] sm:$0xff] }
 0x418   : > { %v10438_v57 = vpop.eup %8630 }
 0x419   : > { %7929 = vmatmul.mubr.msk.f32.vlgmr.msra.gmra.mxu1 %vm1494_vm3, %v3041_v0  ;;  %1746 = vadd.xlane.f32.xlu0 %v1745_v44  ;;  %v1814_v22 = vsel %vm1494_vm3, %v10438_v57, 0.0  ;;  %v10449_v31 = vpop.permute.xlu1 %736 }
 0x41a   : > { %7906 = vmatpush3.xpose.msk.msra.mxu0 %vm1494_vm3, %v2992_v29  ;;  %7953 = vmatpush3.xpose.msk.msra.mxu1 %vm1494_vm3, %v3027_v20 }
 0x41b   : > { %7954 = vmatprep.subr.mxu1 %v12506_v51  ;;  %7931 = vmatprep.subr.mxu0 %v12506_v51 }
 0x41c   : > { %7970 = vmatprep.mubr.msk.f32.mxu1 %vm9056_vm0, %v12506_v51 }
 0x41d   : > { %1743 = vadd.xlane.f32.xlu0 %v1742_v45  ;;  %v12529_v45 = vld [vmem:[#allocation48_spill] sm:$0xff] }
 0x41e   : > { %7955 = vmatpush3.xpose.msk.msra.mxu1 %vm1494_vm3, %v3026_v3  ;;  %v1627_v3 = vsub.f32 %v12529_v45, %v12528_v12  ;;  %v12541_v45 = vld [vmem:[#allocation7_spill] sm:$0xff] }
 0x41f   : > { %7956 = vmatprep.subr.mxu1 %v12506_v51 }
 0x420   : > { %v1686_v15 = vmul.f32 1.442695, %v1627_v3 }
 0x421   : > { %1740 = vadd.xlane.f32.xlu0 %v1739_v4 }
 0x422   : > { %7957 = vmatpush3.xpose.msk.msra.mxu1 %vm1494_vm3, %v3025_v5 }
 0x423   : > { %7958 = vmatprep.subr.mxu1 %v12506_v51 }
 0x425   : > { %1818 = vadd.xlane.f32.xlu0 %v1817_v50  ;;  %v2928_v23 = vpop.xlane.xlu0 %2927 }
 0x426   : > { %7959 = vmatpush3.xpose.msk.msra.mxu1 %vm1494_vm3, %v3024_v43  ;;  %8632 = vrcp.f32 %v2928_v23 }
 0x427   : > { %7960 = vmatprep.subr.mxu1 %v12506_v51  ;;  %8634 = vrcp.f32 %v10323_v6  ;;  %v12531_v6 = vld [vmem:[#allocation51_spill] sm:$0xff] }
 0x428   : > { %665 = vbcast.lane.b32.xlu1 %v12526_v39, 320  ;;  %8636 = vrcp.f32 %v10276_v17  ;;  %v1626_v50 = vsub.f32 %v12531_v6, %v12530_v2  ;;  %v12532_v17 = vld [vmem:[#allocation78_spill] sm:$0xff] }
 0x429   : > { %1815 = vadd.xlane.f32.xlu0 %v1814_v22  ;;  %v619_v35 = vpop.permute.xlu0 %618  ;;  %8638 = vpow2.f32 %v1686_v15  ;;  %v12534_v22 = vld [vmem:[#allocation52_spill] sm:$0xff] }
 0x42a   : > { %v688_v11 = vadd.f32 %v619_v35, %v538_v40  ;;  %v10451_v55 = vadd.f32 %v619_v35, %v562_v7  ;;  %v1684_v16 = vmul.f32 1.442695, %v1626_v50  ;;  %v12535_v7 = vld [vmem:[#allocation4_spill] sm:$0xff]  ;;  %v12536_v35 = vld [vmem:[#allocation75_spill] sm:$0xff]  ;;  %v12544_v50 = vld [vmem:[#allocation70_spill] sm:$0xff] }
 0x42c   : > { %v766_v52 = vmul.f32 %v10449_v31, %v688_v11  ;;  %751 = vbcast.lane.b32.xlu1 %v12527_v37, 256  ;;  %8640 = vpow2.f32 %v1684_v16 }
 0x42e   : > { %v3028_v56 = vsel %vm1494_vm3, %v766_v52, 0.0 }
 0x42f   : > { %v3029_v0 = vrot.slane %v3028_v56, 4 }
 0x431   : > { %v3030_v44 = vadd.f32 %v3029_v0, %v3028_v56  ;;  %v12537_v56 = vld [vmem:[#allocation76_spill] sm:$0xff]  ;;  %v12538_v0 = vld [vmem:[#allocation54_spill] sm:$0xff] }
 0x433   : > { %v3031_v63 = vrot.slane %v3030_v44, 2  ;;  %v8633_v20 = vpop.eup %8632 }
 0x434   : > { %v3018_v5 = vmul.f32 %v8633_v20, %v10086_v59  ;;  %v8635_v41 = vpop.eup %8634  ;;  %v12533_v59 = vld [vmem:[#allocation74_spill] sm:$0xff]  ;;  %v12540_v20 = vld [vmem:[#allocation68_spill] sm:$0xff] }
 0x435   : > { %v3032_v29 = vadd.f32 %v3031_v63, %v3030_v44  ;;  %v3017_v43 = vmul.f32 %v8635_v41, %v12532_v17  ;;  %v8637_v23 = vpop.eup %8636  ;;  %v1634_v40 = vsub.f32 %v12534_v22, %v12533_v59  ;;  %v1625_v44 = vsub.f32 %v12538_v0, %v12537_v56  ;;  %v12539_v63 = vld [vmem:[#allocation5_spill] sm:$0xff]  ;;  %v12545_v17 = vld [vmem:[#allocation47_spill] sm:$0xff] }
 0x436   : > { %v3016_v11 = vmul.f32 %v8637_v23, %v12536_v35  ;;  %v1624_v12 = vsub.f32 %v12540_v20, %v10253_v61  ;;  %v1636_v61 = vsub.f32 %v12545_v17, %v12544_v50 }
 0x437   : > { %v3033_v18 = vrot.slane %v3032_v29, 1  ;;  %v1700_v52 = vmul.f32 1.442695, %v1634_v40 }
 0x438   : > { %v1680_v3 = vmul.f32 1.442695, %v1624_v12  ;;  %v1704_v16 = vmul.f32 1.442695, %v1636_v61 }
 0x439   : > { %v3034_v4 = vadd.f32 %v3033_v18, %v3032_v29  ;;  %8642 = vpow2.f32 %v1700_v52  ;;  %v1682_v29 = vmul.f32 1.442695, %v1625_v44  ;;  %v10483_v18 = vpop.eup %8638 }
 0x43a   : > { %v1781_v15 = vsel %vm1494_vm3, %v10483_v18, 0.0  ;;  %v10489_v2 = vpop.eup %8640 }
 0x43b   : > { %7908 = vmatmul.mubr.msk.f32.vlgmr.msra.gmra.mxu0 %vm1494_vm3, %v3034_v4  ;;  %8644 = vpow2.f32 %v1682_v29  ;;  %v12542_v4 = vld [vmem:[#allocation69_spill] sm:$0xff] }
 0x43c   : > { %7932 = vmatpush3.xpose.msk.msra.mxu0 %vm1494_vm3, %v3018_v5  ;;  %7949 = vmatprep.mubr.msk.f32.mxu0 %vm9056_vm0, %v12506_v51  ;;  %v12543_v5 = vld [vmem:[#allocation46_spill] sm:$0xff]  ;;  %8646 = vpow2.f32 %v1680_v3 }
 0x43d   : > { %7933 = vmatprep.subr.mxu0 %v12506_v51  ;;  %v1628_v41 = vsub.f32 %v12543_v5, %v12542_v4 }
 0x43f   : > { %321 = vbcast.lane.b32.xlu0 %v12535_v7, 320  ;;  %v1688_v6 = vmul.f32 1.442695, %v1628_v41  ;;  %v2916_v40 = vpop.xlane.xlu1 %2915 }
 0x440   : > { %7934 = vmatpush3.xpose.msk.msra.mxu0 %vm1494_vm3, %v3017_v43  ;;  %v1778_v43 = vsel %vm1494_vm3, %v10489_v2, 0.0 }
 0x441   : > { %7935 = vmatprep.subr.mxu0 %v12506_v51  ;;  %8648 = vpow2.f32 %v1688_v6 }
 0x442   : > { %8650 = vpow2.f32 %v1704_v16 }
 0x443   : > { %270 = vbcast.lane.b32.xlu0 %v12539_v63, 320  ;;  %v10520_v6 = vpop.xlane.xlu1 %1737 }
 0x444   : > { %7936 = vmatpush3.xpose.msk.msra.mxu0 %vm1494_vm3, %v3016_v11 }
 0x445   : > { %7937 = vmatprep.subr.mxu0 %v12506_v51 }
 0x446   : > { %v10495_v23 = vpop.eup %8642 }
 0x447   : > { %440 = vbcast.lane.b32.xlu0 %v12541_v45, 320  ;;  %v1802_v59 = vsel %vm1494_vm3, %v10495_v23, 0.0 }
 0x448   : > { %v10499_v22 = vpop.eup %8644 }
 0x449   : > { %v1775_v11 = vsel %vm1494_vm3, %v10499_v22, 0.0  ;;  %v10503_v52 = vpop.eup %8646 }
 0x44a   : > { %v1772_v0 = vsel %vm1494_vm3, %v10503_v52, 0.0 }
 0x44e   : > { %v10509_v44 = vpop.eup %8648 }
 0x44f   : > { %v1784_v20 = vsel %vm1494_vm3, %v10509_v44, 0.0  ;;  %v10513_v12 = vpop.eup %8650 }
 0x450   : > { %1782 = vadd.xlane.f32.xlu1 %v1781_v15  ;;  %v1808_v5 = vsel %vm1494_vm3, %v10513_v12, 0.0 }
 0x454   : > { %1779 = vadd.xlane.f32.xlu1 %v1778_v43  ;;  %v10526_v43 = vpop.xlane.xlu1 %1734 }
 0x458   : > { %1803 = vadd.xlane.f32.xlu1 %v1802_v59 }
 0x45a   : > { %v2919_v35 = vpop.xlane.xlu0 %2918 }
 0x45b   : > { %8652 = vrcp.f32 %v2919_v35  ;;  %v12546_v35 = vld [vmem:[#allocation77_spill] sm:$0xff] }
 0x45c   : > { %1776 = vadd.xlane.f32.xlu1 %v1775_v11  ;;  %8654 = vrcp.f32 %v2916_v40  ;;  %v724_v11 = vadd.f32 %v10267_v1, %v12546_v35  ;;  %v774_v1 = vmul.f32 %v10449_v31, %v10451_v55  ;;  %v12548_v35 = vld [vmem:[#allocation2_spill] sm:$0xff] }
 0x45e   : > { %v10505_v56 = vpop.xlane.xlu0 %1578 }
 0x460   : > { %1773 = vadd.xlane.f32.xlu1 %v1772_v0 }
 0x462   : > { %v2943_v29 = vpop.xlane.xlu0 %2942 }
 0x463   : > { %8656 = vrcp.f32 %v2943_v29  ;;  %v778_v29 = vmul.f32 %v10293_v47, %v724_v11 }
 0x466   : > { %1785 = vadd.xlane.f32.xlu0 %v1784_v20  ;;  %v10515_v3 = vpop.xlane.xlu0 %1551 }
 0x468   : > { %v8653_v4 = vpop.eup %8652 }
 0x469   : > { %v3015_v41 = vmul.f32 %v8653_v4, %v10171_v46  ;;  %v8655_v15 = vpop.eup %8654 }
 0x46a   : > { %1809 = vadd.xlane.f32.xlu0 %v1808_v5  ;;  %v2940_v50 = vpop.xlane.xlu0 %2939  ;;  %v3014_v17 = vmul.f32 %v8655_v15, %v10110_v53  ;;  %v10533_v53 = vpop.xlane.xlu1 %1731  ;;  %v12547_v5 = vld [vmem:[#allocation60_spill] sm:$0xff] }
 0x46b   : > { %7938 = vmatpush3.xpose.msk.msra.mxu0 %vm1494_vm3, %v3015_v41  ;;  %8658 = vrcp.f32 %v2940_v50  ;;  %v1632_v41 = vsub.f32 %v12547_v5, %v10079_v24  ;;  %v3049_v50 = vsel %vm1494_vm3, %v778_v29, 0.0 }
 0x46c   : > { %7939 = vmatprep.subr.mxu0 %v12506_v51  ;;  %v3050_v24 = vrot.slane %v3049_v50, 4 }
 0x46e   : > { %v2913_v61 = vpop.xlane.xlu0 %2912  ;;  %v10541_v15 = vpop.xlane.xlu1 %1728 }
 0x46f   : > { %8660 = vrcp.f32 %v2913_v61  ;;  %7940 = vmatpush3.xpose.msk.msra.mxu0 %vm1494_vm3, %v3014_v17  ;;  %v1696_v61 = vmul.f32 1.442695, %v1632_v41  ;;  %v12550_v41 = vld [vmem:[#allocation72_spill] sm:$0xff] }
 0x470   : > { %7941 = vmatprep.subr.mxu0 %v12506_v51  ;;  %v8657_v46 = vpop.eup %8656 }
 0x471   : > { %467 = vbcast.lane.b32.xlu1 %v12502_v54, 272  ;;  %v3023_v59 = vmul.f32 %v8657_v46, %v10194_v13  ;;  %v3042_v46 = vsel %vm1494_vm3, %v774_v1, 0.0 }
 0x472   : > { %v2937_v16 = vpop.xlane.xlu0 %2936  ;;  %v10554_v31 = vpop.xlane.xlu1 %1725 }
 0x473   : > { %8662 = vrcp.f32 %v2937_v16  ;;  %7961 = vmatpush3.xpose.msk.msra.mxu1 %vm1494_vm3, %v3023_v59  ;;  %v3051_v59 = vadd.f32 %v3050_v24, %v3049_v50  ;;  %v12551_v50 = vld [vmem:[#allocation50_spill] sm:$0xff] }
 0x474   : > { %7962 = vmatprep.subr.mxu1 %v12506_v51  ;;  %v1635_v1 = vsub.f32 %v12551_v50, %v12550_v41 }
 0x475   : > { %v3052_v29 = vrot.slane %v3051_v59, 2 }
 0x476   : > { %v2910_v40 = vpop.xlane.xlu0 %2909 }
 0x477   : > { %8664 = vrcp.f32 %v2910_v40  ;;  %v3043_v40 = vrot.slane %v3042_v46, 4 }
 0x478   : > { %v8659_v0 = vpop.eup %8658 }
 0x479   : > { %v3022_v4 = vmul.f32 %v8659_v0, %v10215_v36 }
 0x47a   : > { %v2934_v20 = vpop.xlane.xlu0 %2933 }
 0x47b   : > { %8666 = vrcp.f32 %v2934_v20  ;;  %7963 = vmatpush3.xpose.msk.msra.mxu1 %vm1494_vm3, %v3022_v4  ;;  %v3044_v20 = vadd.f32 %v3043_v40, %v3042_v46  ;;  %v10561_v4 = vpop.xlane.xlu1 %1722  ;;  %v1702_v46 = vmul.f32 1.442695, %v1635_v1 }
 0x47c   : > { %v8661_v13 = vpop.eup %8660  ;;  %7964 = vmatprep.subr.mxu1 %v12506_v51 }
 0x47d   : > { %v3013_v17 = vmul.f32 %v8661_v13, %v10225_v49  ;;  %v12549_v13 = vld [vmem:[#allocation40_spill] sm:$0xff] }
 0x47e   : > { %v2907_v47 = vpop.xlane.xlu0 %2906 }
 0x47f   : > { %8668 = vrcp.f32 %v2907_v47  ;;  %7942 = vmatpush3.xpose.msk.msra.mxu0 %vm1494_vm3, %v3013_v17  ;;  %v3053_v47 = vadd.f32 %v3052_v29, %v3051_v59 }
 0x480   : > { %v8663_v36 = vpop.eup %8662  ;;  %614 = vbcast.lane.b32.xlu0 %v12460_v25, 320  ;;  %7943 = vmatprep.subr.mxu0 %v12506_v51 }
 0x481   : > { %v3021_v16 = vmul.f32 %v8663_v36, %v10235_v60  ;;  %v3045_v36 = vrot.slane %v3044_v20, 2 }
 0x482   : > { %v2931_v49 = vpop.xlane.xlu0 %2930 }
 0x483   : > { %8670 = vrcp.f32 %v2931_v49  ;;  %7965 = vmatpush3.xpose.msk.msra.mxu1 %vm1494_vm3, %v3021_v16  ;;  %v12554_v16 = vld [vmem:[#allocation64_spill] sm:$0xff] }
 0x484   : > { %v8665_v55 = vpop.eup %8664  ;;  %8672 = vpow2.f32 %v1696_v61  ;;  %732 = vbcast.lane.b32.xlu0 %v12548_v35, 256  ;;  %7966 = vmatprep.subr.mxu1 %v12506_v51  ;;  %v12552_v61 = vld [vmem:[#allocation22_spill] sm:$0xff] }
 0x485   : > { %v3012_v11 = vmul.f32 %v8665_v55, %v10241_v9  ;;  %v1720_v55 = vpop.xlane.xlu1 %1719 }
 0x486   : > { %v2904_v0 = vpop.xlane.xlu0 %2903 }
 0x487   : > { %8674 = vrcp.f32 %v2904_v0  ;;  %7944 = vmatpush3.xpose.msk.msra.mxu0 %vm1494_vm3, %v3012_v11  ;;  %v3054_v0 = vrot.slane %v3053_v47, 1 }
 0x488   : > { %v8667_v60 = vpop.eup %8666  ;;  %7945 = vmatprep.subr.mxu0 %v12506_v51  ;;  %8676 = vrcp.f32 %v10520_v6  ;;  %v12553_v6 = vld [vmem:[#allocation39_spill] sm:$0xff] }
 0x489   : > { %v3020_v5 = vmul.f32 %v8667_v60, %v12549_v13  ;;  %v1633_v49 = vsub.f32 %v12554_v16, %v12553_v6  ;;  %v3046_v60 = vadd.f32 %v3045_v36, %v3044_v20  ;;  %v3055_v41 = vadd.f32 %v3054_v0, %v3053_v47  ;;  %v1717_v1 = vpop.xlane.xlu1 %1716 }
 0x48a   : > { %v1765_v17 = vpop.xlane.xlu0 %1764 }
 0x48b   : > { %8678 = vrcp.f32 %v1765_v17  ;;  %7967 = vmatpush3.xpose.msk.msra.mxu1 %vm1494_vm3, %v3020_v5  ;;  %v1698_v29 = vmul.f32 1.442695, %v1633_v49  ;;  %v3047_v50 = vrot.slane %v3046_v60, 1 }
 0x48c   : > { %v8669_v9 = vpop.eup %8668  ;;  %7968 = vmatprep.subr.mxu1 %v12506_v51  ;;  %8680 = vrcp.f32 %v10526_v43 }
 0x48d   : > { %v3011_v24 = vmul.f32 %v8669_v9, %v12552_v61  ;;  %v3048_v47 = vadd.f32 %v3047_v50, %v3046_v60 }
 0x48e   : > { %v1762_v40 = vpop.xlane.xlu0 %1761 }
 0x48f   : > { %8682 = vrcp.f32 %v1762_v40  ;;  %7946 = vmatpush3.xpose.msk.msra.mxu0 %vm1494_vm3, %v3011_v24  ;;  %v1714_v24 = vpop.xlane.xlu1 %1713 }
 0x490   : > { %v8671_v11 = vpop.eup %8670  ;;  %7947 = vmatprep.subr.mxu0 %v12506_v51  ;;  %8684 = vrcp.f32 %v10533_v53 }
 0x491   : > { %v10576_v59 = vpop.eup %8672  ;;  %v3019_v43 = vmul.f32 %v8671_v11, %v10271_v26  ;;  %8686 = vpow2.f32 %v1702_v46 }
 0x492   : > { %v1759_v13 = vpop.xlane.xlu0 %1758  ;;  %v1796_v20 = vsel %vm1494_vm3, %v10576_v59, 0.0 }
 0x493   : > { %8688 = vrcp.f32 %v1759_v13  ;;  %7969 = vmatpush3.xpose.msk.msra.mxu1 %vm1494_vm3, %v3019_v43  ;;  %v10608_v60 = vpop.xlane.xlu1 %1791 }
 0x494   : > { %v8675_v5 = vpop.eup %8674  ;;  %7994 = vmatprep.subr.mxu1 %v12506_v51  ;;  %8690 = vrcp.f32 %v10541_v15  ;;  %v12555_v15 = vld [vmem:[#allocation9_spill] sm:$0xff] }
 0x495   : > { %1797 = vadd.xlane.f32.xlu1 %v1796_v20  ;;  %v3010_v26 = vmul.f32 %v8675_v5, %v10284_v19  ;;  %v8677_v53 = vpop.eup %8676  ;;  %8692 = vpow2.f32 %v1698_v29 }
 0x496   : > { %7971 = vmatmul.mubr.msk.f32.vlgmr.msra.gmra.mxu1 %vm1494_vm3, %v3055_v41  ;;  %v1756_v17 = vpop.xlane.xlu0 %1755  ;;  %v1864_v36 = vmul.f32 %v8677_v53, %v12555_v15 }
 0x497   : > { %8694 = vrcp.f32 %v1756_v17  ;;  %7948 = vmatpush3.xpose.msk.msra.mxu0 %vm1494_vm3, %v3010_v26  ;;  %8012 = vmatprep.mubr.msk.f32.mxu1 %vm9056_vm0, %v12506_v51  ;;  %v10624_v53 = vpop.xlane.xlu1 %1788 }
 0x498   : > { %v8679_v9 = vpop.eup %8678  ;;  %7973 = vmatprep.subr.mxu0 %v12506_v51  ;;  %8696 = vrcp.f32 %v10554_v31  ;;  %v12556_v31 = vld [vmem:[#allocation80_spill] sm:$0xff] }
 0x499   : > { %v1873_v19 = vmul.f32 %v8679_v9, %v10303_v33  ;;  %v8681_v61 = vpop.eup %8680 }
 0x49a   : > { %7950 = vmatmul.mubr.msk.f32.vlgmr.msra.gmra.mxu0 %vm1494_vm3, %v3048_v47  ;;  %v1753_v46 = vpop.xlane.xlu0 %1752  ;;  %v1863_v16 = vmul.f32 %v8681_v61, %v12556_v31 }
 0x49b   : > { %8698 = vrcp.f32 %v1753_v46  ;;  %7974 = vmatpush3.xpose.msk.msra.mxu0 %vm1494_vm3, %v1864_v36  ;;  %7995 = vmatpush3.xpose.msk.msra.mxu1 %vm1494_vm3, %v1873_v19  ;;  %v492_v19 = vpop.permute.xlu1 %491 }
 0x49c   : > { %v8683_v6 = vpop.eup %8682  ;;  %7975 = vmatprep.subr.mxu0 %v12506_v51  ;;  %7996 = vmatprep.subr.mxu1 %v12506_v51  ;;  %8700 = vrcp.f32 %v10561_v4 }
 0x49d   : > { %v1872_v33 = vmul.f32 %v8683_v6, %v10320_v10  ;;  %7991 = vmatprep.mubr.msk.f32.mxu0 %vm9056_vm0, %v12506_v51  ;;  %v8685_v49 = vpop.eup %8684  ;;  %v12557_v10 = vld [vmem:[#allocation81_spill] sm:$0xff] }
 0x49e   : > { %v1750_v40 = vpop.xlane.xlu0 %1749  ;;  %v10604_v11 = vpop.eup %8686  ;;  %v1862_v4 = vmul.f32 %v8685_v49, %v12557_v10  ;;  %v12562_v10 = vld [vmem:[#allocation63_spill] sm:$0xff] }
 0x49f   : > { %8702 = vrcp.f32 %v1750_v40  ;;  %7976 = vmatpush3.xpose.msk.msra.mxu0 %vm1494_vm3, %v1863_v16  ;;  %7997 = vmatpush3.xpose.msk.msra.mxu1 %vm1494_vm3, %v1872_v33  ;;  %v1805_v5 = vsel %vm1494_vm3, %v10604_v11, 0.0  ;;  %v12561_v40 = vld [vmem:[#allocation29_spill] sm:$0xff] }
 0x4a0   : > { %v8689_v0 = vpop.eup %8688  ;;  %7977 = vmatprep.subr.mxu0 %v12506_v51  ;;  %7998 = vmatprep.subr.mxu1 %v12506_v51  ;;  %8704 = vrcp.f32 %v1720_v55  ;;  %v1813_v49 = vpop.xlane.xlu1 %1812 }
 0x4a1   : > { %v1871_v43 = vmul.f32 %v8689_v0, %v10335_v28  ;;  %v8691_v29 = vpop.eup %8690  ;;  %v12558_v28 = vld [vmem:[#allocation43_spill] sm:$0xff]  ;;  %v1622_v0 = vsub.f32 %v12561_v40, %v10515_v3  ;;  %v12563_v3 = vld [vmem:[#allocation41_spill] sm:$0xff] }
 0x4a2   : > { %v1747_v13 = vpop.xlane.xlu0 %1746  ;;  %v10616_v41 = vpop.eup %8692  ;;  %v1861_v55 = vmul.f32 %v8691_v29, %v12558_v28 }
 0x4a3   : > { %8706 = vrcp.f32 %v1747_v13  ;;  %1806 = vadd.xlane.f32.xlu0 %v1805_v5  ;;  %7978 = vmatpush3.xpose.msk.msra.mxu0 %vm1494_vm3, %v1862_v4  ;;  %v1799_v9 = vsel %vm1494_vm3, %v10616_v41, 0.0 }
 0x4a4   : > { %v8695_v50 = vpop.eup %8694  ;;  %7999 = vmatpush3.xpose.msk.msra.mxu1 %vm1494_vm3, %v1871_v43  ;;  %7979 = vmatprep.subr.mxu0 %v12506_v51  ;;  %8708 = vrcp.f32 %v1717_v1  ;;  %v10652_v5 = vpop.permute.xlu1 %665 }
 0x4a5   : > { %8000 = vmatprep.subr.mxu1 %v12506_v51  ;;  %v1870_v20 = vmul.f32 %v8695_v50, %v10351_v62  ;;  %v8697_v26 = vpop.eup %8696  ;;  %v12559_v62 = vld [vmem:[#allocation33_spill] sm:$0xff]  ;;  %v1676_v50 = vmul.f32 1.442695, %v1622_v0 }
 0x4a6   : > { %641 = vbcast.lane.b32.xlu1 %v12526_v39, 272  ;;  %v1744_v17 = vpop.xlane.xlu0 %1743  ;;  %v1860_v47 = vmul.f32 %v8697_v26, %v12559_v62  ;;  %v10660_v26 = vmul.f32 %v9162_v27, %v492_v19 }
 0x4a7   : > { %8710 = vrcp.f32 %v1744_v17  ;;  %1800 = vadd.xlane.f32.xlu0 %v1799_v9  ;;  %7980 = vmatpush3.xpose.msk.msra.mxu0 %vm1494_vm3, %v1861_v55  ;;  %v12564_v17 = vld [vmem:[#allocation11_spill] sm:$0xff] }
 0x4a8   : > { %v8699_v1 = vpop.eup %8698  ;;  %8001 = vmatpush3.xpose.msk.msra.mxu1 %vm1494_vm3, %v1870_v20  ;;  %7981 = vmatprep.subr.mxu0 %v12506_v51  ;;  %8712 = vrcp.f32 %v1714_v24  ;;  %v12560_v24 = vld [vmem:[#allocation15_spill] sm:$0xff] }
 0x4a9   : > { %8002 = vmatprep.subr.mxu1 %v12506_v51  ;;  %v1869_v15 = vmul.f32 %v8699_v1, %v10362_v21  ;;  %v8701_v36 = vpop.eup %8700 }
 0x4aa   : > { %v1741_v61 = vpop.xlane.xlu0 %1740  ;;  %v1859_v6 = vmul.f32 %v8701_v36, %v12560_v24  ;;  %v10671_v36 = vpop.permute.xlu1 %751 }
 0x4ab   : > { %8714 = vrcp.f32 %v1741_v61  ;;  %7982 = vmatpush3.xpose.msk.msra.mxu0 %vm1494_vm3, %v1860_v47 }
 0x4ac   : > { %v8703_v46 = vpop.eup %8702  ;;  %8003 = vmatpush3.xpose.msk.msra.mxu1 %vm1494_vm3, %v1869_v15  ;;  %7983 = vmatprep.subr.mxu0 %v12506_v51  ;;  %8716 = vpow2.f32 %v1676_v50 }
 0x4ad   : > { %8004 = vmatprep.subr.mxu1 %v12506_v51  ;;  %v1868_v31 = vmul.f32 %v8703_v46, %v10375_v58  ;;  %v8705_v16 = vpop.eup %8704 }
 0x4ae   : > { %v1819_v33 = vpop.xlane.xlu0 %1818  ;;  %v1858_v4 = vmul.f32 %v8705_v16, %v12562_v10  ;;  %v12566_v10 = vld [vmem:[#allocation79_spill] sm:$0xff] }
 0x4af   : > { %7984 = vmatpush3.xpose.msk.msra.mxu0 %vm1494_vm3, %v1859_v6  ;;  %8718 = vrcp.f32 %v1819_v33 }
 0x4b0   : > { %v8707_v21 = vpop.eup %8706  ;;  %8005 = vmatpush3.xpose.msk.msra.mxu1 %vm1494_vm3, %v1868_v31  ;;  %7985 = vmatprep.subr.mxu0 %v12506_v51 }
 0x4b1   : > { %8006 = vmatprep.subr.mxu1 %v12506_v51  ;;  %v1867_v43 = vmul.f32 %v8707_v21, %v10386_v38  ;;  %v8709_v58 = vpop.eup %8708 }
 0x4b2   : > { %v1816_v29 = vpop.xlane.xlu0 %1815  ;;  %v1857_v28 = vmul.f32 %v8709_v58, %v12563_v3 }
 0x4b3   : > { %7986 = vmatpush3.xpose.msk.msra.mxu0 %vm1494_vm3, %v1858_v4  ;;  %8720 = vrcp.f32 %v1816_v29  ;;  %v1623_v4 = vsub.f32 %v12566_v10, %v10440_v30  ;;  %v12567_v29 = vld [vmem:[#allocation31_spill] sm:$0xff] }
 0x4b4   : > { %v8711_v13 = vpop.eup %8710  ;;  %8007 = vmatpush3.xpose.msk.msra.mxu1 %vm1494_vm3, %v1867_v43  ;;  %7987 = vmatprep.subr.mxu0 %v12506_v51  ;;  %8722 = vrcp.f32 %v1813_v49 }
 0x4b5   : > { %8008 = vmatprep.subr.mxu1 %v12506_v51  ;;  %v1866_v55 = vmul.f32 %v8711_v13, %v10404_v42  ;;  %v8713_v20 = vpop.eup %8712  ;;  %v12565_v42 = vld [vmem:[#allocation61_spill] sm:$0xff]  ;;  %v1678_v49 = vmul.f32 1.442695, %v1623_v4  ;;  %v1631_v13 = vsub.f32 %v12567_v29, %v10505_v56 }
 0x4b6   : > { %v10657_v38 = vpop.permute.xlu0 %321  ;;  %v1856_v47 = vmul.f32 %v8713_v20, %v12565_v42 }
 0x4b7   : > { %v375_v9 = vmul.f32 %v12564_v17, %v10657_v38  ;;  %7988 = vmatpush3.xpose.msk.msra.mxu0 %vm1494_vm3, %v1857_v28  ;;  %8724 = vpow2.f32 %v1678_v49 }
 0x4b8   : > { %v8715_v1 = vpop.eup %8714  ;;  %8009 = vmatpush3.xpose.msk.msra.mxu1 %vm1494_vm3, %v1866_v55  ;;  %7989 = vmatprep.subr.mxu0 %v12506_v51 }
 0x4b9   : > { %v549_v62 = vadd.f32 %v10660_v26, %v375_v9  ;;  %8010 = vmatprep.subr.mxu1 %v12506_v51  ;;  %v1865_v15 = vmul.f32 %v8715_v1, %v10415_v34  ;;  %v10683_v31 = vpop.eup %8716 }
 0x4ba   : > { %v1766_v40 = vsel %vm1494_vm3, %v10683_v31, 0.0  ;;  %v10711_v9 = vpop.permute.xlu0 %270 }
 0x4bb   : > { %v699_v19 = vadd.f32 %v10652_v5, %v549_v62  ;;  %7990 = vmatpush3.xpose.msk.msra.mxu0 %vm1494_vm3, %v1856_v47 }
 0x4bc   : > { %8011 = vmatpush3.xpose.msk.msra.mxu1 %vm1494_vm3, %v1865_v15  ;;  %8015 = vmatprep.subr.mxu0 %v12506_v51  ;;  %v8719_v33 = vpop.eup %8718  ;;  %v363_v15 = vmul.f32 %v12524_v8, %v10711_v9 }
 0x4bd   : > { %v769_v61 = vmul.f32 %v10671_v36, %v699_v19  ;;  %297 = vbcast.lane.b32.xlu0 %v12535_v7, 272  ;;  %8036 = vmatprep.subr.mxu1 %v12506_v51  ;;  %v1891_v43 = vmul.f32 %v8719_v33, %v10424_v48  ;;  %v1694_v48 = vmul.f32 1.442695, %v1631_v13 }
 0x4be   : > { %v441_v1 = vpop.permute.xlu0 %440 }
 0x4bf   : > { %v1899_v34 = vsel %vm1494_vm3, %v769_v61, 0.0  ;;  %8726 = vpow2.f32 %v1694_v48  ;;  %v10716_v47 = vmul.f32 %v9162_v27, %v441_v1 }
 0x4c0   : > { %v1900_v46 = vrot.slane %v1899_v34, 4  ;;  %v8721_v58 = vpop.eup %8720 }
 0x4c1   : > { %246 = vbcast.lane.b32.xlu0 %v12539_v63, 272  ;;  %v1890_v50 = vmul.f32 %v8721_v58, %v10438_v57  ;;  %v8723_v3 = vpop.eup %8722 }
 0x4c2   : > { %v1901_v24 = vadd.f32 %v1900_v46, %v1899_v34  ;;  %v1889_v30 = vmul.f32 %v8723_v3, %v10390_v32  ;;  %v537_v34 = vadd.f32 %v10716_v47, %v363_v15  ;;  %v12570_v3 = vld [vmem:[#allocation42_spill] sm:$0xff] }
 0x4c4   : > { %v1902_v6 = vrot.slane %v1901_v24, 2  ;;  %v10705_v56 = vpop.eup %8724 }
 0x4c5   : > { %416 = vbcast.lane.b32.xlu0 %v12541_v45, 272  ;;  %v1769_v57 = vsel %vm1494_vm3, %v10705_v56, 0.0 }
 0x4c6   : > { %v1903_v16 = vadd.f32 %v1902_v6, %v1901_v24 }
 0x4c8   : > { %v1904_v21 = vrot.slane %v1903_v16, 1 }
 0x4ca   : > { %v1905_v0 = vadd.f32 %v1904_v21, %v1903_v16  ;;  %1767 = vadd.xlane.f32.xlu1 %v1766_v40 }
 0x4cc   : > { %8013 = vmatmul.mubr.msk.f32.vlgmr.msra.gmra.mxu1 %vm1494_vm3, %v1905_v0  ;;  %v10709_v20 = vpop.eup %8726 }
 0x4cd   : > { %8037 = vmatpush3.xpose.msk.msra.mxu1 %vm1494_vm3, %v1891_v43  ;;  %8054 = vmatprep.mubr.msk.f32.mxu1 %vm9056_vm0, %v12506_v51  ;;  %v1793_v32 = vsel %vm1494_vm3, %v10709_v20, 0.0 }
 0x4ce   : > { %8038 = vmatprep.subr.mxu1 %v12506_v51 }
 0x4d1   : > { %8039 = vmatpush3.xpose.msk.msra.mxu1 %vm1494_vm3, %v1890_v50 }
 0x4d2   : > { %8040 = vmatprep.subr.mxu1 %v12506_v51 }
 0x4d5   : > { %8041 = vmatpush3.xpose.msk.msra.mxu1 %vm1494_vm3, %v1889_v30  ;;  %v12571_v30 = vld [vmem:[#allocation21_spill] sm:$0xff] }
 0x4d6   : > { %8042 = vmatprep.subr.mxu1 %v12506_v51 }
 0x4d9   : > { %v10703_v28 = vpop.f32.mrf.mxu1  ;;  %v1783_v19 = vpop.xlane.xlu1 %1782 }
 0x4da   : > { %12568 = vst [vmem:[#allocation36_spill] sm:$0xff] %v10703_v28 }
 0x4db   : > { %v7930_v55 = vpop.f32.mrf.mxu1 }
 0x4dd   : > { %v1780_v33 = vpop.xlane.xlu1 %1779 }
 0x4e1   : > { %v1804_v43 = vpop.xlane.xlu1 %1803 }
 0x4e4   : > { %1770 = vadd.xlane.f32.xlu0 %v1769_v57 }
 0x4e5   : > { %v1777_v13 = vpop.xlane.xlu1 %1776 }
 0x4e8   : > { %1794 = vadd.xlane.f32.xlu0 %v1793_v32 }
 0x4e9   : > { %v1774_v32 = vpop.xlane.xlu1 %1773 }
 0x4ef   : > { %v1786_v62 = vpop.xlane.xlu0 %1785 }
 0x4f3   : > { %v1810_v42 = vpop.xlane.xlu0 %1809 }
 0x4f4   : > { %8728 = vrcp.f32 %v1810_v42 }
 0x4f5   : > { %8730 = vrcp.f32 %v10608_v60 }
 0x4f6   : > { %8732 = vrcp.f32 %v10624_v53 }
 0x4f7   : > { %v10720_v61 = vpop.permute.xlu0 %614  ;;  %8734 = vrcp.f32 %v1786_v62 }
 0x4f8   : > { %v687_v46 = vadd.f32 %v10720_v61, %v537_v34  ;;  %8736 = vrcp.f32 %v1783_v19 }
 0x4f9   : > { %8738 = vrcp.f32 %v1780_v33 }
 0x4fa   : > { %8740 = vrcp.f32 %v1777_v13 }
 0x4fb   : > { %v10725_v24 = vpop.f32.mrf.mxu0  ;;  %v10727_v6 = vpop.permute.xlu0 %732  ;;  %8742 = vrcp.f32 %v1774_v32 }
 0x4fc   : > { %12569 = vst [vmem:[#allocation38_spill] sm:$0xff] %v10725_v24  ;;  %v765_v16 = vmul.f32 %v10727_v6, %v687_v46 }
 0x4fd   : > { %v7909_v21 = vpop.f32.mrf.mxu0 }
 0x4fe   : > { %v1892_v40 = vsel %vm1494_vm3, %v765_v16, 0.0  ;;  %590 = vbcast.lane.b32.xlu0 %v12460_v25, 272  ;;  %v468_v16 = vpop.permute.xlu1 %467 }
 0x4ff   : > { %v1893_v0 = vrot.slane %v1892_v40, 4 }
 0x501   : > { %v8729_v10 = vpop.eup %8728  ;;  %v1894_v4 = vadd.f32 %v1893_v0, %v1892_v40 }
 0x502   : > { %v1888_v60 = vmul.f32 %v8729_v10, %v10513_v12  ;;  %313 = vbcast.lane.b32.xlu0 %v12535_v7, 304  ;;  %v8731_v53 = vpop.eup %8730 }
 0x503   : > { %v1895_v58 = vrot.slane %v1894_v4, 2  ;;  %v1882_v48 = vmul.f32 %v8731_v53, %v12570_v3  ;;  %v8733_v12 = vpop.eup %8732 }
 0x504   : > { %8043 = vmatpush3.xpose.msk.msra.mxu1 %vm1494_vm3, %v1888_v60  ;;  %v1881_v55 = vmul.f32 %v8733_v12, %v12571_v30  ;;  %v8735_v57 = vpop.eup %8734 }
 0x505   : > { %v1896_v49 = vadd.f32 %v1895_v58, %v1894_v4  ;;  %8044 = vmatprep.subr.mxu1 %v12506_v51  ;;  %v1880_v1 = vmul.f32 %v8735_v57, %v10509_v44  ;;  %v8737_v62 = vpop.eup %8736 }
 0x506   : > { %483 = vbcast.lane.b32.xlu0 %v12502_v54, 304  ;;  %v1879_v42 = vmul.f32 %v8737_v62, %v10483_v18  ;;  %v8739_v15 = vpop.eup %8738 }
 0x507   : > { %v1897_v29 = vrot.slane %v1896_v49, 1  ;;  %v1878_v19 = vmul.f32 %v8739_v15, %v10489_v2  ;;  %v8741_v34 = vpop.eup %8740 }
 0x508   : > { %v1877_v44 = vmul.f32 %v8741_v34, %v10499_v22  ;;  %v8743_v46 = vpop.eup %8742  ;;  %v10769_v22 = vmul.f32 %v9162_v27, %v468_v16 }
 0x509   : > { %v1898_v50 = vadd.f32 %v1897_v29, %v1896_v49  ;;  %v1876_v18 = vmul.f32 %v8743_v46, %v10503_v52 }
 0x50a   : > { %262 = vbcast.lane.b32.xlu0 %v12539_v63, 304 }
 0x50b   : > { %7992 = vmatmul.mubr.msk.f32.vlgmr.msra.gmra.mxu0 %vm1494_vm3, %v1898_v50 }
 0x50c   : > { %8016 = vmatpush3.xpose.msk.msra.mxu0 %vm1494_vm3, %v1882_v48  ;;  %8033 = vmatprep.mubr.msk.f32.mxu0 %vm9056_vm0, %v12506_v51  ;;  %v12574_v48 = vld [vmem:[#allocation14_spill] sm:$0xff] }
 0x50d   : > { %8017 = vmatprep.subr.mxu0 %v12506_v51  ;;  %v399_v12 = vmul.f32 %v12574_v48, %v10657_v38 }
 0x50e   : > { %432 = vbcast.lane.b32.xlu0 %v12541_v45, 304 }
 0x50f   : > { %v573_v30 = vadd.f32 %v10660_v26, %v399_v12 }
 0x510   : > { %8018 = vmatpush3.xpose.msk.msra.mxu0 %vm1494_vm3, %v1881_v55  ;;  %v387_v55 = vmul.f32 %v12525_v14, %v10711_v9 }
 0x511   : > { %8019 = vmatprep.subr.mxu0 %v12506_v51 }
 0x512   : > { %657 = vbcast.lane.b32.xlu0 %v12526_v39, 304  ;;  %v561_v32 = vadd.f32 %v10716_v47, %v387_v55 }
 0x514   : > { %8020 = vmatpush3.xpose.msk.msra.mxu0 %vm1494_vm3, %v1880_v1  ;;  %v711_v1 = vadd.f32 %v10720_v61, %v561_v32 }
 0x515   : > { %8021 = vmatprep.subr.mxu0 %v12506_v51 }
 0x516   : > { %606 = vbcast.lane.b32.xlu0 %v12460_v25, 304 }
 0x518   : > { %8022 = vmatpush3.xpose.msk.msra.mxu0 %vm1494_vm3, %v1879_v42  ;;  %v773_v42 = vmul.f32 %v10727_v6, %v711_v1 }
 0x519   : > { %8023 = vmatprep.subr.mxu0 %v12506_v51 }
 0x51c   : > { %8024 = vmatpush3.xpose.msk.msra.mxu0 %vm1494_vm3, %v1878_v19  ;;  %v1906_v19 = vsel %vm1494_vm3, %v773_v42, 0.0 }
 0x51d   : > { %8025 = vmatprep.subr.mxu0 %v12506_v51 }
 0x51e   : > { %v1798_v21 = vpop.xlane.xlu1 %1797 }
 0x520   : > { %8026 = vmatpush3.xpose.msk.msra.mxu0 %vm1494_vm3, %v1877_v44  ;;  %v1907_v44 = vrot.slane %v1906_v19, 4 }
 0x521   : > { %8027 = vmatprep.subr.mxu0 %v12506_v51 }
 0x522   : > { %v10773_v52 = vpop.permute.xlu1 %641  ;;  %v1908_v46 = vadd.f32 %v1907_v44, %v1906_v19 }
 0x524   : > { %8028 = vmatpush3.xpose.msk.msra.mxu0 %vm1494_vm3, %v1876_v18 }
 0x525   : > { %8029 = vmatprep.subr.mxu0 %v12506_v51 }
 0x52c   : > { %v1807_v2 = vpop.xlane.xlu0 %1806 }
 0x52d   : > { %8744 = vrcp.f32 %v1807_v2 }
 0x52e   : > { %8746 = vrcp.f32 %v1804_v43 }
 0x530   : > { %v1801_v33 = vpop.xlane.xlu0 %1800 }
 0x531   : > { %8748 = vrcp.f32 %v1801_v33 }
 0x532   : > { %8750 = vrcp.f32 %v1798_v21 }
 0x534   : > { %v10766_v40 = vpop.permute.xlu0 %297 }
 0x535   : > { %v369_v0 = vmul.f32 %v12564_v17, %v10766_v40 }
 0x537   : > { %v543_v10 = vadd.f32 %v10769_v22, %v369_v0 }
 0x538   : > { %v247_v57 = vpop.permute.xlu0 %246 }
 0x539   : > { %v693_v4 = vadd.f32 %v10773_v52, %v543_v10  ;;  %v357_v61 = vmul.f32 %v12524_v8, %v247_v57  ;;  %v1909_v10 = vrot.slane %v1908_v46, 2 }
 0x53a   : > { %v8745_v60 = vpop.eup %8744 }
 0x53b   : > { %4025 = vxpose.xlu1.b32.start.end [1/1] (short) (narrow) %v693_v4, 72  ;;  %v1887_v43 = vmul.f32 %v8745_v60, %v10604_v11  ;;  %v8747_v58 = vpop.eup %8746 }
 0x53c   : > { %v1886_v49 = vmul.f32 %v8747_v58, %v10495_v23  ;;  %v417_v15 = vpop.permute.xlu0 %416  ;;  %v1910_v58 = vadd.f32 %v1909_v10, %v1908_v46 }
 0x53d   : > { %8045 = vmatpush3.xpose.msk.msra.mxu1 %vm1494_vm3, %v1887_v43 }
 0x53e   : > { %8046 = vmatprep.subr.mxu1 %v12506_v51  ;;  %v8749_v53 = vpop.eup %8748 }
 0x53f   : > { %v1885_v29 = vmul.f32 %v8749_v53, %v10616_v41  ;;  %v8751_v13 = vpop.eup %8750 }
 0x540   : > { %v1884_v11 = vmul.f32 %v8751_v13, %v10576_v59  ;;  %v723_v59 = vadd.f32 %v10652_v5, %v573_v30  ;;  %v507_v5 = vmul.f32 %v9162_v27, %v417_v15 }
 0x541   : > { %8047 = vmatpush3.xpose.msk.msra.mxu1 %vm1494_vm3, %v1886_v49 }
 0x542   : > { %8048 = vmatprep.subr.mxu1 %v12506_v51  ;;  %v777_v62 = vmul.f32 %v10671_v36, %v723_v59  ;;  %v381_v36 = vmul.f32 %v12525_v14, %v247_v57  ;;  %v531_v18 = vadd.f32 %v507_v5, %v357_v61 }
 0x544   : > { %v1913_v38 = vsel %vm1494_vm3, %v777_v62, 0.0  ;;  %v555_v16 = vadd.f32 %v507_v5, %v381_v36 }
 0x545   : > { %8049 = vmatpush3.xpose.msk.msra.mxu1 %vm1494_vm3, %v1885_v29  ;;  %v1914_v9 = vrot.slane %v1913_v38, 4 }
 0x546   : > { %8050 = vmatprep.subr.mxu1 %v12506_v51 }
 0x547   : > { %v1915_v6 = vadd.f32 %v1914_v9, %v1913_v38  ;;  %v393_v9 = vmul.f32 %v12574_v48, %v10766_v40 }
 0x549   : > { %8051 = vmatpush3.xpose.msk.msra.mxu1 %vm1494_vm3, %v1884_v11  ;;  %v1916_v0 = vrot.slane %v1915_v6, 2  ;;  %v567_v44 = vadd.f32 %v10769_v22, %v393_v9 }
 0x54a   : > { %8052 = vmatprep.subr.mxu1 %v12506_v51 }
 0x54b   : > { %v1917_v43 = vadd.f32 %v1916_v0, %v1915_v6  ;;  %v717_v5 = vadd.f32 %v10773_v52, %v567_v44 }
 0x54d   : > { %v1918_v11 = vrot.slane %v1917_v43, 1 }
 0x54f   : > { %v1919_v57 = vadd.f32 %v1918_v11, %v1917_v43 }
 0x553   : > { %v1768_v26 = vpop.xlane.xlu1 %1767 }
 0x556   : > { %v10789_v50 = vpop.f32.mrf.mxu1 }
 0x557   : > { %12572 = vst [vmem:[#allocation34_spill] sm:$0xff] %v10789_v50 }
 0x558   : > { %v7972_v23 = vpop.f32.mrf.mxu1 }
 0x559   : > { %v1911_v23 = vrot.slane %v1910_v58, 1 }
 0x55a   : > { %v10791_v3 = vpop.f32.mrf.mxu0 }
 0x55b   : > { %12573 = vst [vmem:[#allocation35_spill] sm:$0xff] %v10791_v3  ;;  %v1912_v59 = vadd.f32 %v1911_v23, %v1910_v58 }
 0x55c   : > { %v7951_v41 = vpop.f32.mrf.mxu0 }
 0x56d   : > { %v1771_v34 = vpop.xlane.xlu0 %1770 }
 0x56e   : > { %8752 = vrcp.f32 %v1771_v34 }
 0x56f   : > { %8754 = vrcp.f32 %v1768_v26 }
 0x571   : > { %v1795_v47 = vpop.xlane.xlu0 %1794 }
 0x572   : > { %8756 = vrcp.f32 %v1795_v47 }
 0x575   : > { %v591_v2 = vpop.permute.xlu0 %590 }
 0x576   : > { %v681_v33 = vadd.f32 %v591_v2, %v531_v18  ;;  %v705_v21 = vadd.f32 %v591_v2, %v555_v16 }
 0x578   : > { %4194 = vxpose.xlu1.b32.start.end [1/1] (short) (narrow) %v705_v21, 72  ;;  %3856 = vxpose.xlu0.b32.start.end [1/1] (short) (narrow) %v681_v33, 72 }
 0x579   : > { %v314_v4 = vpop.permute.xlu0 %313 }
 0x57a   : > { %v397_v47 = vmul.f32 %v12574_v48, %v314_v4 }
 0x57b   : > { %v8753_v60 = vpop.eup %8752 }
 0x57c   : > { %v1875_v49 = vmul.f32 %v8753_v60, %v10705_v56  ;;  %v8755_v53 = vpop.eup %8754  ;;  %v373_v56 = vmul.f32 %v12564_v17, %v314_v4 }
 0x57d   : > { %v484_v29 = vpop.permute.xlu0 %483  ;;  %v1874_v12 = vmul.f32 %v8755_v53, %v10683_v31 }
 0x57e   : > { %8030 = vmatpush3.xpose.msk.msra.mxu0 %vm1494_vm3, %v1875_v49  ;;  %v523_v55 = vmul.f32 %v9162_v27, %v484_v29 }
 0x57f   : > { %v8757_v13 = vpop.eup %8756  ;;  %8031 = vmatprep.subr.mxu0 %v12506_v51 }
 0x580   : > { %v1883_v41 = vmul.f32 %v8757_v13, %v10709_v20  ;;  %v547_v20 = vadd.f32 %v523_v55, %v373_v56  ;;  %v571_v61 = vadd.f32 %v523_v55, %v397_v47 }
 0x581   : > { %v10813_v30 = vpop.permute.xlu0 %262 }
 0x582   : > { %8032 = vmatpush3.xpose.msk.msra.mxu0 %vm1494_vm3, %v1874_v12  ;;  %8053 = vmatpush3.xpose.msk.msra.mxu1 %vm1494_vm3, %v1883_v41  ;;  %v361_v32 = vmul.f32 %v12524_v8, %v10813_v30  ;;  %v385_v10 = vmul.f32 %v12525_v14, %v10813_v30 }
 0x583   : > { %8086 = vmatprep.subr.mxu1 %v12506_v51  ;;  %8057 = vmatprep.subr.mxu0 %v12506_v51 }
 0x585   : > { %8034 = vmatmul.mubr.msk.f32.vlgmr.msra.gmra.mxu0 %vm1494_vm3, %v1912_v59  ;;  %8055 = vmatmul.mubr.msk.f32.vlgmr.msra.gmra.mxu1 %vm1494_vm3, %v1919_v57  ;;  %v433_v31 = vpop.permute.xlu0 %432 }
 0x586   : > { %v511_v1 = vmul.f32 %v9162_v27, %v433_v31  ;;  %8088 = vmatprep.mubr.msk.f32.mxu1 %vm9056_vm0, %v12506_v51  ;;  %8059 = vmatprep.mubr.msk.f32.mxu0 %vm9056_vm0, %v12506_v51 }
 0x588   : > { %v535_v42 = vadd.f32 %v511_v1, %v361_v32  ;;  %v559_v4 = vadd.f32 %v511_v1, %v385_v10 }
 0x589   : > { %v658_v62 = vpop.permute.xlu0 %657 }
 0x58a   : > { %v697_v15 = vadd.f32 %v658_v62, %v547_v20  ;;  %v721_v36 = vadd.f32 %v658_v62, %v571_v61 }
 0x58c   : > { %v10830_v38 = vpop.f32.mrf.mxu1  ;;  %8087 = vmatpush3.msra.mxu1 %v697_v15 }
 0x58d   : > { %12575 = vst [vmem:[#allocation57_spill] sm:$0xff] %v10830_v38  ;;  %8144 = vmatprep.subr.mxu1 %v12506_v51  ;;  %v607_v19 = vpop.permute.xlu0 %606 }
 0x58e   : > { %v8014_v26 = vpop.f32.mrf.mxu1  ;;  %v685_v34 = vadd.f32 %v607_v19, %v535_v42  ;;  %v709_v60 = vadd.f32 %v607_v19, %v559_v4 }
 0x590   : > { %8058 = vmatpush3.msra.mxu0 %v685_v34 }
 0x591   : > { %8115 = vmatprep.subr.mxu0 %v12506_v51 }
 0x599   : > { %4363 = vxpose.xlu0.b32.start.end [1/1] (short) (narrow) %v717_v5, 72 }
 0x5b7   : > { %v4041_v6 = vpop.trf.xlu1 }
 0x5b8   : > { %8089 = vmatmul.mubr.msk.f32.vlgmr.msra.gmra.mxu1 %vm813_vm2, %v4041_v6 }
 0x5b9   : > { %8091 = vmatprep.mubr.msk.f32.mxu1 %vm9056_vm0, %v12506_v51  ;;  %8145 = vmatpush3.msra.mxu1 %v721_v36 }
 0x5ba   : > { %8194 = vmatprep.subr.mxu1 %v12506_v51 }
 0x5bb   : > { %v4042_v40 = vpop.trf.xlu1 }
 0x5bc   : > { %8092 = vmatmul.mubr.msk.f32.gmra.mxu1 %vm813_vm2, %v4042_v40 }
 0x5bd   : > { %8094 = vmatprep.mubr.msk.f32.mxu1 %vm9056_vm0, %v12506_v51 }
 0x5bf   : > { %v4043_v22 = vpop.trf.xlu1 }
 0x5c0   : > { %8095 = vmatmul.mubr.msk.f32.gmra.mxu1 %vm813_vm2, %v4043_v22 }
 0x5c1   : > { %8097 = vmatprep.mubr.msk.f32.mxu1 %vm9056_vm0, %v12506_v51 }
 0x5c3   : > { %v4044_v52 = vpop.trf.xlu1 }
 0x5c4   : > { %8098 = vmatmul.mubr.msk.f32.gmra.mxu1 %vm813_vm2, %v4044_v52 }
 0x5c5   : > { %8100 = vmatprep.mubr.msk.f32.mxu1 %vm9056_vm0, %v12506_v51 }
 0x5c7   : > { %v4045_v46 = vpop.trf.xlu1 }
 0x5c8   : > { %8101 = vmatmul.mubr.msk.f32.gmra.mxu1 %vm813_vm2, %v4045_v46 }
 0x5c9   : > { %8103 = vmatprep.mubr.msk.f32.mxu1 %vm9056_vm0, %v12506_v51 }
 0x5cb   : > { %v10855_v18 = vpop.f32.mrf.mxu0  ;;  %v4046_v16 = vpop.trf.xlu1 }
 0x5cc   : > { %12576 = vst [vmem:[#allocation26_spill] sm:$0xff] %v10855_v18  ;;  %8104 = vmatmul.mubr.msk.f32.gmra.mxu1 %vm813_vm2, %v4046_v16 }
 0x5cd   : > { %v7993_v2 = vpop.f32.mrf.mxu0  ;;  %8106 = vmatprep.mubr.msk.f32.mxu1 %vm9056_vm0, %v12506_v51 }
 0x5cf   : > { %v4047_v33 = vpop.trf.xlu1 }
 0x5d0   : > { %8107 = vmatmul.mubr.msk.f32.gmra.mxu1 %vm813_vm2, %v4047_v33 }
 0x5d1   : > { %8109 = vmatprep.mubr.msk.f32.mxu1 %vm9056_vm0, %v12506_v51 }
 0x5d3   : > { %v4048_v21 = vpop.trf.xlu1 }
 0x5d4   : > { %8110 = vmatmul.mubr.msk.f32.gmra.mxu1 %vm813_vm2, %v4048_v21 }
 0x5d5   : > { %8112 = vmatprep.mubr.msk.f32.mxu1 %vm9056_vm0, %v12506_v51 }
 0x5d7   : > { %v4049_v0 = vpop.trf.xlu1 }
 0x5d8   : > { %8113 = vmatmul.mubr.msk.f32.gmra.mxu1 %vm813_vm2, %v4049_v0 }
 0x5d9   : > { %8146 = vmatprep.mubr.msk.f32.mxu1 %vm9056_vm0, %v12506_v51 }
 0x5f4   : > { %v3872_v43 = vpop.trf.xlu0  ;;  %v4210_v13 = vpop.trf.xlu1 }
 0x5f5   : > { %8060 = vmatmul.mubr.msk.f32.vlgmr.msra.gmra.mxu0 %vm813_vm2, %v3872_v43 }
 0x5f6   : > { %8116 = vmatpush3.msra.mxu0 %v709_v60  ;;  %8062 = vmatprep.mubr.msk.f32.mxu0 %vm9056_vm0, %v12506_v51 }
 0x5f7   : > { %8173 = vmatprep.subr.mxu0 %v12506_v51 }
 0x5f8   : > { %v3873_v58 = vpop.trf.xlu0  ;;  %v4211_v12 = vpop.trf.xlu1 }
 0x5f9   : > { %8063 = vmatmul.mubr.msk.f32.gmra.mxu0 %vm813_vm2, %v3873_v58 }
 0x5fa   : > { %8065 = vmatprep.mubr.msk.f32.mxu0 %vm9056_vm0, %v12506_v51 }
 0x5fc   : > { %v3874_v49 = vpop.trf.xlu0  ;;  %v4212_v30 = vpop.trf.xlu1 }
 0x5fd   : > { %8066 = vmatmul.mubr.msk.f32.gmra.mxu0 %vm813_vm2, %v3874_v49 }
 0x5fe   : > { %8068 = vmatprep.mubr.msk.f32.mxu0 %vm9056_vm0, %v12506_v51 }
 0x600   : > { %v3875_v53 = vpop.trf.xlu0  ;;  %v4213_v57 = vpop.trf.xlu1 }
 0x601   : > { %8069 = vmatmul.mubr.msk.f32.gmra.mxu0 %vm813_vm2, %v3875_v53 }
 0x602   : > { %8071 = vmatprep.mubr.msk.f32.mxu0 %vm9056_vm0, %v12506_v51 }
 0x604   : > { %v3876_v29 = vpop.trf.xlu0  ;;  %v4214_v31 = vpop.trf.xlu1 }
 0x605   : > { %8072 = vmatmul.mubr.msk.f32.gmra.mxu0 %vm813_vm2, %v3876_v29 }
 0x606   : > { %8074 = vmatprep.mubr.msk.f32.mxu0 %vm9056_vm0, %v12506_v51 }
 0x608   : > { %v3877_v11 = vpop.trf.xlu0  ;;  %v4215_v1 = vpop.trf.xlu1 }
 0x609   : > { %8075 = vmatmul.mubr.msk.f32.gmra.mxu0 %vm813_vm2, %v3877_v11 }
 0x60a   : > { %8077 = vmatprep.mubr.msk.f32.mxu0 %vm9056_vm0, %v12506_v51 }
 0x60c   : > { %v3878_v23 = vpop.trf.xlu0  ;;  %v4216_v42 = vpop.trf.xlu1 }
 0x60d   : > { %8078 = vmatmul.mubr.msk.f32.gmra.mxu0 %vm813_vm2, %v3878_v23 }
 0x60e   : > { %8080 = vmatprep.mubr.msk.f32.mxu0 %vm9056_vm0, %v12506_v51 }
 0x610   : > { %v3879_v41 = vpop.trf.xlu0  ;;  %v4217_v26 = vpop.trf.xlu1 }
 0x611   : > { %8081 = vmatmul.mubr.msk.f32.gmra.mxu0 %vm813_vm2, %v3879_v41 }
 0x612   : > { %8083 = vmatprep.mubr.msk.f32.mxu0 %vm9056_vm0, %v12506_v51 }
 0x614   : > { %v3880_v56 = vpop.trf.xlu0  ;;  %v4218_v9 = vpop.trf.xlu1 }
 0x615   : > { %8084 = vmatmul.mubr.msk.f32.gmra.mxu0 %vm813_vm2, %v3880_v56 }
 0x616   : > { %8117 = vmatprep.mubr.msk.f32.mxu0 %vm9056_vm0, %v12506_v51 }
 0x618   : > { %v4379_v55 = vpop.trf.xlu0 }
 0x619   : > { %8118 = vmatmul.mubr.msk.f32.vlgmr.msra.gmra.mxu0 %vm813_vm2, %v4210_v13  ;;  %8147 = vmatmul.mubr.msk.f32.vlgmr.msra.gmra.mxu1 %vm813_vm2, %v4379_v55 }
 0x61a   : > { %8120 = vmatprep.mubr.msk.f32.mxu0 %vm9056_vm0, %v12506_v51  ;;  %8149 = vmatprep.mubr.msk.f32.mxu1 %vm9056_vm0, %v12506_v51 }
 0x61c   : > { %v4380_v59 = vpop.trf.xlu0 }
 0x61d   : > { %8121 = vmatmul.mubr.msk.f32.gmra.mxu0 %vm813_vm2, %v4211_v12  ;;  %8150 = vmatmul.mubr.msk.f32.gmra.mxu1 %vm813_vm2, %v4380_v59 }
 0x61e   : > { %8123 = vmatprep.mubr.msk.f32.mxu0 %vm9056_vm0, %v12506_v51  ;;  %8152 = vmatprep.mubr.msk.f32.mxu1 %vm9056_vm0, %v12506_v51 }
 0x620   : > { %v4381_v20 = vpop.trf.xlu0 }
 0x621   : > { %8124 = vmatmul.mubr.msk.f32.gmra.mxu0 %vm813_vm2, %v4212_v30  ;;  %8153 = vmatmul.mubr.msk.f32.gmra.mxu1 %vm813_vm2, %v4381_v20 }
 0x622   : > { %8126 = vmatprep.mubr.msk.f32.mxu0 %vm9056_vm0, %v12506_v51  ;;  %8155 = vmatprep.mubr.msk.f32.mxu1 %vm9056_vm0, %v12506_v51 }
 0x624   : > { %v4382_v32 = vpop.trf.xlu0 }
 0x625   : > { %8127 = vmatmul.mubr.msk.f32.gmra.mxu0 %vm813_vm2, %v4213_v57  ;;  %8156 = vmatmul.mubr.msk.f32.gmra.mxu1 %vm813_vm2, %v4382_v32 }
 0x626   : > { %8129 = vmatprep.mubr.msk.f32.mxu0 %vm9056_vm0, %v12506_v51  ;;  %8158 = vmatprep.mubr.msk.f32.mxu1 %vm9056_vm0, %v12506_v51 }
 0x628   : > { %v4383_v62 = vpop.trf.xlu0 }
 0x629   : > { %8130 = vmatmul.mubr.msk.f32.gmra.mxu0 %vm813_vm2, %v4214_v31  ;;  %8159 = vmatmul.mubr.msk.f32.gmra.mxu1 %vm813_vm2, %v4383_v62 }
 0x62a   : > { %8132 = vmatprep.mubr.msk.f32.mxu0 %vm9056_vm0, %v12506_v51  ;;  %8161 = vmatprep.mubr.msk.f32.mxu1 %vm9056_vm0, %v12506_v51 }
 0x62c   : > { %v4384_v15 = vpop.trf.xlu0 }
 0x62d   : > { %8133 = vmatmul.mubr.msk.f32.gmra.mxu0 %vm813_vm2, %v4215_v1  ;;  %8162 = vmatmul.mubr.msk.f32.gmra.mxu1 %vm813_vm2, %v4384_v15 }
 0x62e   : > { %8135 = vmatprep.mubr.msk.f32.mxu0 %vm9056_vm0, %v12506_v51  ;;  %8164 = vmatprep.mubr.msk.f32.mxu1 %vm9056_vm0, %v12506_v51 }
 0x630   : > { %v4385_v19 = vpop.trf.xlu0 }
 0x631   : > { %8136 = vmatmul.mubr.msk.f32.gmra.mxu0 %vm813_vm2, %v4216_v42  ;;  %8165 = vmatmul.mubr.msk.f32.gmra.mxu1 %vm813_vm2, %v4385_v19 }
 0x632   : > { %8138 = vmatprep.mubr.msk.f32.mxu0 %vm9056_vm0, %v12506_v51  ;;  %8167 = vmatprep.mubr.msk.f32.mxu1 %vm9056_vm0, %v12506_v51 }
 0x634   : > { %v4386_v34 = vpop.trf.xlu0 }
 0x635   : > { %8139 = vmatmul.mubr.msk.f32.gmra.mxu0 %vm813_vm2, %v4217_v26  ;;  %8168 = vmatmul.mubr.msk.f32.gmra.mxu1 %vm813_vm2, %v4386_v34 }
 0x636   : > { %8141 = vmatprep.mubr.msk.f32.mxu0 %vm9056_vm0, %v12506_v51  ;;  %8170 = vmatprep.mubr.msk.f32.mxu1 %vm9056_vm0, %v12506_v51 }
 0x638   : > { %v4387_v44 = vpop.trf.xlu0 }
 0x639   : > { %8142 = vmatmul.mubr.msk.f32.gmra.mxu0 %vm813_vm2, %v4218_v9  ;;  %8171 = vmatmul.mubr.msk.f32.gmra.mxu1 %vm813_vm2, %v4387_v44 }
 0x63a   : > { %8212 = vmatprep.mubr.msk.f32.mxu1 %vm9056_vm0, %v12506_v51  ;;  %8191 = vmatprep.mubr.msk.f32.mxu0 %vm9056_vm0, %v12506_v51 }
 0x645   : > { %v10953_v5 = vpop.f32.mrf.mxu0  ;;  %v10955_v47 = vpop.f32.mrf.mxu1 }
 0x646   : > { %12577 = vst [vmem:[#allocation56_spill] sm:$0xff] %v10953_v5  ;;  %12578 = vst [vmem:[#allocation25_spill] sm:$0xff] %v10955_v47 }
 0x647   : > { %v8035_v61 = vpop.f32.mrf.mxu0  ;;  %v8056_v36 = vpop.f32.mrf.mxu1 }
 0x678   : > { %v10957_v6 = vpop.f32.mrf.mxu1 }
 0x67a   : > { %v8090_v40 = vpop.f32.mrf.mxu1 }
 0x67c   : > { %v10959_v22 = vpop.f32.mrf.mxu1 }
 0x67e   : > { %v8093_v52 = vpop.f32.mrf.mxu1 }
 0x680   : > { %v10961_v46 = vpop.f32.mrf.mxu1 }
 0x682   : > { %v8096_v16 = vpop.f32.mrf.mxu1 }
 0x684   : > { %v4165_v2 = vpop.f32.mrf.mxu1 }
 0x686   : > { %v8099_v33 = vpop.f32.mrf.mxu1 }
 0x688   : > { %v4170_v21 = vpop.f32.mrf.mxu1 }
 0x68a   : > { %v8102_v0 = vpop.f32.mrf.mxu1 }
 0x68c   : > { %v4175_v10 = vpop.f32.mrf.mxu1 }
 0x68d   : > { %v10983_v16 = vmul.f32 0.35355338, %v4175_v10 }
 0x68e   : > { %v8105_v4 = vpop.f32.mrf.mxu1 }
 0x690   : > { %v4180_v60 = vpop.f32.mrf.mxu1 }
 0x691   : > { %v10977_v44 = vmul.f32 0.35355338, %v4180_v60 }
 0x692   : > { %v8108_v43 = vpop.f32.mrf.mxu1 }
 0x693   : > { %v4613_v0 = vsel %vm1494_vm3, %v10977_v44, -inf }
 0x694   : > { %v4185_v58 = vpop.f32.mrf.mxu1 }
 0x695   : > { %v10963_v29 = vmul.f32 0.35355338, %v4185_v58 }
 0x696   : > { %v8111_v49 = vpop.f32.mrf.mxu1 }
 0x697   : > { %v4616_v12 = vsel %vm1494_vm3, %v10963_v29, -inf }
 0x698   : > { %v4190_v53 = vpop.f32.mrf.mxu1 }
 0x699   : > { %v10965_v13 = vmul.f32 0.35355338, %v4190_v53  ;;  %v10995_v53 = vmul.f32 0.35355338, %v4170_v21 }
 0x69a   : > { %v8114_v11 = vpop.f32.mrf.mxu1 }
 0x69b   : > { %v4619_v23 = vsel %vm1519_vm4, %v10965_v13, -inf }
 0x69c   : > { %4620 = vmax.xlane.f32.xlu0 %v4619_v23  ;;  %v4610_v23 = vsel %vm1494_vm3, %v10983_v16, -inf }
 0x6a0   : > { %4617 = vmax.xlane.f32.xlu0 %v4616_v12 }
 0x6b5   : > { %v10971_v41 = vpop.f32.mrf.mxu0 }
 0x6b7   : > { %v8061_v30 = vpop.f32.mrf.mxu0 }
 0x6b9   : > { %v10973_v56 = vpop.f32.mrf.mxu0 }
 0x6bb   : > { %v8064_v55 = vpop.f32.mrf.mxu0 }
 0x6bd   : > { %v3991_v57 = vpop.f32.mrf.mxu0 }
 0x6bf   : > { %v8067_v59 = vpop.f32.mrf.mxu0 }
 0x6c1   : > { %v3996_v31 = vpop.f32.mrf.mxu0 }
 0x6c3   : > { %v8070_v20 = vpop.f32.mrf.mxu0 }
 0x6c4   : > { %v11007_v20 = vmul.f32 0.35355338, %v4165_v2  ;;  %v11022_v2 = vmul.f32 0.35355338, %v3996_v31 }
 0x6c5   : > { %v4001_v32 = vpop.f32.mrf.mxu0 }
 0x6c6   : > { %v11009_v21 = vmul.f32 0.35355338, %v4001_v32  ;;  %v4577_v31 = vsel %vm1494_vm3, %v11022_v2, -inf }
 0x6c7   : > { %v8073_v1 = vpop.f32.mrf.mxu0 }
 0x6c8   : > { %v4580_v32 = vsel %vm1494_vm3, %v11009_v21, -inf }
 0x6c9   : > { %v4006_v62 = vpop.f32.mrf.mxu0 }
 0x6ca   : > { %v10997_v10 = vmul.f32 0.35355338, %v4006_v62  ;;  %v4607_v62 = vsel %vm1494_vm3, %v10995_v53, -inf }
 0x6cb   : > { %v8076_v42 = vpop.f32.mrf.mxu0 }
 0x6cc   : > { %v4583_v1 = vsel %vm1494_vm3, %v10997_v10, -inf }
 0x6cd   : > { %v4011_v15 = vpop.f32.mrf.mxu0 }
 0x6ce   : > { %v10985_v33 = vmul.f32 0.35355338, %v4011_v15 }
 0x6cf   : > { %v8079_v19 = vpop.f32.mrf.mxu0 }
 0x6d0   : > { %v4586_v11 = vsel %vm1494_vm3, %v10985_v33, -inf }
 0x6d1   : > { %v4016_v26 = vpop.f32.mrf.mxu0 }
 0x6d2   : > { %v10975_v34 = vmul.f32 0.35355338, %v4016_v26 }
 0x6d3   : > { %v8082_v9 = vpop.f32.mrf.mxu0 }
 0x6d4   : > { %v4589_v61 = vsel %vm1494_vm3, %v10975_v34, -inf  ;;  %v11020_v9 = vmul.f32 0.35355338, %v10961_v46  ;;  %v11035_v46 = vmul.f32 0.35355338, %v3991_v57 }
 0x6d5   : > { %4590 = vmax.xlane.f32.xlu0 %v4589_v61  ;;  %v4021_v36 = vpop.f32.mrf.mxu0  ;;  %v4604_v61 = vsel %vm1494_vm3, %v11007_v20, -inf }
 0x6d6   : > { %v10981_v40 = vmul.f32 0.35355338, %v4021_v36  ;;  %v4574_v57 = vsel %vm1494_vm3, %v11035_v46, -inf }
 0x6d7   : > { %v8085_v52 = vpop.f32.mrf.mxu0 }
 0x6d8   : > { %v4592_v4 = vsel %vm1519_vm4, %v10981_v40, -inf }
 0x6d9   : > { %4614 = vmax.xlane.f32.xlu0 %v4613_v0  ;;  %4593 = vmax.xlane.f32.xlu1 %v4592_v4  ;;  %v10991_v60 = vpop.f32.mrf.mxu0  ;;  %v10993_v43 = vpop.f32.mrf.mxu1 }
 0x6db   : > { %v8119_v58 = vpop.f32.mrf.mxu0  ;;  %v8148_v49 = vpop.f32.mrf.mxu1 }
 0x6dc   : > { %v11033_v58 = vmul.f32 0.35355338, %v10959_v22  ;;  %v4601_v49 = vsel %vm1494_vm3, %v11020_v9, -inf  ;;  %v11045_v22 = vmul.f32 0.35355338, %v10973_v56 }
 0x6dd   : > { %4587 = vmax.xlane.f32.xlu0 %v4586_v11  ;;  %4611 = vmax.xlane.f32.xlu1 %v4610_v23  ;;  %v11003_v12 = vpop.f32.mrf.mxu0  ;;  %v11005_v30 = vpop.f32.mrf.mxu1 }
 0x6df   : > { %v8122_v55 = vpop.f32.mrf.mxu0  ;;  %v8151_v59 = vpop.f32.mrf.mxu1 }
 0x6e1   : > { %4584 = vmax.xlane.f32.xlu0 %v4583_v1  ;;  %4608 = vmax.xlane.f32.xlu1 %v4607_v62  ;;  %v11015_v42 = vpop.f32.mrf.mxu0  ;;  %v11017_v15 = vpop.f32.mrf.mxu1  ;;  %v11042_v1 = vmul.f32 0.35355338, %v10957_v6  ;;  %v4598_v62 = vsel %vm1494_vm3, %v11033_v58, -inf  ;;  %v4571_v6 = vsel %vm1494_vm3, %v11045_v22, -inf }
 0x6e3   : > { %v8125_v19 = vpop.f32.mrf.mxu0  ;;  %v8154_v26 = vpop.f32.mrf.mxu1  ;;  %v4595_v56 = vsel %vm1494_vm3, %v11042_v1, -inf }
 0x6e5   : > { %4581 = vmax.xlane.f32.xlu0 %v4580_v32  ;;  %4605 = vmax.xlane.f32.xlu1 %v4604_v61  ;;  %v11028_v36 = vpop.f32.mrf.mxu0  ;;  %v11030_v52 = vpop.f32.mrf.mxu1 }
 0x6e7   : > { %v8128_v0 = vpop.f32.mrf.mxu0  ;;  %v8157_v4 = vpop.f32.mrf.mxu1 }
 0x6e8   : > { %v11052_v0 = vmul.f32 0.35355338, %v10971_v41 }
 0x6e9   : > { %4578 = vmax.xlane.f32.xlu0 %v4577_v31  ;;  %4602 = vmax.xlane.f32.xlu1 %v4601_v49  ;;  %v4339_v11 = vpop.f32.mrf.mxu0  ;;  %v4508_v23 = vpop.f32.mrf.mxu1 }
 0x6eb   : > { %v8131_v55 = vpop.f32.mrf.mxu0  ;;  %v8160_v59 = vpop.f32.mrf.mxu1 }
 0x6ec   : > { %v4568_v59 = vsel %vm1494_vm3, %v11052_v0, -inf }
 0x6ed   : > { %4575 = vmax.xlane.f32.xlu0 %v4574_v57  ;;  %4599 = vmax.xlane.f32.xlu1 %v4598_v62  ;;  %v4344_v19 = vpop.f32.mrf.mxu0  ;;  %v4513_v26 = vpop.f32.mrf.mxu1 }
 0x6ef   : > { %v8134_v32 = vpop.f32.mrf.mxu0  ;;  %v8163_v61 = vpop.f32.mrf.mxu1 }
 0x6f1   : > { %4572 = vmax.xlane.f32.xlu0 %v4571_v6  ;;  %4596 = vmax.xlane.f32.xlu1 %v4595_v56  ;;  %v4349_v4 = vpop.f32.mrf.mxu0  ;;  %v4518_v31 = vpop.f32.mrf.mxu1 }
 0x6f3   : > { %v8137_v49 = vpop.f32.mrf.mxu0  ;;  %v8166_v55 = vpop.f32.mrf.mxu1 }
 0x6f5   : > { %4569 = vmax.xlane.f32.xlu0 %v4568_v59  ;;  %v4354_v57 = vpop.f32.mrf.mxu0  ;;  %v4523_v62 = vpop.f32.mrf.mxu1 }
 0x6f6   : > { %v11060_v61 = vmul.f32 0.35355338, %v4354_v57  ;;  %v11062_v47 = vmul.f32 0.35355338, %v4523_v62  ;;  %v11072_v57 = vmul.f32 0.35355338, %v4349_v4 }
 0x6f7   : > { %v8140_v41 = vpop.f32.mrf.mxu0  ;;  %v8169_v32 = vpop.f32.mrf.mxu1  ;;  %v11086_v4 = vmul.f32 0.35355338, %v4513_v26  ;;  %v11107_v26 = vmul.f32 0.35355338, %v11015_v42 }
 0x6f8   : > { %v11074_v41 = vmul.f32 0.35355338, %v4518_v31  ;;  %v4640_v62 = vsel %vm1494_vm3, %v11072_v57, -inf  ;;  %v11088_v31 = vmul.f32 0.35355338, %v4339_v11 }
 0x6f9   : > { %v4359_v5 = vpop.f32.mrf.mxu0  ;;  %v4528_v3 = vpop.f32.mrf.mxu1  ;;  %v4628_v42 = vsel %vm1494_vm3, %v11107_v26, -inf }
 0x6fa   : > { %v11064_v6 = vmul.f32 0.35355338, %v4359_v5  ;;  %v11066_v56 = vmul.f32 0.35355338, %v4528_v3  ;;  %v4643_v5 = vsel %vm1494_vm3, %v11060_v61, -inf  ;;  %v4670_v3 = vsel %vm1494_vm3, %v11062_v47, -inf }
 0x6fb   : > { %v8143_v49 = vpop.f32.mrf.mxu0  ;;  %v8172_v55 = vpop.f32.mrf.mxu1  ;;  %v4667_v32 = vsel %vm1494_vm3, %v11074_v41, -inf  ;;  %v4634_v11 = vsel %vm1494_vm3, %v11088_v31, -inf }
 0x6fc   : > { %v4646_v50 = vsel %vm1519_vm4, %v11064_v6, -inf  ;;  %v4673_v59 = vsel %vm1519_vm4, %v11066_v56, -inf  ;;  %v11090_v49 = vmul.f32 0.35355338, %v4508_v23 }
 0x6fd   : > { %4647 = vmax.xlane.f32.xlu0 %v4646_v50  ;;  %4674 = vmax.xlane.f32.xlu1 %v4673_v59  ;;  %v11084_v50 = vmul.f32 0.35355338, %v4344_v19  ;;  %v4664_v59 = vsel %vm1494_vm3, %v11086_v4, -inf  ;;  %v11100_v19 = vmul.f32 0.35355338, %v11030_v52 }
 0x6fe   : > { %v4661_v23 = vsel %vm1494_vm3, %v11090_v49, -inf }
 0x6ff   : > { %v4637_v55 = vsel %vm1494_vm3, %v11084_v50, -inf  ;;  %v4658_v52 = vsel %vm1494_vm3, %v11100_v19, -inf }
 0x701   : > { %4644 = vmax.xlane.f32.xlu0 %v4643_v5  ;;  %4671 = vmax.xlane.f32.xlu1 %v4670_v3  ;;  %v11097_v5 = vmul.f32 0.35355338, %v11028_v36  ;;  %v11110_v3 = vmul.f32 0.35355338, %v11017_v15 }
 0x703   : > { %v4631_v36 = vsel %vm1494_vm3, %v11097_v5, -inf  ;;  %v4655_v15 = vsel %vm1494_vm3, %v11110_v3, -inf }
 0x705   : > { %4641 = vmax.xlane.f32.xlu0 %v4640_v62  ;;  %4668 = vmax.xlane.f32.xlu1 %v4667_v32  ;;  %v11117_v62 = vmul.f32 0.35355338, %v11003_v12  ;;  %v11120_v32 = vmul.f32 0.35355338, %v11005_v30 }
 0x707   : > { %12579 = vst [vmem:[#allocation55_spill] sm:$0xff] %v11117_v62  ;;  %12580 = vst [vmem:[#allocation24_spill] sm:$0xff] %v11120_v32  ;;  %v4625_v12 = vsel %vm1494_vm3, %v11117_v62, -inf  ;;  %v4652_v30 = vsel %vm1494_vm3, %v11120_v32, -inf }
 0x709   : > { %4638 = vmax.xlane.f32.xlu0 %v4637_v55  ;;  %4665 = vmax.xlane.f32.xlu1 %v4664_v59  ;;  %v11127_v55 = vmul.f32 0.35355338, %v10991_v60  ;;  %v11130_v59 = vmul.f32 0.35355338, %v10993_v43 }
 0x70b   : > { %12581 = vst [vmem:[#allocation53_spill] sm:$0xff] %v11127_v55  ;;  %12582 = vst [vmem:[#allocation23_spill] sm:$0xff] %v11130_v59 }
 0x70d   : > { %4635 = vmax.xlane.f32.xlu0 %v4634_v11  ;;  %4662 = vmax.xlane.f32.xlu1 %v4661_v23  ;;  %v4622_v11 = vsel %vm1494_vm3, %v11127_v55, -inf  ;;  %v4649_v23 = vsel %vm1494_vm3, %v11130_v59, -inf }
 0x711   : > { %4632 = vmax.xlane.f32.xlu0 %v4631_v36  ;;  %4659 = vmax.xlane.f32.xlu1 %v4658_v52 }
 0x715   : > { %4629 = vmax.xlane.f32.xlu0 %v4628_v42  ;;  %4656 = vmax.xlane.f32.xlu1 %v4655_v15 }
 0x719   : > { %4626 = vmax.xlane.f32.xlu0 %v4625_v12  ;;  %4653 = vmax.xlane.f32.xlu1 %v4652_v30 }
 0x71d   : > { %4623 = vmax.xlane.f32.xlu0 %v4622_v11  ;;  %4650 = vmax.xlane.f32.xlu1 %v4649_v23 }
 0x725   : > { %v11144_v60 = vpop.xlane.xlu0 %4620 }
 0x729   : > { %v11146_v43 = vpop.xlane.xlu0 %4617 }
 0x72e   : > { %329 = vbcast.lane.b32.xlu1 %v12535_v7, 336 }
 0x733   : > { %499 = vbcast.lane.b32.xlu0 %v12502_v54, 336 }
 0x737   : > { %278 = vbcast.lane.b32.xlu0 %v12539_v63, 336 }
 0x73b   : > { %448 = vbcast.lane.b32.xlu0 %v12541_v45, 336 }
 0x75e   : > { %v11148_v36 = vpop.xlane.xlu0 %4590 }
 0x762   : > { %v11150_v52 = vpop.xlane.xlu1 %4593  ;;  %v4615_v42 = vpop.xlane.xlu0 %4614 }
 0x766   : > { %v4612_v15 = vpop.xlane.xlu1 %4611  ;;  %v11152_v12 = vpop.xlane.xlu0 %4587 }
 0x76a   : > { %v4609_v30 = vpop.xlane.xlu1 %4608  ;;  %v4585_v11 = vpop.xlane.xlu0 %4584 }
 0x76e   : > { %v4606_v23 = vpop.xlane.xlu1 %4605  ;;  %v4582_v18 = vpop.xlane.xlu0 %4581 }
 0x76f   : > { %v4688_v63 = vsub.f32 %v11007_v20, %v4606_v23 }
 0x772   : > { %v4603_v24 = vpop.xlane.xlu1 %4602  ;;  %v4579_v38 = vpop.xlane.xlu0 %4578 }
 0x773   : > { %v4687_v17 = vsub.f32 %v11020_v9, %v4603_v24  ;;  %v4736_v24 = vmul.f32 1.442695, %v4688_v63 }
 0x775   : > { %v4734_v54 = vmul.f32 1.442695, %v4687_v17  ;;  %v4680_v17 = vsub.f32 %v11009_v21, %v4582_v18  ;;  %v4692_v21 = vsub.f32 %v10963_v29, %v11146_v43  ;;  %v4693_v29 = vsub.f32 %v10965_v13, %v11144_v60 }
 0x776   : > { %v4600_v28 = vpop.xlane.xlu1 %4599  ;;  %v4576_v14 = vpop.xlane.xlu0 %4575  ;;  %v4684_v60 = vsub.f32 %v10981_v40, %v11150_v52 }
 0x777   : > { %v4686_v48 = vsub.f32 %v11033_v58, %v4600_v28  ;;  %v4678_v28 = vsub.f32 %v11035_v46, %v4576_v14  ;;  %v4746_v13 = vmul.f32 1.442695, %v4693_v29 }
 0x779   : > { %v4732_v27 = vmul.f32 1.442695, %v4686_v48  ;;  %v4690_v48 = vsub.f32 %v10983_v16, %v4612_v15 }
 0x77a   : > { %v4597_v55 = vpop.xlane.xlu1 %4596  ;;  %v4573_v8 = vpop.xlane.xlu0 %4572 }
 0x77b   : > { %v4685_v51 = vsub.f32 %v11042_v1, %v4597_v55  ;;  %v4677_v62 = vsub.f32 %v11045_v22, %v4573_v8  ;;  %v4689_v1 = vsub.f32 %v10995_v53, %v4609_v30  ;;  %v4716_v8 = vmul.f32 1.442695, %v4678_v28 }
 0x77c   : > { %v4740_v63 = vmul.f32 1.442695, %v4690_v48  ;;  %v4744_v55 = vmul.f32 1.442695, %v4692_v21 }
 0x77d   : > { %v4730_v59 = vmul.f32 1.442695, %v4685_v51  ;;  %v4714_v58 = vmul.f32 1.442695, %v4677_v62  ;;  %v4679_v51 = vsub.f32 %v11022_v2, %v4579_v38  ;;  %v4738_v9 = vmul.f32 1.442695, %v4689_v1 }
 0x77e   : > { %v4570_v32 = vpop.xlane.xlu0 %4569  ;;  %v4720_v38 = vmul.f32 1.442695, %v4680_v17 }
 0x77f   : > { %8758 = vpow2.f32 %v4730_v59  ;;  %v4676_v45 = vsub.f32 %v11052_v0, %v4570_v32 }
 0x780   : > { %8760 = vpow2.f32 %v4732_v27  ;;  %v4718_v27 = vmul.f32 1.442695, %v4679_v51  ;;  %v4728_v51 = vmul.f32 1.442695, %v4684_v60 }
 0x781   : > { %v4712_v7 = vmul.f32 1.442695, %v4676_v45 }
 0x783   : > { %8762 = vpow2.f32 %v4712_v7  ;;  %v4691_v7 = vsub.f32 %v10977_v44, %v4615_v42 }
 0x784   : > { %8764 = vpow2.f32 %v4734_v54  ;;  %v4681_v54 = vsub.f32 %v10997_v10, %v4585_v11  ;;  %v4682_v10 = vsub.f32 %v10985_v33, %v11152_v12  ;;  %v4683_v33 = vsub.f32 %v10975_v34, %v11148_v36 }
 0x785   : > { %8766 = vpow2.f32 %v4714_v58  ;;  %v4742_v44 = vmul.f32 1.442695, %v4691_v7 }
 0x786   : > { %8768 = vpow2.f32 %v4736_v24  ;;  %v11165_v14 = vpop.xlane.xlu1 %4674  ;;  %v11175_v18 = vpop.xlane.xlu0 %4647  ;;  %v4722_v22 = vmul.f32 1.442695, %v4681_v54  ;;  %v4724_v42 = vmul.f32 1.442695, %v4682_v10  ;;  %v4726_v34 = vmul.f32 1.442695, %v4683_v33 }
 0x787   : > { %8770 = vpow2.f32 %v4716_v8 }
 0x788   : > { %8772 = vpow2.f32 %v4738_v9 }
 0x789   : > { %8774 = vpow2.f32 %v4718_v27  ;;  %v4711_v27 = vsub.f32 %v11066_v56, %v11165_v14 }
 0x78a   : > { %8776 = vpow2.f32 %v4740_v63  ;;  %v4672_v2 = vpop.xlane.xlu1 %4671  ;;  %v4645_v59 = vpop.xlane.xlu0 %4644 }
 0x78b   : > { %8778 = vpow2.f32 %v4720_v38  ;;  %v4710_v40 = vsub.f32 %v11062_v47, %v4672_v2  ;;  %v4782_v21 = vmul.f32 1.442695, %v4711_v27 }
 0x78c   : > { %v11167_v45 = vpop.eup %8758  ;;  %8780 = vpow2.f32 %v4742_v44  ;;  %v4702_v44 = vsub.f32 %v11064_v6, %v11175_v18 }
 0x78d   : > { %v4811_v16 = vsel %vm1494_vm3, %v11167_v45, 0.0  ;;  %v11173_v53 = vpop.eup %8760  ;;  %8782 = vpow2.f32 %v4722_v22  ;;  %v4780_v47 = vmul.f32 1.442695, %v4710_v40 }
 0x78e   : > { %4812 = vadd.xlane.f32.xlu1 %v4811_v16  ;;  %v4814_v0 = vsel %vm1494_vm3, %v11173_v53, 0.0  ;;  %v4669_v11 = vpop.xlane.xlu1 %4668  ;;  %8784 = vpow2.f32 %v4744_v55  ;;  %v4642_v24 = vpop.xlane.xlu0 %4641  ;;  %v4764_v55 = vmul.f32 1.442695, %v4702_v44 }
 0x78f   : > { %8786 = vpow2.f32 %v4724_v42  ;;  %v4709_v23 = vsub.f32 %v11074_v41, %v4669_v11  ;;  %v4700_v41 = vsub.f32 %v11072_v57, %v4642_v24  ;;  %v4701_v57 = vsub.f32 %v11060_v61, %v4645_v59 }
 0x790   : > { %v11177_v20 = vpop.eup %8762  ;;  %8788 = vpow2.f32 %v4746_v13 }
 0x791   : > { %v11183_v46 = vpop.eup %8764  ;;  %v4784_v62 = vsel %vm1494_vm3, %v11177_v20, 0.0  ;;  %8790 = vpow2.f32 %v4726_v34  ;;  %v4778_v8 = vmul.f32 1.442695, %v4709_v23  ;;  %v4760_v54 = vmul.f32 1.442695, %v4700_v41 }
 0x792   : > { %v11189_v32 = vpop.eup %8766  ;;  %4815 = vadd.xlane.f32.xlu1 %v4814_v0  ;;  %4785 = vadd.xlane.f32.xlu0 %v4784_v62  ;;  %v4817_v15 = vsel %vm1494_vm3, %v11183_v46, 0.0  ;;  %8792 = vpow2.f32 %v4728_v51  ;;  %v4762_v61 = vmul.f32 1.442695, %v4701_v57  ;;  %v4666_v22 = vpop.xlane.xlu1 %4665 }
 0x793   : > { %v11195_v43 = vpop.eup %8768  ;;  %v4787_v12 = vsel %vm1494_vm3, %v11189_v32, 0.0  ;;  %8794 = vpow2.f32 %v4778_v8  ;;  %v4708_v6 = vsub.f32 %v11086_v4, %v4666_v22 }
 0x794   : > { %v11201_v30 = vpop.eup %8770  ;;  %v4820_v28 = vsel %vm1494_vm3, %v11195_v43, 0.0  ;;  %8796 = vpow2.f32 %v4780_v47 }
 0x795   : > { %v11205_v36 = vpop.eup %8772  ;;  %v4790_v58 = vsel %vm1494_vm3, %v11201_v30, 0.0  ;;  %8798 = vpow2.f32 %v4760_v54  ;;  %v4776_v59 = vmul.f32 1.442695, %v4708_v6 }
 0x796   : > { %4818 = vadd.xlane.f32.xlu1 %v4817_v15  ;;  %4788 = vadd.xlane.f32.xlu0 %v4787_v12  ;;  %v11212_v1 = vpop.eup %8774  ;;  %v4823_v48 = vsel %vm1494_vm3, %v11205_v36, 0.0  ;;  %8800 = vpow2.f32 %v4782_v21  ;;  %v4663_v47 = vpop.xlane.xlu1 %4662 }
 0x797   : > { %v11215_v52 = vpop.eup %8776  ;;  %v4793_v9 = vsel %vm1494_vm3, %v11212_v1, 0.0  ;;  %8802 = vpow2.f32 %v4762_v61 }
 0x798   : > { %v11222_v17 = vpop.eup %8778  ;;  %v4826_v7 = vsel %vm1494_vm3, %v11215_v52, 0.0  ;;  %8804 = vpow2.f32 %v4764_v55 }
 0x799   : > { %v11228_v63 = vpop.eup %8780  ;;  %v4796_v38 = vsel %vm1494_vm3, %v11222_v17, 0.0  ;;  %8806 = vpow2.f32 %v4776_v59 }
 0x79a   : > { %4821 = vadd.xlane.f32.xlu1 %v4820_v28  ;;  %4791 = vadd.xlane.f32.xlu0 %v4790_v58  ;;  %v11233_v16 = vpop.eup %8782  ;;  %v4829_v56 = vsel %vm1494_vm3, %v11228_v63, 0.0  ;;  %v4660_v21 = vpop.xlane.xlu1 %4659 }
 0x79b   : > { %v11237_v14 = vpop.eup %8784  ;;  %v4799_v10 = vsel %vm1494_vm3, %v11233_v16, 0.0  ;;  %v4706_v61 = vsub.f32 %v11100_v19, %v4660_v21  ;;  %v12591_v21 = vld [vmem:[#allocation4_spill] sm:$0xff] }
 0x79c   : > { %v11243_v2 = vpop.eup %8786  ;;  %v4832_v62 = vsel %vm1494_vm3, %v11237_v14, 0.0 }
 0x79d   : > { %v11245_v0 = vpop.eup %8788  ;;  %v4802_v18 = vsel %vm1494_vm3, %v11243_v2, 0.0  ;;  %v4772_v55 = vmul.f32 1.442695, %v4706_v61 }
 0x79e   : > { %4824 = vadd.xlane.f32.xlu1 %v4823_v48  ;;  %4794 = vadd.xlane.f32.xlu0 %v4793_v9  ;;  %v11249_v29 = vpop.eup %8790  ;;  %v4835_v42 = vsel %vm1519_vm4, %v11245_v0, 0.0  ;;  %v4639_v9 = vpop.xlane.xlu0 %4638 }
 0x79f   : > { %v11254_v33 = vpop.eup %8792  ;;  %v4805_v15 = vsel %vm1494_vm3, %v11249_v29, 0.0  ;;  %v4657_v6 = vpop.xlane.xlu1 %4656 }
 0x7a0   : > { %v11260_v12 = vpop.eup %8794  ;;  %v4808_v13 = vsel %vm1519_vm4, %v11254_v33, 0.0 }
 0x7a1   : > { %v11262_v4 = vpop.eup %8796  ;;  %v4883_v11 = vsel %vm1494_vm3, %v11260_v12, 0.0 }
 0x7a2   : > { %4827 = vadd.xlane.f32.xlu1 %v4826_v7  ;;  %4797 = vadd.xlane.f32.xlu0 %v4796_v38  ;;  %v11268_v34 = vpop.eup %8798  ;;  %v4886_v23 = vsel %vm1494_vm3, %v11262_v4, 0.0  ;;  %v4636_v27 = vpop.xlane.xlu0 %4635  ;;  %v4699_v7 = vsub.f32 %v11084_v50, %v4639_v9 }
 0x7a3   : > { %v11270_v60 = vpop.eup %8800  ;;  %v4856_v28 = vsel %vm1494_vm3, %v11268_v34, 0.0  ;;  %v4698_v38 = vsub.f32 %v11088_v31, %v4636_v27  ;;  %v4705_v31 = vsub.f32 %v11110_v3, %v4657_v6 }
 0x7a4   : > { %v11276_v58 = vpop.eup %8802  ;;  %v4889_v24 = vsel %vm1519_vm4, %v11270_v60, 0.0  ;;  %v4758_v54 = vmul.f32 1.442695, %v4699_v7 }
 0x7a5   : > { %v4859_v51 = vsel %vm1494_vm3, %v11276_v58, 0.0  ;;  %v11282_v40 = vpop.eup %8804  ;;  %v4756_v44 = vmul.f32 1.442695, %v4698_v38 }
 0x7a6   : > { %4830 = vadd.xlane.f32.xlu1 %v4829_v56  ;;  %4800 = vadd.xlane.f32.xlu0 %v4799_v10  ;;  %v4862_v8 = vsel %vm1519_vm4, %v11282_v40, 0.0  ;;  %v11286_v41 = vpop.eup %8806  ;;  %v4633_v57 = vpop.xlane.xlu0 %4632  ;;  %v4707_v56 = vsub.f32 %v11090_v49, %v4663_v47  ;;  %8808 = vpow2.f32 %v4758_v54  ;;  %v4770_v49 = vmul.f32 1.442695, %v4705_v31 }
 0x7a7   : > { %v4880_v48 = vsel %vm1494_vm3, %v11286_v41, 0.0  ;;  %8810 = vpow2.f32 %v4756_v44  ;;  %v4654_v47 = vpop.xlane.xlu1 %4653 }
 0x7a8   : > { %v4774_v22 = vmul.f32 1.442695, %v4707_v56  ;;  %v12592_v56 = vld [vmem:[#allocation6_spill] sm:$0xff] }
 0x7aa   : > { %4833 = vadd.xlane.f32.xlu1 %v4832_v62  ;;  %4803 = vadd.xlane.f32.xlu0 %v4802_v18  ;;  %v4630_v10 = vpop.xlane.xlu0 %4629  ;;  %v4697_v62 = vsub.f32 %v11097_v5, %v4633_v57  ;;  %8812 = vpow2.f32 %v4774_v22 }
 0x7ab   : > { %v4696_v50 = vsub.f32 %v11107_v26, %v4630_v10  ;;  %8814 = vpow2.f32 %v4772_v55  ;;  %v4651_v57 = vpop.xlane.xlu1 %4650  ;;  %v12593_v10 = vld [vmem:[#allocation5_spill] sm:$0xff]  ;;  %v12594_v55 = vld [vmem:[#allocation7_spill] sm:$0xff] }
 0x7ac   : > { %v4754_v18 = vmul.f32 1.442695, %v4697_v62 }
 0x7ad   : > { %v4752_v59 = vmul.f32 1.442695, %v4696_v50  ;;  %v12595_v50 = vld [vmem:[#allocation24_spill] sm:$0xff] }
 0x7ae   : > { %4836 = vadd.xlane.f32.xlu1 %v4835_v42  ;;  %4806 = vadd.xlane.f32.xlu0 %v4805_v15  ;;  %8816 = vpow2.f32 %v4754_v18  ;;  %v4704_v6 = vsub.f32 %v12595_v50, %v4654_v47 }
 0x7af   : > { %8818 = vpow2.f32 %v4752_v59  ;;  %v11333_v38 = vpop.permute.xlu1 %329 }
 0x7b0   : > { %8820 = vpow2.f32 %v4770_v49  ;;  %12590 = vst [vmem:[#allocation27_spill] sm:$0xff] %v11333_v38  ;;  %v4768_v59 = vmul.f32 1.442695, %v4704_v6  ;;  %v12596_v49 = vld [vmem:[#allocation55_spill] sm:$0xff] }
 0x7b2   : > { %4884 = vadd.xlane.f32.xlu1 %v4883_v11  ;;  %4809 = vadd.xlane.f32.xlu0 %v4808_v13  ;;  %8822 = vpow2.f32 %v4768_v59 }
 0x7b3   : > { %v11301_v42 = vpop.eup %8808 }
 0x7b4   : > { %12583 = vst [vmem:[#allocation49_spill] sm:$0xff] %v11301_v42  ;;  %v4853_v5 = vsel %vm1494_vm3, %v11301_v42, 0.0  ;;  %v11305_v19 = vpop.eup %8810 }
 0x7b5   : > { %12584 = vst [vmem:[#allocation20_spill] sm:$0xff] %v11305_v19  ;;  %v4850_v15 = vsel %vm1494_vm3, %v11305_v19, 0.0 }
 0x7b6   : > { %4887 = vadd.xlane.f32.xlu1 %v4886_v23  ;;  %4857 = vadd.xlane.f32.xlu0 %v4856_v28 }
 0x7b7   : > { %v11307_v26 = vpop.eup %8812 }
 0x7b8   : > { %12585 = vst [vmem:[#allocation45_spill] sm:$0xff] %v11307_v26  ;;  %v11311_v11 = vpop.eup %8814  ;;  %v4877_v13 = vsel %vm1494_vm3, %v11307_v26, 0.0  ;;  %v12601_v26 = vld [vmem:[#allocation12_spill] sm:$0xff] }
 0x7b9   : > { %12586 = vst [vmem:[#allocation19_spill] sm:$0xff] %v11311_v11  ;;  %v4874_v23 = vsel %vm1494_vm3, %v11311_v11, 0.0 }
 0x7ba   : > { %4890 = vadd.xlane.f32.xlu1 %v4889_v24  ;;  %4860 = vadd.xlane.f32.xlu0 %v4859_v51 }
 0x7bb   : > { %v11313_v3 = vpop.eup %8816 }
 0x7bc   : > { %12587 = vst [vmem:[#allocation44_spill] sm:$0xff] %v11313_v3  ;;  %v11319_v28 = vpop.eup %8818  ;;  %v4847_v24 = vsel %vm1494_vm3, %v11313_v3, 0.0 }
 0x7bd   : > { %12588 = vst [vmem:[#allocation18_spill] sm:$0xff] %v11319_v28  ;;  %v4844_v51 = vsel %vm1494_vm3, %v11319_v28, 0.0 }
 0x7be   : > { %4863 = vadd.xlane.f32.xlu0 %v4862_v8  ;;  %v11325_v8 = vpop.eup %8820 }
 0x7bf   : > { %12589 = vst [vmem:[#allocation58_spill] sm:$0xff] %v11325_v8  ;;  %v4871_v9 = vsel %vm1494_vm3, %v11325_v8, 0.0 }
 0x7c2   : > { %4881 = vadd.xlane.f32.xlu0 %v4880_v48  ;;  %v4627_v48 = vpop.xlane.xlu0 %4626 }
 0x7c6   : > { %v11329_v27 = vpop.xlane.xlu0 %4623 }
 0x7ca   : > { %v500_v7 = vpop.permute.xlu0 %499 }
 0x7cb   : > { %673 = vbcast.lane.b32.xlu1 %v12526_v39, 336 }
 0x7ce   : > { %v11331_v54 = vpop.permute.xlu0 %278 }
 0x7cf   : > { %759 = vbcast.lane.b32.xlu1 %v12527_v37, 272 }
 0x7d2   : > { %v11337_v44 = vpop.permute.xlu0 %448 }
 0x7d8   : > { %622 = vbcast.lane.b32.xlu0 %v12460_v25, 336 }
 0x7dc   : > { %740 = vbcast.lane.b32.xlu0 %v12548_v35, 272 }
 0x7f3   : > { %4854 = vadd.xlane.f32.xlu1 %v4853_v5  ;;  %v4695_v5 = vsub.f32 %v12596_v49, %v4627_v48  ;;  %v11358_v48 = vpop.eup %8822 }
 0x7f4   : > { %12598 = vst [vmem:[#allocation37_spill] sm:$0xff] %v11358_v48  ;;  %v4868_v59 = vsel %vm1494_vm3, %v11358_v48, 0.0 }
 0x7f7   : > { %4851 = vadd.xlane.f32.xlu1 %v4850_v15 }
 0x7fb   : > { %4878 = vadd.xlane.f32.xlu0 %v4877_v13  ;;  %4875 = vadd.xlane.f32.xlu1 %v4874_v23  ;;  %v4750_v23 = vmul.f32 1.442695, %v4695_v5 }
 0x7fd   : > { %8824 = vpow2.f32 %v4750_v23 }
 0x7ff   : > { %4848 = vadd.xlane.f32.xlu1 %v4847_v24  ;;  %4845 = vadd.xlane.f32.xlu0 %v4844_v51  ;;  %v12597_v24 = vld [vmem:[#allocation23_spill] sm:$0xff] }
 0x800   : > { %v4703_v51 = vsub.f32 %v12597_v24, %v4651_v57 }
 0x802   : > { %v4766_v37 = vmul.f32 1.442695, %v4703_v51 }
 0x803   : > { %4872 = vadd.xlane.f32.xlu1 %v4871_v9 }
 0x804   : > { %8826 = vpow2.f32 %v4766_v37 }
 0x80a   : > { %v11362_v57 = vpop.eup %8824 }
 0x80b   : > { %12599 = vst [vmem:[#allocation17_spill] sm:$0xff] %v11362_v57  ;;  %v4841_v37 = vsel %vm1494_vm3, %v11362_v57, 0.0 }
 0x811   : > { %v11368_v24 = vpop.eup %8826 }
 0x812   : > { %12600 = vst [vmem:[#allocation32_spill] sm:$0xff] %v11368_v24 }
 0x814   : > { %301 = vbcast.lane.b32.xlu1 %v12591_v21, 280 }
 0x815   : > { %471 = vbcast.lane.b32.xlu0 %v12592_v56, 280 }
 0x817   : > { %v11339_v61 = vpop.xlane.xlu1 %4812 }
 0x819   : > { %250 = vbcast.lane.b32.xlu0 %v12593_v10, 280 }
 0x81b   : > { %v11342_v22 = vpop.xlane.xlu1 %4815  ;;  %v11344_v62 = vpop.xlane.xlu0 %4785 }
 0x81d   : > { %420 = vbcast.lane.b32.xlu0 %v12594_v55, 280 }
 0x81f   : > { %v11348_v18 = vpop.xlane.xlu1 %4818  ;;  %v11350_v31 = vpop.xlane.xlu0 %4788 }
 0x823   : > { %v4822_v15 = vpop.xlane.xlu1 %4821  ;;  %v11353_v13 = vpop.xlane.xlu0 %4791 }
 0x827   : > { %v4825_v9 = vpop.xlane.xlu1 %4824  ;;  %v11356_v35 = vpop.xlane.xlu0 %4794 }
 0x82b   : > { %v4828_v47 = vpop.xlane.xlu1 %4827  ;;  %v4798_v50 = vpop.xlane.xlu0 %4797 }
 0x82f   : > { %v4831_v8 = vpop.xlane.xlu1 %4830  ;;  %v4801_v28 = vpop.xlane.xlu0 %4800 }
 0x833   : > { %v4834_v6 = vpop.xlane.xlu1 %4833  ;;  %v4804_v11 = vpop.xlane.xlu0 %4803 }
 0x837   : > { %v4837_v49 = vpop.xlane.xlu1 %4836  ;;  %v4807_v3 = vpop.xlane.xlu0 %4806 }
 0x838   : > { %8828 = vrcp.f32 %v4837_v49  ;;  %4869 = vadd.xlane.f32.xlu1 %v4868_v59  ;;  %v4865_v49 = vsel %vm1494_vm3, %v11368_v24, 0.0 }
 0x839   : > { %8830 = vrcp.f32 %v4834_v6 }
 0x83b   : > { %v11364_v5 = vpop.xlane.xlu1 %4884  ;;  %v4810_v23 = vpop.xlane.xlu0 %4809 }
 0x83c   : > { %4842 = vadd.xlane.f32.xlu0 %v4841_v37  ;;  %8832 = vrcp.f32 %v4810_v23  ;;  %v11381_v37 = vmul.f32 %v12601_v26, %v500_v7 }
 0x83d   : > { %8834 = vrcp.f32 %v4831_v8 }
 0x83e   : > { %8836 = vrcp.f32 %v4807_v3  ;;  %v12602_v3 = vld [vmem:[#allocation11_spill] sm:$0xff] }
 0x83f   : > { %v11370_v51 = vpop.xlane.xlu1 %4887  ;;  %v11372_v48 = vpop.xlane.xlu0 %4857  ;;  %8838 = vrcp.f32 %v4828_v47  ;;  %v377_v8 = vmul.f32 %v12602_v3, %v11333_v38 }
 0x840   : > { %4866 = vadd.xlane.f32.xlu0 %v4865_v49  ;;  %8840 = vrcp.f32 %v4804_v11  ;;  %v12603_v11 = vmov 0.0  }
 0x841   : > { %8842 = vrcp.f32 %v4825_v9  ;;  %v551_v49 = vadd.f32 %v11381_v37, %v377_v8 }
 0x842   : > { %8844 = vrcp.f32 %v4801_v28 }
 0x843   : > { %v11376_v6 = vpop.xlane.xlu1 %4890  ;;  %v11378_v59 = vpop.xlane.xlu0 %4860  ;;  %8846 = vrcp.f32 %v4822_v15 }
 0x844   : > { %8848 = vrcp.f32 %v4798_v50 }
 0x845   : > { %v8829_v57 = vpop.eup %8828  ;;  %8850 = vrcp.f32 %v11348_v18 }
 0x846   : > { %v4945_v23 = vmul.f32 %v8829_v57, %v11245_v0  ;;  %v8831_v19 = vpop.eup %8830  ;;  %8852 = vrcp.f32 %v11356_v35 }
 0x847   : > { %v11386_v24 = vpop.permute.xlu1 %673  ;;  %v11388_v47 = vpop.xlane.xlu0 %4863  ;;  %v4944_v9 = vmul.f32 %v8831_v19, %v11237_v14  ;;  %8854 = vrcp.f32 %v11342_v22 }
 0x848   : > { %8195 = vmatpush3.xpose.msk.msra.mxu1 %vm1494_vm3, %v4945_v23  ;;  %v12604_v23 = vld [vmem:[#allocation10_spill] sm:$0xff]  ;;  %v701_v15 = vadd.f32 %v11386_v24, %v551_v49  ;;  %8856 = vrcp.f32 %v11353_v13  ;;  %v12605_v49 = vld [vmem:[#allocation53_spill] sm:$0xff] }
 0x849   : > { %645 = vbcast.lane.b32.xlu1 %v12526_v39, 280  ;;  %8196 = vmatprep.subr.mxu1 %v12603_v11  ;;  %v8833_v7 = vpop.eup %8832  ;;  %v365_v42 = vmul.f32 %v12604_v23, %v11331_v54  ;;  %v11404_v39 = vmul.f32 %v12601_v26, %v11337_v44  ;;  %8858 = vrcp.f32 %v11339_v61 }
 0x84a   : > { %v8835_v3 = vpop.eup %8834  ;;  %v4936_v57 = vmul.f32 %v8833_v7, %v11254_v33  ;;  %8860 = vrcp.f32 %v11350_v31 }
 0x84b   : > { %v11395_v0 = vpop.permute.xlu1 %759  ;;  %v11397_v28 = vpop.xlane.xlu0 %4881  ;;  %v4943_v33 = vmul.f32 %v8835_v3, %v11228_v63  ;;  %v539_v7 = vadd.f32 %v11404_v39, %v365_v42  ;;  %8862 = vrcp.f32 %v11376_v6 }
 0x84c   : > { %v8837_v38 = vpop.eup %8836  ;;  %8197 = vmatpush3.xpose.msk.msra.mxu1 %vm1494_vm3, %v4944_v9  ;;  %8174 = vmatpush3.xpose.msk.msra.mxu0 %vm1494_vm3, %v4936_v57  ;;  %v771_v14 = vmul.f32 %v11395_v0, %v701_v15  ;;  %v4694_v9 = vsub.f32 %v12605_v49, %v11329_v27  ;;  %8864 = vrcp.f32 %v11344_v62 }
 0x84d   : > { %8198 = vmatprep.subr.mxu1 %v12603_v11  ;;  %8175 = vmatprep.subr.mxu0 %v12603_v11  ;;  %v8839_v19 = vpop.eup %8838  ;;  %v4935_v50 = vmul.f32 %v8837_v38, %v11249_v29 }
 0x84e   : > { %v8841_v8 = vpop.eup %8840  ;;  %v4971_v63 = vsel %vm1494_vm3, %v771_v14, 0.0  ;;  %v4942_v35 = vmul.f32 %v8839_v19, %v11215_v52  ;;  %v4748_v14 = vmul.f32 1.442695, %v4694_v9 }
 0x84f   : > { %v11415_v44 = vpop.permute.xlu0 %622  ;;  %v8843_v29 = vpop.eup %8842  ;;  %v4934_v38 = vmul.f32 %v8841_v8, %v11243_v2  ;;  %v4972_v57 = vrot.slane %v4971_v63, 4 }
 0x850   : > { %8199 = vmatpush3.xpose.msk.msra.mxu1 %vm1494_vm3, %v4943_v33  ;;  %8176 = vmatpush3.xpose.msk.msra.mxu0 %vm1494_vm3, %v4935_v50  ;;  %v689_v18 = vadd.f32 %v11415_v44, %v539_v7  ;;  %v8845_v3 = vpop.eup %8844  ;;  %v4941_v52 = vmul.f32 %v8843_v29, %v11205_v36  ;;  %8866 = vpow2.f32 %v4748_v14 }
 0x851   : > { %8200 = vmatprep.subr.mxu1 %v12603_v11  ;;  %8177 = vmatprep.subr.mxu0 %v12603_v11  ;;  %v8847_v2 = vpop.eup %8846  ;;  %v4933_v13 = vmul.f32 %v8845_v3, %v11233_v16  ;;  %v4973_v33 = vadd.f32 %v4972_v57, %v4971_v63  ;;  %8868 = vrcp.f32 %v11370_v51 }
 0x852   : > { %v8849_v15 = vpop.eup %8848  ;;  %v4940_v36 = vmul.f32 %v8847_v2, %v11195_v43  ;;  %8870 = vrcp.f32 %v11388_v47 }
 0x853   : > { %v11428_v42 = vpop.permute.xlu0 %740  ;;  %v8851_v31 = vpop.eup %8850  ;;  %v4932_v16 = vmul.f32 %v8849_v15, %v11222_v17  ;;  %v4974_v50 = vrot.slane %v4973_v33, 2  ;;  %8872 = vrcp.f32 %v11364_v5 }
 0x854   : > { %v767_v22 = vmul.f32 %v11428_v42, %v689_v18  ;;  %8201 = vmatpush3.xpose.msk.msra.mxu1 %vm1494_vm3, %v4942_v35  ;;  %8178 = vmatpush3.xpose.msk.msra.mxu0 %vm1494_vm3, %v4934_v38  ;;  %v8853_v19 = vpop.eup %8852  ;;  %v4939_v43 = vmul.f32 %v8851_v31, %v11183_v46  ;;  %8874 = vrcp.f32 %v11378_v59 }
 0x855   : > { %8202 = vmatprep.subr.mxu1 %v12603_v11  ;;  %8179 = vmatprep.subr.mxu0 %v12603_v11  ;;  %v8855_v62 = vpop.eup %8854  ;;  %v4931_v17 = vmul.f32 %v8853_v19, %v11212_v1  ;;  %v4975_v7 = vadd.f32 %v4974_v50, %v4973_v33  ;;  %8876 = vrcp.f32 %v11397_v28  ;;  %v12608_v50 = vld [vmem:[#allocation20_spill] sm:$0xff] }
 0x856   : > { %594 = vbcast.lane.b32.xlu0 %v12460_v25, 280  ;;  %v4964_v27 = vsel %vm1494_vm3, %v767_v22, 0.0  ;;  %v8857_v8 = vpop.eup %8856  ;;  %v4938_v46 = vmul.f32 %v8855_v62, %v11173_v53  ;;  %8878 = vrcp.f32 %v11372_v48  ;;  %v12609_v62 = vld [vmem:[#allocation45_spill] sm:$0xff] }
 0x857   : > { %v4965_v61 = vrot.slane %v4964_v27, 4  ;;  %v8859_v47 = vpop.eup %8858  ;;  %v4930_v1 = vmul.f32 %v8857_v8, %v11201_v30  ;;  %v4976_v18 = vrot.slane %v4975_v7, 1 }
 0x858   : > { %8203 = vmatpush3.xpose.msk.msra.mxu1 %vm1494_vm3, %v4941_v52  ;;  %8180 = vmatpush3.xpose.msk.msra.mxu0 %vm1494_vm3, %v4933_v13  ;;  %v8861_v63 = vpop.eup %8860  ;;  %v4937_v53 = vmul.f32 %v8859_v47, %v11167_v45 }
 0x859   : > { %8204 = vmatprep.subr.mxu1 %v12603_v11  ;;  %8181 = vmatprep.subr.mxu0 %v12603_v11  ;;  %v4966_v6 = vadd.f32 %v4965_v61, %v4964_v27  ;;  %v8863_v59 = vpop.eup %8862  ;;  %v4929_v30 = vmul.f32 %v8861_v63, %v11189_v32  ;;  %v4977_v38 = vadd.f32 %v4976_v18, %v4975_v7 }
 0x85a   : > { %317 = vbcast.lane.b32.xlu0 %v12591_v21, 312  ;;  %v8865_v35 = vpop.eup %8864  ;;  %v4963_v45 = vmul.f32 %v8863_v59, %v11270_v60  ;;  %v12613_v59 = vld [vmem:[#allocation58_spill] sm:$0xff] }
 0x85b   : > { %v4967_v51 = vrot.slane %v4966_v6, 2  ;;  %v4928_v32 = vmul.f32 %v8865_v35, %v11177_v20 }
 0x85c   : > { %8205 = vmatpush3.xpose.msk.msra.mxu1 %vm1494_vm3, %v4940_v36  ;;  %8182 = vmatpush3.xpose.msk.msra.mxu0 %vm1494_vm3, %v4932_v16  ;;  %v12607_v36 = vld [vmem:[#allocation49_spill] sm:$0xff] }
 0x85d   : > { %8206 = vmatprep.subr.mxu1 %v12603_v11  ;;  %8183 = vmatprep.subr.mxu0 %v12603_v11  ;;  %v4968_v5 = vadd.f32 %v4967_v51, %v4966_v6  ;;  %v11481_v29 = vpop.eup %8866  ;;  %v12610_v51 = vld [vmem:[#allocation44_spill] sm:$0xff] }
 0x85e   : > { %487 = vbcast.lane.b32.xlu0 %v12592_v56, 312  ;;  %v8869_v48 = vpop.eup %8868  ;;  %v4838_v49 = vsel %vm1494_vm3, %v11481_v29, 0.0 }
 0x85f   : > { %v4969_v28 = vrot.slane %v4968_v5, 1  ;;  %v8871_v3 = vpop.eup %8870  ;;  %v4962_v20 = vmul.f32 %v8869_v48, %v11262_v4 }
 0x860   : > { %8207 = vmatpush3.xpose.msk.msra.mxu1 %vm1494_vm3, %v4939_v43  ;;  %8184 = vmatpush3.xpose.msk.msra.mxu0 %vm1494_vm3, %v4931_v17  ;;  %v8873_v9 = vpop.eup %8872  ;;  %v4954_v22 = vmul.f32 %v8871_v3, %v11282_v40 }
 0x861   : > { %8208 = vmatprep.subr.mxu1 %v12603_v11  ;;  %8185 = vmatprep.subr.mxu0 %v12603_v11  ;;  %v4970_v60 = vadd.f32 %v4969_v28, %v4968_v5  ;;  %v8875_v57 = vpop.eup %8874  ;;  %v4961_v52 = vmul.f32 %v8873_v9, %v11260_v12  ;;  %v12612_v5 = vld [vmem:[#allocation18_spill] sm:$0xff] }
 0x862   : > { %266 = vbcast.lane.b32.xlu0 %v12593_v10, 312  ;;  %v8877_v4 = vpop.eup %8876  ;;  %v4953_v2 = vmul.f32 %v8875_v57, %v11276_v58  ;;  %v12606_v58 = vld [vmem:[#allocation8_spill] sm:$0xff]  ;;  %v12615_v28 = vld [vmem:[#allocation14_spill] sm:$0xff] }
 0x863   : > { %v8879_v40 = vpop.eup %8878  ;;  %v4960_v27 = vmul.f32 %v8877_v4, %v11286_v41 }
 0x864   : > { %8209 = vmatpush3.xpose.msk.msra.mxu1 %vm1494_vm3, %v4938_v46  ;;  %8186 = vmatpush3.xpose.msk.msra.mxu0 %vm1494_vm3, %v4930_v1  ;;  %v4952_v13 = vmul.f32 %v8879_v40, %v11268_v34  ;;  %v12611_v1 = vld [vmem:[#allocation19_spill] sm:$0xff] }
 0x865   : > { %8210 = vmatprep.subr.mxu1 %v12603_v11  ;;  %8187 = vmatprep.subr.mxu0 %v12603_v11 }
 0x866   : > { %436 = vbcast.lane.b32.xlu0 %v12594_v55, 312 }
 0x868   : > { %8211 = vmatpush3.xpose.msk.msra.mxu1 %vm1494_vm3, %v4937_v53  ;;  %8188 = vmatpush3.xpose.msk.msra.mxu0 %vm1494_vm3, %v4929_v30 }
 0x869   : > { %8236 = vmatprep.subr.mxu1 %v12603_v11  ;;  %8189 = vmatprep.subr.mxu0 %v12603_v11 }
 0x86a   : > { %610 = vbcast.lane.b32.xlu0 %v12460_v25, 312 }
 0x86b   : > { %8213 = vmatmul.mubr.msk.f32.vlgmr.msra.gmra.mxu1 %vm1494_vm3, %v4977_v38  ;;  %v12614_v38 = vld [vmem:[#allocation27_spill] sm:$0xff] }
 0x86c   : > { %8237 = vmatpush3.xpose.msk.msra.mxu1 %vm1494_vm3, %v4963_v45  ;;  %8254 = vmatprep.mubr.msk.f32.mxu1 %vm9056_vm0, %v12603_v11  ;;  %v401_v45 = vmul.f32 %v12615_v28, %v12614_v38 }
 0x86d   : > { %8190 = vmatpush3.xpose.msk.msra.mxu0 %vm1494_vm3, %v4928_v32  ;;  %4839 = vadd.xlane.f32.xlu1 %v4838_v49 }
 0x86e   : > { %8215 = vmatprep.subr.mxu0 %v12603_v11  ;;  %8238 = vmatprep.subr.mxu1 %v12603_v11  ;;  %v575_v32 = vadd.f32 %v11381_v37, %v401_v45 }
 0x870   : > { %8192 = vmatmul.mubr.msk.f32.vlgmr.msra.gmra.mxu0 %vm1494_vm3, %v4970_v60  ;;  %8239 = vmatpush3.xpose.msk.msra.mxu1 %vm1494_vm3, %v4962_v20  ;;  %v725_v49 = vadd.f32 %v11386_v24, %v575_v32  ;;  %v12616_v20 = vld [vmem:[#allocation11_spill] sm:$0xff] }
 0x871   : > { %8216 = vmatpush3.xpose.msk.msra.mxu0 %vm1494_vm3, %v4954_v22  ;;  %8240 = vmatprep.subr.mxu1 %v12603_v11 }
 0x872   : > { %8217 = vmatprep.subr.mxu0 %v12603_v11  ;;  %8233 = vmatprep.mubr.msk.f32.mxu0 %vm9056_vm0, %v12603_v11  ;;  %v779_v60 = vmul.f32 %v11395_v0, %v725_v49 }
 0x874   : > { %8241 = vmatpush3.xpose.msk.msra.mxu1 %vm1494_vm3, %v4961_v52  ;;  %v4985_v4 = vsel %vm1494_vm3, %v779_v60, 0.0 }
 0x875   : > { %8218 = vmatpush3.xpose.msk.msra.mxu0 %vm1494_vm3, %v4953_v2  ;;  %8242 = vmatprep.subr.mxu1 %v12603_v11  ;;  %v4986_v37 = vrot.slane %v4985_v4, 4 }
 0x876   : > { %8219 = vmatprep.subr.mxu0 %v12603_v11 }
 0x878   : > { %8243 = vmatpush3.xpose.msk.msra.mxu1 %vm1494_vm3, %v4960_v27 }
 0x879   : > { %8220 = vmatpush3.xpose.msk.msra.mxu0 %vm1494_vm3, %v4952_v13  ;;  %8244 = vmatprep.subr.mxu1 %v12603_v11 }
 0x87a   : > { %8221 = vmatprep.subr.mxu0 %v12603_v11 }
 0x87c   : > { %v4855_v12 = vpop.xlane.xlu1 %4854 }
 0x87d   : > { %8880 = vrcp.f32 %v4855_v12 }
 0x87e   : > { %661 = vbcast.lane.b32.xlu1 %v12606_v58, 312 }
 0x880   : > { %v4852_v15 = vpop.xlane.xlu1 %4851 }
 0x881   : > { %8882 = vrcp.f32 %v4852_v15  ;;  %v4987_v15 = vadd.f32 %v4986_v37, %v4985_v4 }
 0x884   : > { %v4876_v14 = vpop.xlane.xlu1 %4875  ;;  %v4879_v33 = vpop.xlane.xlu0 %4878 }
 0x885   : > { %8884 = vrcp.f32 %v4879_v33 }
 0x886   : > { %8886 = vrcp.f32 %v4876_v14 }
 0x888   : > { %v4849_v41 = vpop.xlane.xlu1 %4848  ;;  %v4846_v34 = vpop.xlane.xlu0 %4845 }
 0x889   : > { %8888 = vrcp.f32 %v4849_v41 }
 0x88a   : > { %v8881_v61 = vpop.eup %8880  ;;  %8890 = vrcp.f32 %v4846_v34 }
 0x88b   : > { %v4951_v31 = vmul.f32 %v8881_v61, %v12607_v36  ;;  %v4988_v61 = vrot.slane %v4987_v15, 2  ;;  %v12617_v36 = vld [vmem:[#allocation37_spill] sm:$0xff] }
 0x88c   : > { %v4873_v16 = vpop.xlane.xlu1 %4872  ;;  %v472_v35 = vpop.permute.xlu0 %471 }
 0x88d   : > { %8892 = vrcp.f32 %v4873_v16  ;;  %8222 = vmatpush3.xpose.msk.msra.mxu0 %vm1494_vm3, %v4951_v31  ;;  %v520_v52 = vmul.f32 %v12601_v26, %v472_v35 }
 0x88e   : > { %v8883_v19 = vpop.eup %8882  ;;  %8223 = vmatprep.subr.mxu0 %v12603_v11 }
 0x88f   : > { %v4950_v6 = vmul.f32 %v8883_v19, %v12608_v50  ;;  %v4989_v19 = vadd.f32 %v4988_v61, %v4987_v15  ;;  %v12618_v50 = vld [vmem:[#allocation17_spill] sm:$0xff]  ;;  %v12621_v15 = vld [vmem:[#allocation36_spill] sm:$0xff]  ;;  %v12624_v61 = vld [vmem:[#allocation38_spill] sm:$0xff] }
 0x890   : > { %v251_v48 = vpop.permute.xlu0 %250  ;;  %v302_v3 = vpop.permute.xlu1 %301 }
 0x891   : > { %8224 = vmatpush3.xpose.msk.msra.mxu0 %vm1494_vm3, %v4950_v6  ;;  %v370_v9 = vmul.f32 %v12616_v20, %v302_v3  ;;  %v358_v0 = vmul.f32 %v12604_v23, %v251_v48 }
 0x892   : > { %8225 = vmatprep.subr.mxu0 %v12603_v11  ;;  %v8885_v43 = vpop.eup %8884 }
 0x893   : > { %v4959_v17 = vmul.f32 %v8885_v43, %v12609_v62  ;;  %v8887_v8 = vpop.eup %8886  ;;  %v544_v2 = vadd.f32 %v520_v52, %v370_v9  ;;  %v4990_v62 = vrot.slane %v4989_v19, 1 }
 0x894   : > { %v4958_v63 = vmul.f32 %v8887_v8, %v12611_v1  ;;  %v421_v22 = vpop.permute.xlu0 %420 }
 0x895   : > { %8245 = vmatpush3.xpose.msk.msra.mxu1 %vm1494_vm3, %v4959_v17  ;;  %v508_v12 = vmul.f32 %v12601_v26, %v421_v22  ;;  %v12619_v17 = vld [vmem:[#allocation32_spill] sm:$0xff] }
 0x896   : > { %v8889_v7 = vpop.eup %8888  ;;  %8246 = vmatprep.subr.mxu1 %v12603_v11 }
 0x897   : > { %v4949_v46 = vmul.f32 %v8889_v7, %v12610_v51  ;;  %v8891_v47 = vpop.eup %8890  ;;  %v532_v14 = vadd.f32 %v508_v12, %v358_v0  ;;  %v4991_v7 = vadd.f32 %v4990_v62, %v4989_v19  ;;  %v394_v51 = vmul.f32 %v12615_v28, %v302_v3 }
 0x898   : > { %v4948_v53 = vmul.f32 %v8891_v47, %v12612_v5 }
 0x899   : > { %8226 = vmatpush3.xpose.msk.msra.mxu0 %vm1494_vm3, %v4949_v46  ;;  %8247 = vmatpush3.xpose.msk.msra.mxu1 %vm1494_vm3, %v4958_v63  ;;  %v12620_v46 = vld [vmem:[#allocation13_spill] sm:$0xff]  ;;  %v568_v1 = vadd.f32 %v520_v52, %v394_v51 }
 0x89a   : > { %v8893_v18 = vpop.eup %8892  ;;  %8227 = vmatprep.subr.mxu0 %v12603_v11  ;;  %8248 = vmatprep.subr.mxu1 %v12603_v11  ;;  %v389_v47 = vmul.f32 %v12620_v46, %v11331_v54 }
 0x89b   : > { %v4957_v30 = vmul.f32 %v8893_v18, %v12613_v59  ;;  %v382_v59 = vmul.f32 %v12620_v46, %v251_v48 }
 0x89c   : > { %v563_v18 = vadd.f32 %v11404_v39, %v389_v47 }
 0x89d   : > { %8228 = vmatpush3.xpose.msk.msra.mxu0 %vm1494_vm3, %v4948_v53  ;;  %8249 = vmatpush3.xpose.msk.msra.mxu1 %vm1494_vm3, %v4957_v30  ;;  %v556_v35 = vadd.f32 %v508_v12, %v382_v59 }
 0x89e   : > { %8229 = vmatprep.subr.mxu0 %v12603_v11  ;;  %8250 = vmatprep.subr.mxu1 %v12603_v11  ;;  %v713_v53 = vadd.f32 %v11415_v44, %v563_v18 }
 0x8a0   : > { %v775_v30 = vmul.f32 %v11428_v42, %v713_v53 }
 0x8a2   : > { %v4978_v32 = vsel %vm1494_vm3, %v775_v30, 0.0 }
 0x8a3   : > { %v4979_v49 = vrot.slane %v4978_v32, 4 }
 0x8a5   : > { %v4980_v44 = vadd.f32 %v4979_v49, %v4978_v32 }
 0x8c1   : > { %v4870_v57 = vpop.xlane.xlu1 %4869 }
 0x8c2   : > { %8894 = vrcp.f32 %v4870_v57  ;;  %v4981_v57 = vrot.slane %v4980_v44, 2 }
 0x8c5   : > { %v646_v40 = vpop.permute.xlu1 %645  ;;  %v4843_v27 = vpop.xlane.xlu0 %4842 }
 0x8c6   : > { %v694_v13 = vadd.f32 %v646_v40, %v544_v2  ;;  %8896 = vrcp.f32 %v4843_v27  ;;  %v718_v63 = vadd.f32 %v646_v40, %v568_v1  ;;  %v4982_v2 = vadd.f32 %v4981_v57, %v4980_v44 }
 0x8c8   : > { %5565 = vxpose.xlu0.b32.start.end [1/1] (short) (narrow) %v694_v13, 72  ;;  %v4983_v13 = vrot.slane %v4982_v2, 1 }
 0x8c9   : > { %v4867_v24 = vpop.xlane.xlu0 %4866 }
 0x8ca   : > { %8898 = vrcp.f32 %v4867_v24  ;;  %v4984_v0 = vadd.f32 %v4983_v13, %v4982_v2 }
 0x8cd   : > { %v595_v33 = vpop.permute.xlu0 %594 }
 0x8ce   : > { %v682_v41 = vadd.f32 %v595_v33, %v532_v14  ;;  %v706_v38 = vadd.f32 %v595_v33, %v556_v35  ;;  %v12622_v14 = vld [vmem:[#allocation57_spill] sm:$0xff] }
 0x8cf   : > { %v8895_v34 = vpop.eup %8894  ;;  %v3653_v33 = vadd.f32 %v12622_v14, %v12621_v15 }
 0x8d0   : > { %5396 = vxpose.xlu1.b32.start.end [1/1] (short) (narrow) %v682_v41, 72  ;;  %v4956_v31 = vmul.f32 %v8895_v34, %v12617_v36  ;;  %v12625_v36 = vld [vmem:[#allocation26_spill] sm:$0xff] }
 0x8d1   : > { %v318_v5 = vpop.permute.xlu0 %317 }
 0x8d2   : > { %8251 = vmatpush3.xpose.msk.msra.mxu1 %vm1494_vm3, %v4956_v31  ;;  %v374_v54 = vmul.f32 %v12616_v20, %v318_v5  ;;  %v3553_v31 = vadd.f32 %v12625_v36, %v12624_v61 }
 0x8d3   : > { %v8897_v16 = vpop.eup %8896  ;;  %8252 = vmatprep.subr.mxu1 %v12603_v11 }
 0x8d4   : > { %v4947_v6 = vmul.f32 %v8897_v16, %v12618_v50 }
 0x8d5   : > { %v488_v45 = vpop.permute.xlu0 %487 }
 0x8d6   : > { %8230 = vmatpush3.xpose.msk.msra.mxu0 %vm1494_vm3, %v4947_v6  ;;  %v524_v3 = vmul.f32 %v12601_v26, %v488_v45  ;;  %v398_v6 = vmul.f32 %v12615_v28, %v318_v5 }
 0x8d7   : > { %v8899_v43 = vpop.eup %8898  ;;  %8231 = vmatprep.subr.mxu0 %v12603_v11 }
 0x8d8   : > { %v4955_v8 = vmul.f32 %v8899_v43, %v12619_v17  ;;  %v548_v9 = vadd.f32 %v524_v3, %v374_v54  ;;  %v572_v43 = vadd.f32 %v524_v3, %v398_v6 }
 0x8d9   : > { %v267_v60 = vpop.permute.xlu0 %266 }
 0x8da   : > { %8253 = vmatpush3.xpose.msk.msra.mxu1 %vm1494_vm3, %v4955_v8  ;;  %v362_v52 = vmul.f32 %v12604_v23, %v267_v60 }
 0x8db   : > { %8286 = vmatprep.subr.mxu1 %v12603_v11 }
 0x8dd   : > { %8255 = vmatmul.mubr.msk.f32.vlgmr.msra.gmra.mxu1 %vm1494_vm3, %v4991_v7  ;;  %v437_v42 = vpop.permute.xlu0 %436 }
 0x8de   : > { %8288 = vmatprep.mubr.msk.f32.mxu1 %vm9056_vm0, %v12603_v11  ;;  %v512_v4 = vmul.f32 %v12601_v26, %v437_v42 }
 0x8e0   : > { %v536_v40 = vadd.f32 %v512_v4, %v362_v52 }
 0x8e1   : > { %v611_v37 = vpop.permute.xlu0 %610 }
 0x8e2   : > { %v686_v24 = vadd.f32 %v611_v37, %v536_v40 }
 0x8e9   : > { %5903 = vxpose.xlu0.b32.start.end [1/1] (short) (narrow) %v718_v63, 72 }
 0x8f1   : > { %5734 = vxpose.xlu1.b32.start.end [1/1] (short) (narrow) %v706_v38, 72 }
 0x8f6   : > { %v4840_v39 = vpop.xlane.xlu1 %4839 }
 0x8f7   : > { %8900 = vrcp.f32 %v4840_v39 }
 0x8fa   : > { %v662_v22 = vpop.permute.xlu1 %661 }
 0x8fb   : > { %v698_v48 = vadd.f32 %v662_v22, %v548_v9  ;;  %v722_v62 = vadd.f32 %v662_v22, %v572_v43 }
 0x8fd   : > { %8287 = vmatpush3.msra.mxu1 %v698_v48 }
 0x8fe   : > { %8344 = vmatprep.subr.mxu1 %v12603_v11 }
 0x904   : > { %v8901_v27 = vpop.eup %8900 }
 0x905   : > { %v4946_v12 = vmul.f32 %v8901_v27, %v11481_v29 }
 0x907   : > { %8232 = vmatpush3.xpose.msk.msra.mxu0 %vm1494_vm3, %v4946_v12  ;;  %v12628_v12 = vld [vmem:[#allocation25_spill] sm:$0xff] }
 0x908   : > { %8257 = vmatprep.subr.mxu0 %v12603_v11 }
 0x90a   : > { %8234 = vmatmul.mubr.msk.f32.vlgmr.msra.gmra.mxu0 %vm1494_vm3, %v4984_v0 }
 0x90b   : > { %8258 = vmatpush3.msra.mxu0 %v686_v24  ;;  %8259 = vmatprep.mubr.msk.f32.mxu0 %vm9056_vm0, %v12603_v11 }
 0x90c   : > { %8315 = vmatprep.subr.mxu0 %v12603_v11 }
 0x92b   : > { %v5188_v41 = vpop.f32.mrf.mxu1 }
 0x92c   : > { %v11585_v34 = vadd.f32 %v5188_v41, %v3653_v33  ;;  %v12630_v33 = vld [vmem:[#allocation35_spill] sm:$0xff]  ;;  %v12631_v41 = vld [vmem:[#allocation56_spill] sm:$0xff] }
 0x92d   : > { %v8214_v29 = vpop.f32.mrf.mxu1 }
 0x92e   : > { %12623 = vst [vmem:[#allocation16_spill] sm:$0xff] %v11585_v34  ;;  %v3753_v29 = vadd.f32 %v12631_v41, %v12630_v33 }
 0x92f   : > { %503 = vbcast.lane.b32.xlu1 %v12592_v56, 344  ;;  %v386_v56 = vmul.f32 %v12620_v46, %v267_v60 }
 0x930   : > { %v5088_v16 = vpop.f32.mrf.mxu0 }
 0x931   : > { %v11590_v19 = vadd.f32 %v5088_v16, %v3553_v31 }
 0x932   : > { %v8193_v50 = vpop.f32.mrf.mxu0  ;;  %333 = vbcast.lane.b32.xlu0 %v12591_v21, 344  ;;  %v560_v21 = vadd.f32 %v512_v4, %v386_v56 }
 0x933   : > { %12626 = vst [vmem:[#allocation62_spill] sm:$0xff] %v11590_v19  ;;  %677 = vbcast.lane.b32.xlu1 %v12606_v58, 344 }
 0x936   : > { %282 = vbcast.lane.b32.xlu0 %v12593_v10, 344 }
 0x93a   : > { %452 = vbcast.lane.b32.xlu0 %v12594_v55, 344 }
 0x93e   : > { %626 = vbcast.lane.b32.xlu0 %v12460_v25, 344  ;;  %v710_v25 = vadd.f32 %v611_v37, %v560_v21  ;;  %v12627_v37 = vld [vmem:[#allocation34_spill] sm:$0xff] }
 0x93f   : > { %v3853_v24 = vadd.f32 %v12628_v12, %v12627_v37 }
 0x944   : > { %v5581_v17 = vpop.trf.xlu0 }
 0x945   : > { %8289 = vmatmul.mubr.msk.f32.vlgmr.msra.gmra.mxu1 %vm813_vm2, %v5581_v17 }
 0x946   : > { %8345 = vmatpush3.msra.mxu1 %v722_v62  ;;  %8291 = vmatprep.mubr.msk.f32.mxu1 %vm9056_vm0, %v12603_v11 }
 0x947   : > { %8394 = vmatprep.subr.mxu1 %v12603_v11 }
 0x948   : > { %v5582_v10 = vpop.trf.xlu0 }
 0x949   : > { %8292 = vmatmul.mubr.msk.f32.gmra.mxu1 %vm813_vm2, %v5582_v10 }
 0x94a   : > { %8294 = vmatprep.mubr.msk.f32.mxu1 %vm9056_vm0, %v12603_v11 }
 0x94c   : > { %v5412_v55 = vpop.trf.xlu1  ;;  %v5583_v58 = vpop.trf.xlu0 }
 0x94d   : > { %8260 = vmatmul.mubr.msk.f32.vlgmr.msra.gmra.mxu0 %vm813_vm2, %v5412_v55  ;;  %8295 = vmatmul.mubr.msk.f32.gmra.mxu1 %vm813_vm2, %v5583_v58 }
 0x94e   : > { %8316 = vmatpush3.msra.mxu0 %v710_v25  ;;  %8262 = vmatprep.mubr.msk.f32.mxu0 %vm9056_vm0, %v12603_v11 }
 0x94f   : > { %8297 = vmatprep.mubr.msk.f32.mxu1 %vm9056_vm0, %v12603_v11  ;;  %8373 = vmatprep.subr.mxu0 %v12603_v11 }
 0x950   : > { %v5413_v8 = vpop.trf.xlu1  ;;  %v5584_v7 = vpop.trf.xlu0 }
 0x951   : > { %8263 = vmatmul.mubr.msk.f32.gmra.mxu0 %vm813_vm2, %v5413_v8  ;;  %8298 = vmatmul.mubr.msk.f32.gmra.mxu1 %vm813_vm2, %v5584_v7 }
 0x952   : > { %8265 = vmatprep.mubr.msk.f32.mxu0 %vm9056_vm0, %v12603_v11  ;;  %8300 = vmatprep.mubr.msk.f32.mxu1 %vm9056_vm0, %v12603_v11 }
 0x954   : > { %v5414_v51 = vpop.trf.xlu1  ;;  %v5585_v47 = vpop.trf.xlu0 }
 0x955   : > { %8266 = vmatmul.mubr.msk.f32.gmra.mxu0 %vm813_vm2, %v5414_v51  ;;  %8301 = vmatmul.mubr.msk.f32.gmra.mxu1 %vm813_vm2, %v5585_v47 }
 0x956   : > { %8268 = vmatprep.mubr.msk.f32.mxu0 %vm9056_vm0, %v12603_v11  ;;  %8303 = vmatprep.mubr.msk.f32.mxu1 %vm9056_vm0, %v12603_v11 }
 0x958   : > { %v5415_v1 = vpop.trf.xlu1  ;;  %v5586_v63 = vpop.trf.xlu0 }
 0x959   : > { %8269 = vmatmul.mubr.msk.f32.gmra.mxu0 %vm813_vm2, %v5415_v1  ;;  %8304 = vmatmul.mubr.msk.f32.gmra.mxu1 %vm813_vm2, %v5586_v63 }
 0x95a   : > { %8271 = vmatprep.mubr.msk.f32.mxu0 %vm9056_vm0, %v12603_v11  ;;  %8306 = vmatprep.mubr.msk.f32.mxu1 %vm9056_vm0, %v12603_v11 }
 0x95c   : > { %v5416_v18 = vpop.trf.xlu1  ;;  %v5587_v5 = vpop.trf.xlu0 }
 0x95d   : > { %8272 = vmatmul.mubr.msk.f32.gmra.mxu0 %vm813_vm2, %v5416_v18  ;;  %8307 = vmatmul.mubr.msk.f32.gmra.mxu1 %vm813_vm2, %v5587_v5 }
 0x95e   : > { %8274 = vmatprep.mubr.msk.f32.mxu0 %vm9056_vm0, %v12603_v11  ;;  %8309 = vmatprep.mubr.msk.f32.mxu1 %vm9056_vm0, %v12603_v11 }
 0x960   : > { %v5417_v53 = vpop.trf.xlu1  ;;  %v5588_v59 = vpop.trf.xlu0 }
 0x961   : > { %8275 = vmatmul.mubr.msk.f32.gmra.mxu0 %vm813_vm2, %v5417_v53  ;;  %8310 = vmatmul.mubr.msk.f32.gmra.mxu1 %vm813_vm2, %v5588_v59 }
 0x962   : > { %8277 = vmatprep.mubr.msk.f32.mxu0 %vm9056_vm0, %v12603_v11  ;;  %8312 = vmatprep.mubr.msk.f32.mxu1 %vm9056_vm0, %v12603_v11 }
 0x964   : > { %v5418_v30 = vpop.trf.xlu1  ;;  %v5589_v35 = vpop.trf.xlu0 }
 0x965   : > { %8278 = vmatmul.mubr.msk.f32.gmra.mxu0 %vm813_vm2, %v5418_v30  ;;  %8313 = vmatmul.mubr.msk.f32.gmra.mxu1 %vm813_vm2, %v5589_v35 }
 0x966   : > { %8280 = vmatprep.mubr.msk.f32.mxu0 %vm9056_vm0, %v12603_v11  ;;  %8346 = vmatprep.mubr.msk.f32.mxu1 %vm9056_vm0, %v12603_v11 }
 0x968   : > { %v5419_v38 = vpop.trf.xlu1  ;;  %v5919_v45 = vpop.trf.xlu0 }
 0x969   : > { %8281 = vmatmul.mubr.msk.f32.gmra.mxu0 %vm813_vm2, %v5419_v38  ;;  %8347 = vmatmul.mubr.msk.f32.vlgmr.msra.gmra.mxu1 %vm813_vm2, %v5919_v45 }
 0x96a   : > { %8283 = vmatprep.mubr.msk.f32.mxu0 %vm9056_vm0, %v12603_v11  ;;  %8349 = vmatprep.mubr.msk.f32.mxu1 %vm9056_vm0, %v12603_v11 }
 0x96c   : > { %v5420_v32 = vpop.trf.xlu1  ;;  %v5920_v54 = vpop.trf.xlu0 }
 0x96d   : > { %8284 = vmatmul.mubr.msk.f32.gmra.mxu0 %vm813_vm2, %v5420_v32  ;;  %8350 = vmatmul.mubr.msk.f32.gmra.mxu1 %vm813_vm2, %v5920_v54 }
 0x96e   : > { %8317 = vmatprep.mubr.msk.f32.mxu0 %vm9056_vm0, %v12603_v11  ;;  %8352 = vmatprep.mubr.msk.f32.mxu1 %vm9056_vm0, %v12603_v11 }
 0x970   : > { %v5750_v3 = vpop.trf.xlu1  ;;  %v5921_v49 = vpop.trf.xlu0 }
 0x971   : > { %8318 = vmatmul.mubr.msk.f32.vlgmr.msra.gmra.mxu0 %vm813_vm2, %v5750_v3  ;;  %8353 = vmatmul.mubr.msk.f32.gmra.mxu1 %vm813_vm2, %v5921_v49 }
 0x972   : > { %8320 = vmatprep.mubr.msk.f32.mxu0 %vm9056_vm0, %v12603_v11  ;;  %8355 = vmatprep.mubr.msk.f32.mxu1 %vm9056_vm0, %v12603_v11 }
 0x974   : > { %v5751_v39 = vpop.trf.xlu1  ;;  %v5922_v60 = vpop.trf.xlu0 }
 0x975   : > { %8321 = vmatmul.mubr.msk.f32.gmra.mxu0 %vm813_vm2, %v5751_v39  ;;  %8356 = vmatmul.mubr.msk.f32.gmra.mxu1 %vm813_vm2, %v5922_v60 }
 0x976   : > { %8323 = vmatprep.mubr.msk.f32.mxu0 %vm9056_vm0, %v12603_v11  ;;  %8358 = vmatprep.mubr.msk.f32.mxu1 %vm9056_vm0, %v12603_v11 }
 0x978   : > { %v5752_v9 = vpop.trf.xlu1  ;;  %v5923_v44 = vpop.trf.xlu0 }
 0x979   : > { %8324 = vmatmul.mubr.msk.f32.gmra.mxu0 %vm813_vm2, %v5752_v9  ;;  %8359 = vmatmul.mubr.msk.f32.gmra.mxu1 %vm813_vm2, %v5923_v44 }
 0x97a   : > { %8326 = vmatprep.mubr.msk.f32.mxu0 %vm9056_vm0, %v12603_v11  ;;  %8361 = vmatprep.mubr.msk.f32.mxu1 %vm9056_vm0, %v12603_v11 }
 0x97c   : > { %v5753_v22 = vpop.trf.xlu1  ;;  %v5924_v48 = vpop.trf.xlu0 }
 0x97d   : > { %8327 = vmatmul.mubr.msk.f32.gmra.mxu0 %vm813_vm2, %v5753_v22  ;;  %8362 = vmatmul.mubr.msk.f32.gmra.mxu1 %vm813_vm2, %v5924_v48 }
 0x97e   : > { %8329 = vmatprep.mubr.msk.f32.mxu0 %vm9056_vm0, %v12603_v11  ;;  %8364 = vmatprep.mubr.msk.f32.mxu1 %vm9056_vm0, %v12603_v11 }
 0x980   : > { %v5754_v57 = vpop.trf.xlu1  ;;  %v5925_v42 = vpop.trf.xlu0 }
 0x981   : > { %8330 = vmatmul.mubr.msk.f32.gmra.mxu0 %vm813_vm2, %v5754_v57  ;;  %8365 = vmatmul.mubr.msk.f32.gmra.mxu1 %vm813_vm2, %v5925_v42 }
 0x982   : > { %8332 = vmatprep.mubr.msk.f32.mxu0 %vm9056_vm0, %v12603_v11  ;;  %8367 = vmatprep.mubr.msk.f32.mxu1 %vm9056_vm0, %v12603_v11 }
 0x984   : > { %v5755_v52 = vpop.trf.xlu1  ;;  %v5926_v4 = vpop.trf.xlu0 }
 0x985   : > { %8333 = vmatmul.mubr.msk.f32.gmra.mxu0 %vm813_vm2, %v5755_v52  ;;  %8368 = vmatmul.mubr.msk.f32.gmra.mxu1 %vm813_vm2, %v5926_v4 }
 0x986   : > { %8335 = vmatprep.mubr.msk.f32.mxu0 %vm9056_vm0, %v12603_v11  ;;  %8370 = vmatprep.mubr.msk.f32.mxu1 %vm9056_vm0, %v12603_v11 }
 0x988   : > { %v5756_v2 = vpop.trf.xlu1  ;;  %v5927_v40 = vpop.trf.xlu0 }
 0x989   : > { %8336 = vmatmul.mubr.msk.f32.gmra.mxu0 %vm813_vm2, %v5756_v2  ;;  %8371 = vmatmul.mubr.msk.f32.gmra.mxu1 %vm813_vm2, %v5927_v40 }
 0x98a   : > { %8338 = vmatprep.mubr.msk.f32.mxu0 %vm9056_vm0, %v12603_v11  ;;  %8412 = vmatprep.mubr.msk.f32.mxu1 %vm9056_vm0, %v12603_v11 }
 0x98c   : > { %v5757_v27 = vpop.trf.xlu1 }
 0x98d   : > { %8339 = vmatmul.mubr.msk.f32.gmra.mxu0 %vm813_vm2, %v5757_v27 }
 0x98e   : > { %8341 = vmatprep.mubr.msk.f32.mxu0 %vm9056_vm0, %v12603_v11 }
 0x990   : > { %v5758_v13 = vpop.trf.xlu1 }
 0x991   : > { %8342 = vmatmul.mubr.msk.f32.gmra.mxu0 %vm813_vm2, %v5758_v13 }
 0x992   : > { %8391 = vmatprep.mubr.msk.f32.mxu0 %vm9056_vm0, %v12603_v11 }
 0x99d   : > { %v5388_v0 = vpop.f32.mrf.mxu1 }
 0x99e   : > { %v11711_v15 = vadd.f32 %v5388_v0, %v3853_v24 }
 0x99f   : > { %v8256_v14 = vpop.f32.mrf.mxu1 }
 0x9a0   : > { %12629 = vst [vmem:[#allocation30_spill] sm:$0xff] %v11711_v15 }
 0x9a1   : > { %v504_v50 = vpop.permute.xlu1 %503 }
 0x9a2   : > { %v528_v56 = vmul.f32 %v12601_v26, %v504_v50 }
 0x9a4   : > { %v334_v16 = vpop.permute.xlu0 %333 }
 0x9a5   : > { %v378_v43 = vmul.f32 %v12616_v20, %v334_v16  ;;  %v402_v62 = vmul.f32 %v12615_v28, %v334_v16 }
 0x9a7   : > { %v11720_v17 = vadd.f32 %v528_v56, %v378_v43  ;;  %v11722_v21 = vadd.f32 %v528_v56, %v402_v62 }
 0x9a8   : > { %v283_v6 = vpop.permute.xlu0 %282 }
 0x9a9   : > { %v366_v10 = vmul.f32 %v12604_v23, %v283_v6  ;;  %v390_v25 = vmul.f32 %v12620_v46, %v283_v6 }
 0x9ac   : > { %v453_v55 = vpop.permute.xlu0 %452 }
 0x9ad   : > { %v516_v58 = vmul.f32 %v12601_v26, %v453_v55 }
 0x9af   : > { %v11727_v8 = vadd.f32 %v516_v58, %v366_v10  ;;  %v11729_v7 = vadd.f32 %v516_v58, %v390_v25 }
 0x9ca   : > { %v5288_v61 = vpop.f32.mrf.mxu0 }
 0x9cb   : > { %v11715_v36 = vadd.f32 %v5288_v61, %v3753_v29 }
 0x9cc   : > { %v8235_v31 = vpop.f32.mrf.mxu0 }
 0x9cd   : > { %12632 = vst [vmem:[#allocation59_spill] sm:$0xff] %v11715_v36 }
 0xa05   : > { %v5690_v20 = vpop.f32.mrf.mxu1 }
 0xa06   : > { %v11731_v51 = vmul.f32 0.35355338, %v5690_v20 }
 0xa07   : > { %v8290_v28 = vpop.f32.mrf.mxu1 }
 0xa08   : > { %v6135_v47 = vsel %vm1494_vm3, %v11731_v51, -inf }
 0xa09   : > { %6136 = vmax.xlane.f32.xlu0 %v6135_v47  ;;  %v5695_v1 = vpop.f32.mrf.mxu1 }
 0xa0a   : > { %v11735_v63 = vmul.f32 0.35355338, %v5695_v1 }
 0xa0b   : > { %v8293_v23 = vpop.f32.mrf.mxu1 }
 0xa0c   : > { %v6138_v46 = vsel %vm1494_vm3, %v11735_v63, -inf }
 0xa0d   : > { %v5521_v26 = vpop.f32.mrf.mxu0  ;;  %6139 = vmax.xlane.f32.xlu0 %v6138_v46  ;;  %v5700_v18 = vpop.f32.mrf.mxu1 }
 0xa0e   : > { %v11739_v5 = vmul.f32 0.35355338, %v5521_v26  ;;  %v11741_v53 = vmul.f32 0.35355338, %v5700_v18 }
 0xa0f   : > { %v8261_v59 = vpop.f32.mrf.mxu0  ;;  %v8296_v30 = vpop.f32.mrf.mxu1 }
 0xa10   : > { %v6108_v35 = vsel %vm1494_vm3, %v11739_v5, -inf  ;;  %v6141_v38 = vsel %vm1494_vm3, %v11741_v53, -inf }
 0xa11   : > { %6109 = vmax.xlane.f32.xlu1 %v6108_v35  ;;  %v5526_v45 = vpop.f32.mrf.mxu0  ;;  %6142 = vmax.xlane.f32.xlu0 %v6141_v38  ;;  %v5705_v32 = vpop.f32.mrf.mxu1 }
 0xa12   : > { %v11747_v54 = vmul.f32 0.35355338, %v5526_v45  ;;  %v11749_v3 = vmul.f32 0.35355338, %v5705_v32 }
 0xa13   : > { %v8264_v49 = vpop.f32.mrf.mxu0  ;;  %v8299_v39 = vpop.f32.mrf.mxu1 }
 0xa14   : > { %v6111_v60 = vsel %vm1494_vm3, %v11747_v54, -inf  ;;  %v6144_v9 = vsel %vm1494_vm3, %v11749_v3, -inf }
 0xa15   : > { %6112 = vmax.xlane.f32.xlu1 %v6111_v60  ;;  %v5531_v44 = vpop.f32.mrf.mxu0  ;;  %6145 = vmax.xlane.f32.xlu0 %v6144_v9  ;;  %v5710_v22 = vpop.f32.mrf.mxu1 }
 0xa16   : > { %v11755_v48 = vmul.f32 0.35355338, %v5531_v44  ;;  %v11757_v57 = vmul.f32 0.35355338, %v5710_v22 }
 0xa17   : > { %v8267_v42 = vpop.f32.mrf.mxu0  ;;  %v8302_v52 = vpop.f32.mrf.mxu1 }
 0xa18   : > { %v6114_v4 = vsel %vm1494_vm3, %v11755_v48, -inf  ;;  %v6147_v2 = vsel %vm1494_vm3, %v11757_v57, -inf }
 0xa19   : > { %6115 = vmax.xlane.f32.xlu1 %v6114_v4  ;;  %v5536_v40 = vpop.f32.mrf.mxu0  ;;  %6148 = vmax.xlane.f32.xlu0 %v6147_v2  ;;  %v5715_v27 = vpop.f32.mrf.mxu1 }
 0xa1a   : > { %v11763_v13 = vmul.f32 0.35355338, %v5536_v40  ;;  %v11765_v37 = vmul.f32 0.35355338, %v5715_v27 }
 0xa1b   : > { %v8270_v12 = vpop.f32.mrf.mxu0  ;;  %v8305_v24 = vpop.f32.mrf.mxu1 }
 0xa1c   : > { %v6117_v0 = vsel %vm1494_vm3, %v11763_v13, -inf  ;;  %v6150_v14 = vsel %vm1494_vm3, %v11765_v37, -inf }
 0xa1d   : > { %6118 = vmax.xlane.f32.xlu1 %v6117_v0  ;;  %v5541_v33 = vpop.f32.mrf.mxu0  ;;  %6151 = vmax.xlane.f32.xlu0 %v6150_v14  ;;  %v5720_v41 = vpop.f32.mrf.mxu1 }
 0xa1e   : > { %v11771_v29 = vmul.f32 0.35355338, %v5541_v33  ;;  %v11773_v61 = vmul.f32 0.35355338, %v5720_v41 }
 0xa1f   : > { %v8273_v31 = vpop.f32.mrf.mxu0  ;;  %v8308_v16 = vpop.f32.mrf.mxu1 }
 0xa20   : > { %v6120_v50 = vsel %vm1494_vm3, %v11771_v29, -inf  ;;  %v6153_v6 = vsel %vm1494_vm3, %v11773_v61, -inf }
 0xa21   : > { %6121 = vmax.xlane.f32.xlu1 %v6120_v50  ;;  %v5546_v43 = vpop.f32.mrf.mxu0  ;;  %6154 = vmax.xlane.f32.xlu0 %v6153_v6  ;;  %v5725_v62 = vpop.f32.mrf.mxu1 }
 0xa22   : > { %v11779_v56 = vmul.f32 0.35355338, %v5546_v43  ;;  %v11785_v47 = vmul.f32 0.35355338, %v5725_v62 }
 0xa23   : > { %v8276_v10 = vpop.f32.mrf.mxu0  ;;  %v8311_v25 = vpop.f32.mrf.mxu1 }
 0xa24   : > { %v6123_v55 = vsel %vm1494_vm3, %v11779_v56, -inf  ;;  %v6156_v30 = vsel %vm1494_vm3, %v11785_v47, -inf }
 0xa25   : > { %6124 = vmax.xlane.f32.xlu1 %v6123_v55  ;;  %v5551_v58 = vpop.f32.mrf.mxu0  ;;  %v5730_v20 = vpop.f32.mrf.mxu1 }
 0xa26   : > { %v11783_v28 = vmul.f32 0.35355338, %v5551_v58  ;;  %v11797_v60 = vmul.f32 0.35355338, %v5730_v20 }
 0xa27   : > { %v8279_v1 = vpop.f32.mrf.mxu0  ;;  %v8314_v23 = vpop.f32.mrf.mxu1 }
 0xa28   : > { %v6126_v46 = vsel %vm1494_vm3, %v11783_v28, -inf  ;;  %v6159_v2 = vsel %vm1519_vm4, %v11797_v60, -inf }
 0xa29   : > { %v5556_v26 = vpop.f32.mrf.mxu0  ;;  %6127 = vmax.xlane.f32.xlu0 %v6126_v46  ;;  %v6028_v18 = vpop.f32.mrf.mxu1 }
 0xa2a   : > { %v11789_v59 = vmul.f32 0.35355338, %v5556_v26  ;;  %v11805_v40 = vmul.f32 0.35355338, %v6028_v18 }
 0xa2b   : > { %v8282_v35 = vpop.f32.mrf.mxu0  ;;  %v8348_v38 = vpop.f32.mrf.mxu1 }
 0xa2c   : > { %v6129_v39 = vsel %vm1494_vm3, %v11789_v59, -inf  ;;  %v6189_v41 = vsel %vm1494_vm3, %v11805_v40, -inf }
 0xa2d   : > { %v5561_v45 = vpop.f32.mrf.mxu0  ;;  %6157 = vmax.xlane.f32.xlu0 %v6156_v30  ;;  %v6033_v32 = vpop.f32.mrf.mxu1 }
 0xa2e   : > { %v11793_v49 = vmul.f32 0.35355338, %v5561_v45  ;;  %v11813_v31 = vmul.f32 0.35355338, %v6033_v32 }
 0xa2f   : > { %v8285_v9 = vpop.f32.mrf.mxu0  ;;  %v8351_v44 = vpop.f32.mrf.mxu1 }
 0xa30   : > { %v6132_v22 = vsel %vm1519_vm4, %v11793_v49, -inf  ;;  %v6192_v25 = vsel %vm1494_vm3, %v11813_v31, -inf }
 0xa31   : > { %6133 = vmax.xlane.f32.xlu1 %v6132_v22  ;;  %v5859_v42 = vpop.f32.mrf.mxu0  ;;  %6130 = vmax.xlane.f32.xlu0 %v6129_v39  ;;  %v6038_v52 = vpop.f32.mrf.mxu1 }
 0xa32   : > { %v11801_v4 = vmul.f32 0.35355338, %v5859_v42  ;;  %v11821_v55 = vmul.f32 0.35355338, %v6038_v52 }
 0xa33   : > { %v8319_v27 = vpop.f32.mrf.mxu0  ;;  %v8354_v12 = vpop.f32.mrf.mxu1 }
 0xa34   : > { %v6162_v24 = vsel %vm1494_vm3, %v11801_v4, -inf  ;;  %v6195_v18 = vsel %vm1494_vm3, %v11821_v55, -inf }
 0xa35   : > { %6163 = vmax.xlane.f32.xlu1 %v6162_v24  ;;  %v5864_v0 = vpop.f32.mrf.mxu0  ;;  %6160 = vmax.xlane.f32.xlu0 %v6159_v2  ;;  %v6043_v14 = vpop.f32.mrf.mxu1 }
 0xa36   : > { %v11809_v33 = vmul.f32 0.35355338, %v5864_v0  ;;  %v11829_v30 = vmul.f32 0.35355338, %v6043_v14 }
 0xa37   : > { %v8322_v16 = vpop.f32.mrf.mxu0  ;;  %v8357_v50 = vpop.f32.mrf.mxu1 }
 0xa38   : > { %v6165_v6 = vsel %vm1494_vm3, %v11809_v33, -inf  ;;  %v6198_v44 = vsel %vm1494_vm3, %v11829_v30, -inf }
 0xa39   : > { %6166 = vmax.xlane.f32.xlu1 %v6165_v6  ;;  %v5869_v43 = vpop.f32.mrf.mxu0  ;;  %6190 = vmax.xlane.f32.xlu0 %v6189_v41  ;;  %v6048_v62 = vpop.f32.mrf.mxu1 }
 0xa3a   : > { %v11817_v10 = vmul.f32 0.35355338, %v5869_v43  ;;  %v11837_v22 = vmul.f32 0.35355338, %v6048_v62 }
 0xa3b   : > { %v8325_v58 = vpop.f32.mrf.mxu0  ;;  %v8360_v20 = vpop.f32.mrf.mxu1 }
 0xa3c   : > { %v6168_v1 = vsel %vm1494_vm3, %v11817_v10, -inf  ;;  %v6201_v0 = vsel %vm1494_vm3, %v11837_v22, -inf }
 0xa3d   : > { %6169 = vmax.xlane.f32.xlu1 %v6168_v1  ;;  %v5874_v23 = vpop.f32.mrf.mxu0  ;;  %6193 = vmax.xlane.f32.xlu0 %v6192_v25  ;;  %v6053_v46 = vpop.f32.mrf.mxu1 }
 0xa3e   : > { %v11825_v26 = vmul.f32 0.35355338, %v5874_v23  ;;  %v11845_v14 = vmul.f32 0.35355338, %v6053_v46 }
 0xa3f   : > { %v8328_v35 = vpop.f32.mrf.mxu0  ;;  %v8363_v38 = vpop.f32.mrf.mxu1 }
 0xa40   : > { %v6171_v45 = vsel %vm1494_vm3, %v11825_v26, -inf  ;;  %v6204_v25 = vsel %vm1494_vm3, %v11845_v14, -inf }
 0xa41   : > { %6172 = vmax.xlane.f32.xlu1 %v6171_v45  ;;  %v5879_v32 = vpop.f32.mrf.mxu0  ;;  %6196 = vmax.xlane.f32.xlu0 %v6195_v18  ;;  %v6058_v39 = vpop.f32.mrf.mxu1 }
 0xa42   : > { %v11833_v9 = vmul.f32 0.35355338, %v5879_v32  ;;  %v11853_v58 = vmul.f32 0.35355338, %v6058_v39 }
 0xa43   : > { %v8331_v42 = vpop.f32.mrf.mxu0  ;;  %v8366_v52 = vpop.f32.mrf.mxu1 }
 0xa44   : > { %v6174_v2 = vsel %vm1494_vm3, %v11833_v9, -inf  ;;  %v6207_v35 = vsel %vm1494_vm3, %v11853_v58, -inf }
 0xa45   : > { %6175 = vmax.xlane.f32.xlu1 %v6174_v2  ;;  %v5884_v27 = vpop.f32.mrf.mxu0  ;;  %6199 = vmax.xlane.f32.xlu0 %v6198_v44  ;;  %v6063_v12 = vpop.f32.mrf.mxu1 }
 0xa46   : > { %v11841_v24 = vmul.f32 0.35355338, %v5884_v27  ;;  %v11861_v38 = vmul.f32 0.35355338, %v6063_v12 }
 0xa47   : > { %v8334_v41 = vpop.f32.mrf.mxu0  ;;  %v8369_v16 = vpop.f32.mrf.mxu1 }
 0xa48   : > { %v6177_v50 = vsel %vm1494_vm3, %v11841_v24, -inf  ;;  %v6210_v42 = vsel %vm1494_vm3, %v11861_v38, -inf }
 0xa49   : > { %6178 = vmax.xlane.f32.xlu1 %v6177_v50  ;;  %v5889_v6 = vpop.f32.mrf.mxu0  ;;  %6202 = vmax.xlane.f32.xlu0 %v6201_v0  ;;  %v6068_v43 = vpop.f32.mrf.mxu1 }
 0xa4a   : > { %v11849_v62 = vmul.f32 0.35355338, %v5889_v6  ;;  %v11869_v52 = vmul.f32 0.35355338, %v6068_v43  ;;  %v11875_v0 = vpop.permute.xlu0 %626  ;;  %v11878_v6 = vpop.permute.xlu1 %677 }
 0xa4b   : > { %v8337_v20 = vpop.f32.mrf.mxu0  ;;  %v8372_v1 = vpop.f32.mrf.mxu1 }
 0xa4c   : > { %v6180_v23 = vsel %vm1494_vm3, %v11849_v62, -inf  ;;  %v6213_v12 = vsel %vm1519_vm4, %v11869_v52, -inf }
 0xa4d   : > { %6181 = vmax.xlane.f32.xlu1 %v6180_v23  ;;  %v5894_v46 = vpop.f32.mrf.mxu0  ;;  %6205 = vmax.xlane.f32.xlu0 %v6204_v25 }
 0xa4e   : > { %v11857_v18 = vmul.f32 0.35355338, %v5894_v46 }
 0xa4f   : > { %v8340_v45 = vpop.f32.mrf.mxu0 }
 0xa50   : > { %v6183_v32 = vsel %vm1494_vm3, %v11857_v18, -inf }
 0xa51   : > { %6184 = vmax.xlane.f32.xlu1 %v6183_v32  ;;  %v5899_v39 = vpop.f32.mrf.mxu0  ;;  %6208 = vmax.xlane.f32.xlu0 %v6207_v35 }
 0xa52   : > { %v11865_v44 = vmul.f32 0.35355338, %v5899_v39 }
 0xa53   : > { %v8343_v2 = vpop.f32.mrf.mxu0 }
 0xa54   : > { %v6186_v27 = vsel %vm1519_vm4, %v11865_v44, -inf }
 0xa55   : > { %6187 = vmax.xlane.f32.xlu1 %v6186_v27  ;;  %6211 = vmax.xlane.f32.xlu0 %v6210_v42 }
 0xa59   : > { %6214 = vmax.xlane.f32.xlu0 %v6213_v12 }
 0xa92   : > { %v6137_v41 = vpop.xlane.xlu0 %6136 }
 0xa93   : > { %v6225_v16 = vsub.f32 %v11731_v51, %v6137_v41 }
 0xa95   : > { %v6270_v50 = vmul.f32 1.442695, %v6225_v16 }
 0xa96   : > { %v6140_v43 = vpop.xlane.xlu0 %6139 }
 0xa97   : > { %8902 = vpow2.f32 %v6270_v50  ;;  %v6226_v25 = vsub.f32 %v11735_v63, %v6140_v43 }
 0xa99   : > { %v6272_v20 = vmul.f32 1.442695, %v6226_v25 }
 0xa9a   : > { %v6110_v1 = vpop.xlane.xlu1 %6109  ;;  %v6143_v23 = vpop.xlane.xlu0 %6142 }
 0xa9b   : > { %8904 = vpow2.f32 %v6272_v20  ;;  %v6216_v46 = vsub.f32 %v11739_v5, %v6110_v1  ;;  %v6227_v35 = vsub.f32 %v11741_v53, %v6143_v23 }
 0xa9d   : > { %v6252_v45 = vmul.f32 1.442695, %v6216_v46  ;;  %v6274_v32 = vmul.f32 1.442695, %v6227_v35 }
 0xa9e   : > { %v6113_v39 = vpop.xlane.xlu1 %6112  ;;  %v6146_v42 = vpop.xlane.xlu0 %6145 }
 0xa9f   : > { %8906 = vpow2.f32 %v6252_v45  ;;  %v6217_v51 = vsub.f32 %v11747_v54, %v6113_v39  ;;  %v6228_v2 = vsub.f32 %v11749_v3, %v6146_v42 }
 0xaa0   : > { %8908 = vpow2.f32 %v6274_v32 }
 0xaa1   : > { %v6254_v27 = vmul.f32 1.442695, %v6217_v51  ;;  %v6276_v63 = vmul.f32 1.442695, %v6228_v2 }
 0xaa2   : > { %v6116_v12 = vpop.xlane.xlu1 %6115  ;;  %v6149_v41 = vpop.xlane.xlu0 %6148 }
 0xaa3   : > { %8910 = vpow2.f32 %v6254_v27  ;;  %v6218_v16 = vsub.f32 %v11755_v48, %v6116_v12  ;;  %v6229_v5 = vsub.f32 %v11757_v57, %v6149_v41 }
 0xaa4   : > { %v11887_v53 = vpop.eup %8902  ;;  %8912 = vpow2.f32 %v6276_v63 }
 0xaa5   : > { %12633 = vst [vmem:[#allocation28_spill] sm:$0xff] %v11887_v53  ;;  %v6256_v50 = vmul.f32 1.442695, %v6218_v16  ;;  %v6278_v43 = vmul.f32 1.442695, %v6229_v5  ;;  %v6351_v54 = vsel %vm1494_vm3, %v11887_v53, 0.0 }
 0xaa6   : > { %v6119_v25 = vpop.xlane.xlu1 %6118  ;;  %6352 = vadd.xlane.f32.xlu0 %v6351_v54  ;;  %v6152_v3 = vpop.xlane.xlu0 %6151 }
 0xaa7   : > { %8914 = vpow2.f32 %v6256_v50  ;;  %v6219_v20 = vsub.f32 %v11763_v13, %v6119_v25  ;;  %v6230_v1 = vsub.f32 %v11765_v37, %v6152_v3 }
 0xaa8   : > { %v11893_v23 = vpop.eup %8904  ;;  %8916 = vpow2.f32 %v6278_v43 }
 0xaa9   : > { %12634 = vst [vmem:[#allocation67_spill] sm:$0xff] %v11893_v23  ;;  %v6258_v48 = vmul.f32 1.442695, %v6219_v20  ;;  %v6280_v57 = vmul.f32 1.442695, %v6230_v1  ;;  %v6354_v46 = vsel %vm1494_vm3, %v11893_v23, 0.0 }
 0xaaa   : > { %v6122_v35 = vpop.xlane.xlu1 %6121  ;;  %6355 = vadd.xlane.f32.xlu0 %v6354_v46  ;;  %v6155_v45 = vpop.xlane.xlu0 %6154 }
 0xaab   : > { %8918 = vpow2.f32 %v6258_v48  ;;  %v6220_v32 = vsub.f32 %v11771_v29, %v6122_v35  ;;  %v6231_v39 = vsub.f32 %v11773_v61, %v6155_v45 }
 0xaac   : > { %v11899_v42 = vpop.eup %8906  ;;  %8920 = vpow2.f32 %v6280_v57 }
 0xaad   : > { %12635 = vst [vmem:[#allocation65_spill] sm:$0xff] %v11899_v42  ;;  %v11901_v13 = vpop.eup %8908  ;;  %v6260_v37 = vmul.f32 1.442695, %v6220_v32  ;;  %v6282_v51 = vmul.f32 1.442695, %v6231_v39  ;;  %v6324_v2 = vsel %vm1494_vm3, %v11899_v42, 0.0 }
 0xaae   : > { %12636 = vst [vmem:[#allocation66_spill] sm:$0xff] %v11901_v13  ;;  %v6125_v27 = vpop.xlane.xlu1 %6124  ;;  %6325 = vadd.xlane.f32.xlu1 %v6324_v2  ;;  %v6357_v63 = vsel %vm1494_vm3, %v11901_v13, 0.0 }
 0xaaf   : > { %8922 = vpow2.f32 %v6260_v37  ;;  %v6221_v29 = vsub.f32 %v11779_v56, %v6125_v27  ;;  %6358 = vadd.xlane.f32.xlu0 %v6357_v63 }
 0xab0   : > { %v11908_v61 = vpop.eup %8910  ;;  %8924 = vpow2.f32 %v6282_v51 }
 0xab1   : > { %12637 = vst [vmem:[#allocation71_spill] sm:$0xff] %v11908_v61  ;;  %v11910_v12 = vpop.eup %8912  ;;  %v6262_v41 = vmul.f32 1.442695, %v6221_v29  ;;  %v6327_v16 = vsel %vm1494_vm3, %v11908_v61, 0.0 }
 0xab2   : > { %6328 = vadd.xlane.f32.xlu1 %v6327_v16  ;;  %v6360_v5 = vsel %vm1494_vm3, %v11910_v12, 0.0  ;;  %v6128_v50 = vpop.xlane.xlu0 %6127 }
 0xab3   : > { %8926 = vpow2.f32 %v6262_v41  ;;  %6361 = vadd.xlane.f32.xlu0 %v6360_v5  ;;  %v6222_v43 = vsub.f32 %v11783_v28, %v6128_v50 }
 0xab4   : > { %v11917_v56 = vpop.eup %8914 }
 0xab5   : > { %v11919_v54 = vpop.eup %8916  ;;  %v6264_v25 = vmul.f32 1.442695, %v6222_v43  ;;  %v6330_v3 = vsel %vm1494_vm3, %v11917_v56, 0.0 }
 0xab6   : > { %6331 = vadd.xlane.f32.xlu1 %v6330_v3  ;;  %v6363_v20 = vsel %vm1494_vm3, %v11919_v54, 0.0  ;;  %v6158_v1 = vpop.xlane.xlu0 %6157 }
 0xab7   : > { %8928 = vpow2.f32 %v6264_v25  ;;  %6364 = vadd.xlane.f32.xlu0 %v6363_v20  ;;  %v6232_v48 = vsub.f32 %v11785_v47, %v6158_v1 }
 0xab8   : > { %v11926_v57 = vpop.eup %8918 }
 0xab9   : > { %v11928_v28 = vpop.eup %8920  ;;  %v6284_v46 = vmul.f32 1.442695, %v6232_v48  ;;  %v6333_v35 = vsel %vm1494_vm3, %v11926_v57, 0.0 }
 0xaba   : > { %v6134_v45 = vpop.xlane.xlu1 %6133  ;;  %6334 = vadd.xlane.f32.xlu1 %v6333_v35  ;;  %v6366_v32 = vsel %vm1494_vm3, %v11928_v28, 0.0  ;;  %v6131_v39 = vpop.xlane.xlu0 %6130 }
 0xabb   : > { %8930 = vpow2.f32 %v6284_v46  ;;  %v6224_v37 = vsub.f32 %v11793_v49, %v6134_v45  ;;  %6367 = vadd.xlane.f32.xlu0 %v6366_v32  ;;  %v6223_v47 = vsub.f32 %v11789_v59, %v6131_v39 }
 0xabc   : > { %v11936_v51 = vpop.eup %8922 }
 0xabd   : > { %v11938_v2 = vpop.eup %8924  ;;  %v6266_v27 = vmul.f32 1.442695, %v6223_v47  ;;  %v6336_v63 = vsel %vm1494_vm3, %v11936_v51, 0.0  ;;  %v6268_v29 = vmul.f32 1.442695, %v6224_v37 }
 0xabe   : > { %v11942_v41 = vpop.xlane.xlu1 %6163  ;;  %6337 = vadd.xlane.f32.xlu1 %v6336_v63  ;;  %v6369_v16 = vsel %vm1494_vm3, %v11938_v2, 0.0  ;;  %v6161_v5 = vpop.xlane.xlu0 %6160 }
 0xabf   : > { %6370 = vadd.xlane.f32.xlu0 %v6369_v16  ;;  %v6233_v49 = vsub.f32 %v11797_v60, %v6161_v5  ;;  %8932 = vpow2.f32 %v6266_v27 }
 0xac0   : > { %v11947_v59 = vpop.eup %8926  ;;  %8934 = vpow2.f32 %v6268_v29 }
 0xac1   : > { %v6286_v50 = vmul.f32 1.442695, %v6233_v49  ;;  %v6339_v43 = vsel %vm1494_vm3, %v11947_v59, 0.0 }
 0xac2   : > { %v11951_v25 = vpop.xlane.xlu1 %6166  ;;  %6340 = vadd.xlane.f32.xlu1 %v6339_v43  ;;  %v11953_v3 = vpop.xlane.xlu0 %6190 }
 0xac3   : > { %8936 = vpow2.f32 %v6286_v50 }
 0xac4   : > { %v11955_v20 = vpop.eup %8928 }
 0xac5   : > { %v6342_v1 = vsel %vm1494_vm3, %v11955_v20, 0.0 }
 0xac6   : > { %v11959_v60 = vpop.xlane.xlu1 %6169  ;;  %6343 = vadd.xlane.f32.xlu1 %v6342_v1  ;;  %v11961_v48 = vpop.xlane.xlu0 %6193 }
 0xac8   : > { %v11963_v46 = vpop.eup %8930 }
 0xac9   : > { %v6372_v35 = vsel %vm1494_vm3, %v11963_v46, 0.0 }
 0xaca   : > { %v11967_v45 = vpop.xlane.xlu1 %6172  ;;  %6373 = vadd.xlane.f32.xlu0 %v6372_v35  ;;  %v11969_v32 = vpop.xlane.xlu0 %6196 }
 0xacc   : > { %v11971_v39 = vpop.eup %8932 }
 0xacd   : > { %v6345_v47 = vsel %vm1494_vm3, %v11971_v39, 0.0  ;;  %v11979_v63 = vpop.eup %8934 }
 0xace   : > { %v11973_v37 = vpop.xlane.xlu1 %6175  ;;  %v11977_v27 = vpop.xlane.xlu0 %6199  ;;  %6346 = vadd.xlane.f32.xlu1 %v6345_v47  ;;  %v6348_v5 = vsel %vm1519_vm4, %v11979_v63, 0.0 }
 0xad0   : > { %v11981_v29 = vpop.eup %8936 }
 0xad1   : > { %v6375_v49 = vsel %vm1519_vm4, %v11981_v29, 0.0 }
 0xad2   : > { %v6179_v16 = vpop.xlane.xlu1 %6178  ;;  %v6203_v50 = vpop.xlane.xlu0 %6202  ;;  %6349 = vadd.xlane.f32.xlu1 %v6348_v5  ;;  %6376 = vadd.xlane.f32.xlu0 %v6375_v49 }
 0xad6   : > { %v6182_v43 = vpop.xlane.xlu1 %6181  ;;  %v6206_v1 = vpop.xlane.xlu0 %6205 }
 0xad7   : > { %v6240_v35 = vsub.f32 %v11849_v62, %v6182_v43  ;;  %v6248_v36 = vsub.f32 %v11845_v14, %v6206_v1 }
 0xad9   : > { %v6316_v15 = vmul.f32 1.442695, %v6248_v36  ;;  %v6300_v47 = vmul.f32 1.442695, %v6240_v35 }
 0xada   : > { %v6185_v34 = vpop.xlane.xlu1 %6184  ;;  %v6209_v19 = vpop.xlane.xlu0 %6208 }
 0xadb   : > { %v6241_v53 = vsub.f32 %v11857_v18, %v6185_v34  ;;  %v6249_v42 = vsub.f32 %v11853_v58, %v6209_v19  ;;  %8938 = vpow2.f32 %v6316_v15 }
 0xadc   : > { %8940 = vpow2.f32 %v6300_v47 }
 0xadd   : > { %v6318_v23 = vmul.f32 1.442695, %v6249_v42  ;;  %v6302_v61 = vmul.f32 1.442695, %v6241_v53 }
 0xade   : > { %v6188_v5 = vpop.xlane.xlu1 %6187  ;;  %v6212_v49 = vpop.xlane.xlu0 %6211 }
 0xadf   : > { %v6242_v13 = vsub.f32 %v11865_v44, %v6188_v5  ;;  %v6250_v62 = vsub.f32 %v11861_v38, %v6212_v49  ;;  %8942 = vpow2.f32 %v6318_v23  ;;  %v12638_v5 = vld [vmem:[#allocation3_spill] sm:$0xff]  ;;  %v12639_v49 = vld [vmem:[#allocation2_spill] sm:$0xff] }
 0xae0   : > { %8944 = vpow2.f32 %v6302_v61 }
 0xae1   : > { %v6320_v14 = vmul.f32 1.442695, %v6250_v62  ;;  %v6304_v36 = vmul.f32 1.442695, %v6242_v13  ;;  %v6239_v62 = vsub.f32 %v11841_v24, %v6179_v16 }
 0xae2   : > { %v6215_v43 = vpop.xlane.xlu0 %6214 }
 0xae3   : > { %v6251_v1 = vsub.f32 %v11869_v52, %v6215_v43  ;;  %8946 = vpow2.f32 %v6320_v14  ;;  %v6247_v14 = vsub.f32 %v11837_v22, %v6203_v50  ;;  %v6298_v43 = vmul.f32 1.442695, %v6239_v62 }
 0xae4   : > { %8948 = vpow2.f32 %v6304_v36  ;;  %v6245_v36 = vsub.f32 %v11821_v55, %v11969_v32  ;;  %v6243_v22 = vsub.f32 %v11805_v40, %v11953_v3  ;;  %v6237_v55 = vsub.f32 %v11825_v26, %v11967_v45 }
 0xae5   : > { %v6322_v34 = vmul.f32 1.442695, %v6251_v1  ;;  %v6238_v1 = vsub.f32 %v11833_v9, %v11973_v37  ;;  %v6235_v40 = vsub.f32 %v11809_v33, %v11951_v25  ;;  %v6234_v26 = vsub.f32 %v11801_v4, %v11942_v41 }
 0xae6   : > { %v6306_v32 = vmul.f32 1.442695, %v6243_v22 }
 0xae7   : > { %8950 = vpow2.f32 %v6322_v34  ;;  %v6314_v34 = vmul.f32 1.442695, %v6247_v14  ;;  %v6288_v25 = vmul.f32 1.442695, %v6234_v26 }
 0xae8   : > { %v11994_v19 = vpop.eup %8938  ;;  %8952 = vpow2.f32 %v6298_v43 }
 0xae9   : > { %v6420_v15 = vsel %vm1494_vm3, %v11994_v19, 0.0  ;;  %v11998_v58 = vpop.eup %8940  ;;  %8954 = vpow2.f32 %v6314_v34 }
 0xaea   : > { %6421 = vadd.xlane.f32.xlu0 %v6420_v15  ;;  %v6396_v38 = vsel %vm1494_vm3, %v11998_v58, 0.0  ;;  %v6244_v15 = vsub.f32 %v11813_v31, %v11961_v48  ;;  %v6236_v31 = vsub.f32 %v11817_v10, %v11959_v60  ;;  %v6294_v48 = vmul.f32 1.442695, %v6237_v55 }
 0xaec   : > { %v12000_v18 = vpop.eup %8942  ;;  %v6308_v24 = vmul.f32 1.442695, %v6244_v15  ;;  %v6292_v3 = vmul.f32 1.442695, %v6236_v31 }
 0xaed   : > { %v6423_v44 = vsel %vm1494_vm3, %v12000_v18, 0.0  ;;  %v12006_v52 = vpop.eup %8944 }
 0xaee   : > { %6397 = vadd.xlane.f32.xlu0 %v6396_v38  ;;  %6424 = vadd.xlane.f32.xlu1 %v6423_v44  ;;  %v6399_v23 = vsel %vm1494_vm3, %v12006_v52, 0.0  ;;  %v6310_v38 = vmul.f32 1.442695, %v6245_v36  ;;  %v6296_v44 = vmul.f32 1.442695, %v6238_v1 }
 0xaf0   : > { %v12008_v53 = vpop.eup %8946  ;;  %8956 = vpow2.f32 %v6310_v38 }
 0xaf1   : > { %v6426_v42 = vsel %vm1494_vm3, %v12008_v53, 0.0  ;;  %v12014_v13 = vpop.eup %8948  ;;  %8958 = vpow2.f32 %v6296_v44 }
 0xaf2   : > { %6400 = vadd.xlane.f32.xlu1 %v6399_v23  ;;  %6427 = vadd.xlane.f32.xlu0 %v6426_v42  ;;  %v6402_v47 = vsel %vm1519_vm4, %v12014_v13, 0.0  ;;  %v6246_v23 = vsub.f32 %v11829_v30, %v11977_v27  ;;  %8960 = vpow2.f32 %v6308_v24  ;;  %v6290_v27 = vmul.f32 1.442695, %v6235_v40 }
 0xaf4   : > { %v12016_v61 = vpop.eup %8950  ;;  %v6312_v9 = vmul.f32 1.442695, %v6246_v23 }
 0xaf5   : > { %v6429_v35 = vsel %vm1519_vm4, %v12016_v61, 0.0  ;;  %v12040_v30 = vpop.eup %8952 }
 0xaf6   : > { %6403 = vadd.xlane.f32.xlu1 %v6402_v47  ;;  %6430 = vadd.xlane.f32.xlu0 %v6429_v35  ;;  %8962 = vpow2.f32 %v6312_v9  ;;  %v12044_v37 = vpop.eup %8954  ;;  %v6393_v10 = vsel %vm1494_vm3, %v12040_v30, 0.0 }
 0xaf7   : > { %8964 = vpow2.f32 %v6306_v32  ;;  %v6417_v60 = vsel %vm1494_vm3, %v12044_v37, 0.0 }
 0xaf8   : > { %8966 = vpow2.f32 %v6294_v48 }
 0xaf9   : > { %8968 = vpow2.f32 %v6292_v3 }
 0xafa   : > { %8970 = vpow2.f32 %v6290_v27 }
 0xafb   : > { %8972 = vpow2.f32 %v6288_v25 }
 0xafd   : > { %v12048_v45 = vpop.eup %8956 }
 0xafe   : > { %v12054_v16 = vpop.eup %8958  ;;  %v6411_v41 = vsel %vm1494_vm3, %v12048_v45, 0.0 }
 0xaff   : > { %v12056_v33 = vpop.eup %8960  ;;  %v6390_v4 = vsel %vm1494_vm3, %v12054_v16, 0.0 }
 0xb03   : > { %v12062_v50 = vpop.eup %8962 }
 0xb04   : > { %v12066_v35 = vpop.eup %8964  ;;  %v6414_v47 = vsel %vm1494_vm3, %v12062_v50, 0.0 }
 0xb05   : > { %v6405_v43 = vsel %vm1494_vm3, %v12066_v35, 0.0 }
 0xb07   : > { %763 = vbcast.lane.b32.xlu1 %v12638_v5, 280  ;;  %v6408_v5 = vsel %vm1494_vm3, %v12056_v33, 0.0 }
 0xb0c   : > { %744 = vbcast.lane.b32.xlu0 %v12639_v49, 280  ;;  %v12072_v49 = vpop.eup %8966 }
 0xb0d   : > { %v6387_v36 = vsel %vm1494_vm3, %v12072_v49, 0.0  ;;  %v12082_v1 = vpop.eup %8968 }
 0xb0e   : > { %v6384_v15 = vsel %vm1494_vm3, %v12082_v1, 0.0  ;;  %v12088_v38 = vpop.eup %8970 }
 0xb0f   : > { %v6381_v22 = vsel %vm1494_vm3, %v12088_v38, 0.0  ;;  %v12092_v24 = vpop.eup %8972 }
 0xb10   : > { %v6378_v32 = vsel %vm1494_vm3, %v12092_v24, 0.0 }
 0xb2b   : > { %6394 = vadd.xlane.f32.xlu1 %v6393_v10  ;;  %6418 = vadd.xlane.f32.xlu0 %v6417_v60  ;;  %v9058_v10 = vmov 32  }
 0xb2c   : > { %8469 = vset.pattern.permute.xlu0 %v9058_v10 }
 0xb2f   : > { %6391 = vadd.xlane.f32.xlu1 %v6390_v4  ;;  %6412 = vadd.xlane.f32.xlu0 %v6411_v41  ;;  %v12064_v42 = vpop.xlane.xlu0 %6352  ;;  %v9046_v4 = vld [vmem:[%s12257_s2] sm:$0x3] }
 0xb33   : > { %6415 = vadd.xlane.f32.xlu1 %v6414_v47  ;;  %6409 = vadd.xlane.f32.xlu0 %v6408_v5  ;;  %v12074_v62 = vpop.xlane.xlu0 %6355 }
 0xb37   : > { %v12076_v14 = vpop.xlane.xlu1 %6325  ;;  %6388 = vadd.xlane.f32.xlu1 %v6387_v36  ;;  %6406 = vadd.xlane.f32.xlu0 %v6405_v43 }
 0xb38   : > { %v6359_v44 = vpop.xlane.xlu0 %6358 }
 0xb3b   : > { %v12084_v34 = vpop.xlane.xlu1 %6328  ;;  %6385 = vadd.xlane.f32.xlu1 %v6384_v15 }
 0xb3c   : > { %v6362_v55 = vpop.xlane.xlu0 %6361 }
 0xb3f   : > { %v6332_v23 = vpop.xlane.xlu1 %6331  ;;  %6382 = vadd.xlane.f32.xlu1 %v6381_v22 }
 0xb40   : > { %v6365_v31 = vpop.xlane.xlu0 %6364 }
 0xb43   : > { %v6335_v9 = vpop.xlane.xlu1 %6334  ;;  %6379 = vadd.xlane.f32.xlu1 %v6378_v32 }
 0xb44   : > { %v6368_v40 = vpop.xlane.xlu0 %6367 }
 0xb47   : > { %v6338_v48 = vpop.xlane.xlu1 %6337 }
 0xb48   : > { %v6371_v26 = vpop.xlane.xlu0 %6370 }
 0xb4b   : > { %v6341_v3 = vpop.xlane.xlu1 %6340 }
 0xb4d   : > { %6938 = vperm.xlu0 %8469, %v9046_v4  }
 0xb4f   : > { %v6344_v27 = vpop.xlane.xlu1 %6343 }
 0xb53   : > { %v6374_v60 = vpop.xlane.xlu0 %6373 }
 0xb57   : > { %v6347_v25 = vpop.xlane.xlu1 %6346 }
 0xb5b   : > { %v6350_v41 = vpop.xlane.xlu1 %6349  ;;  %v6377_v47 = vpop.xlane.xlu0 %6376 }
 0xb5c   : > { %8974 = vrcp.f32 %v6350_v41  ;;  %v726_v41 = vadd.f32 %v11878_v6, %v11722_v21  ;;  %v12640_v21 = vld [vmem:[#allocation66_spill] sm:$0xff] }
 0xb5d   : > { %8976 = vrcp.f32 %v6377_v47 }
 0xb5e   : > { %8978 = vrcp.f32 %v6347_v25 }
 0xb5f   : > { %8980 = vrcp.f32 %v6374_v60 }
 0xb60   : > { %8982 = vrcp.f32 %v6344_v27 }
 0xb61   : > { %8984 = vrcp.f32 %v6371_v26 }
 0xb62   : > { %8986 = vrcp.f32 %v6341_v3 }
 0xb63   : > { %8988 = vrcp.f32 %v6368_v40 }
 0xb64   : > { %8990 = vrcp.f32 %v6338_v48 }
 0xb65   : > { %8992 = vrcp.f32 %v6365_v31 }
 0xb66   : > { %8994 = vrcp.f32 %v6335_v9 }
 0xb67   : > { %8996 = vrcp.f32 %v6362_v55 }
 0xb68   : > { %8998 = vrcp.f32 %v6332_v23 }
 0xb69   : > { %v8975_v5 = vpop.eup %8974  ;;  %9000 = vrcp.f32 %v6359_v44 }
 0xb6a   : > { %v8977_v36 = vpop.eup %8976  ;;  %v6476_v43 = vmul.f32 %v8975_v5, %v11979_v63  ;;  %9002 = vrcp.f32 %v12084_v34 }
 0xb6b   : > { %v8979_v15 = vpop.eup %8978  ;;  %v6485_v22 = vmul.f32 %v8977_v36, %v11981_v29  ;;  %9004 = vrcp.f32 %v12074_v62 }
 0xb6c   : > { %v8981_v32 = vpop.eup %8980  ;;  %8374 = vmatpush3.xpose.msk.msra.mxu0 %vm1494_vm3, %v6476_v43  ;;  %v6475_v40 = vmul.f32 %v8979_v15, %v11971_v39  ;;  %9006 = vrcp.f32 %v12076_v14 }
 0xb6d   : > { %8395 = vmatpush3.xpose.msk.msra.mxu1 %vm1494_vm3, %v6485_v22  ;;  %8375 = vmatprep.subr.mxu0 %v12603_v11  ;;  %v8983_v3 = vpop.eup %8982  ;;  %v6484_v63 = vmul.f32 %v8981_v32, %v11963_v46  ;;  %9008 = vrcp.f32 %v12064_v42 }
 0xb6e   : > { %8396 = vmatprep.subr.mxu1 %v12603_v11  ;;  %v8985_v48 = vpop.eup %8984  ;;  %v6474_v29 = vmul.f32 %v8983_v3, %v11955_v20 }
 0xb6f   : > { %v8987_v9 = vpop.eup %8986  ;;  %v6483_v39 = vmul.f32 %v8985_v48, %v11938_v2 }
 0xb70   : > { %8376 = vmatpush3.xpose.msk.msra.mxu0 %vm1494_vm3, %v6475_v40  ;;  %v8989_v55 = vpop.eup %8988  ;;  %v6473_v46 = vmul.f32 %v8987_v9, %v11947_v59 }
 0xb71   : > { %8397 = vmatpush3.xpose.msk.msra.mxu1 %vm1494_vm3, %v6484_v63  ;;  %8377 = vmatprep.subr.mxu0 %v12603_v11  ;;  %v8991_v20 = vpop.eup %8990  ;;  %v6482_v2 = vmul.f32 %v8989_v55, %v11928_v28 }
 0xb72   : > { %8398 = vmatprep.subr.mxu1 %v12603_v11  ;;  %v8993_v26 = vpop.eup %8992  ;;  %v6472_v59 = vmul.f32 %v8991_v20, %v11936_v51  ;;  %v12643_v20 = vld [vmem:[#allocation65_spill] sm:$0xff] }
 0xb73   : > { %v12112_v31 = vpop.xlane.xlu0 %6421  ;;  %v8995_v34 = vpop.eup %8994  ;;  %v6481_v28 = vmul.f32 %v8993_v26, %v11919_v54  ;;  %v702_v54 = vadd.f32 %v11878_v6, %v11720_v17 }
 0xb74   : > { %8378 = vmatpush3.xpose.msk.msra.mxu0 %vm1494_vm3, %v6474_v29  ;;  %v8997_v10 = vpop.eup %8996  ;;  %v6471_v14 = vmul.f32 %v8995_v34, %v11926_v57  ;;  %v690_v57 = vadd.f32 %v11875_v0, %v11727_v8  ;;  %v12642_v29 = vld [vmem:[#allocation67_spill] sm:$0xff]  ;;  %v12644_v34 = vld [vmem:[#allocation28_spill] sm:$0xff] }
 0xb75   : > { %8399 = vmatpush3.xpose.msk.msra.mxu1 %vm1494_vm3, %v6483_v39  ;;  %8379 = vmatprep.subr.mxu0 %v12603_v11  ;;  %v8999_v60 = vpop.eup %8998  ;;  %v6480_v42 = vmul.f32 %v8997_v10, %v11910_v12  ;;  %v714_v12 = vadd.f32 %v11875_v0, %v11729_v7  ;;  %v12641_v0 = vld [vmem:[#allocation71_spill] sm:$0xff] }
 0xb76   : > { %8400 = vmatprep.subr.mxu1 %v12603_v11  ;;  %v9001_v4 = vpop.eup %9000  ;;  %v6470_v47 = vmul.f32 %v8999_v60, %v11917_v56 }
 0xb77   : > { %v6425_v44 = vpop.xlane.xlu1 %6424  ;;  %v12122_v23 = vpop.xlane.xlu0 %6397  ;;  %v6479_v6 = vmul.f32 %v9001_v4, %v12640_v21 }
 0xb78   : > { %8380 = vmatpush3.xpose.msk.msra.mxu0 %vm1494_vm3, %v6473_v46  ;;  %v9003_v17 = vpop.eup %9002 }
 0xb79   : > { %8401 = vmatpush3.xpose.msk.msra.mxu1 %vm1494_vm3, %v6482_v2  ;;  %8381 = vmatprep.subr.mxu0 %v12603_v11  ;;  %v9005_v43 = vpop.eup %9004  ;;  %v6469_v56 = vmul.f32 %v9003_v17, %v12641_v0 }
 0xb7a   : > { %8402 = vmatprep.subr.mxu1 %v12603_v11  ;;  %v9007_v3 = vpop.eup %9006  ;;  %v6478_v9 = vmul.f32 %v9005_v43, %v12642_v29 }
 0xb7b   : > { %v6401_v62 = vpop.xlane.xlu1 %6400  ;;  %v6428_v27 = vpop.xlane.xlu0 %6427  ;;  %v6468_v2 = vmul.f32 %v9007_v3, %v12643_v20 }
 0xb7c   : > { %8382 = vmatpush3.xpose.msk.msra.mxu0 %vm1494_vm3, %v6472_v59  ;;  %v9009_v39 = vpop.eup %9008 }
 0xb7d   : > { %8403 = vmatpush3.xpose.msk.msra.mxu1 %vm1494_vm3, %v6481_v28  ;;  %8383 = vmatprep.subr.mxu0 %v12603_v11 }
 0xb7e   : > { %8404 = vmatprep.subr.mxu1 %v12603_v11 }
 0xb7f   : > { %v6404_v51 = vpop.xlane.xlu1 %6403  ;;  %v6431_v25 = vpop.xlane.xlu0 %6430 }
 0xb80   : > { %8384 = vmatpush3.xpose.msk.msra.mxu0 %vm1494_vm3, %v6471_v14  ;;  %9010 = vrcp.f32 %v6404_v51 }
 0xb81   : > { %8405 = vmatpush3.xpose.msk.msra.mxu1 %vm1494_vm3, %v6480_v42  ;;  %8385 = vmatprep.subr.mxu0 %v12603_v11  ;;  %9012 = vrcp.f32 %v6431_v25 }
 0xb82   : > { %8406 = vmatprep.subr.mxu1 %v12603_v11  ;;  %9014 = vrcp.f32 %v6401_v62  ;;  %v6477_v62 = vmul.f32 %v9009_v39, %v12644_v34 }
 0xb83   : > { %v764_v5 = vpop.permute.xlu1 %763  ;;  %v745_v36 = vpop.permute.xlu0 %744  ;;  %9016 = vrcp.f32 %v6428_v27 }
 0xb84   : > { %v772_v15 = vmul.f32 %v764_v5, %v702_v54  ;;  %v12153_v22 = vmul.f32 %v764_v5, %v726_v41  ;;  %v768_v32 = vmul.f32 %v745_v36, %v690_v57  ;;  %v12155_v40 = vmul.f32 %v745_v36, %v714_v12  ;;  %8386 = vmatpush3.xpose.msk.msra.mxu0 %vm1494_vm3, %v6470_v47 }
 0xb85   : > { %8407 = vmatpush3.xpose.msk.msra.mxu1 %vm1494_vm3, %v6479_v6  ;;  %8387 = vmatprep.subr.mxu0 %v12603_v11  ;;  %9018 = vrcp.f32 %v6425_v44 }
 0xb86   : > { %v6511_v8 = vsel %vm1494_vm3, %v772_v15, 0.0  ;;  %v6504_v7 = vsel %vm1494_vm3, %v768_v32, 0.0  ;;  %8408 = vmatprep.subr.mxu1 %v12603_v11  ;;  %9020 = vrcp.f32 %v12122_v23  ;;  %v6518_v3 = vsel %vm1494_vm3, %v12155_v40, 0.0 }
 0xb87   : > { %v6512_v63 = vrot.slane %v6511_v8, 4  ;;  %v6505_v48 = vrot.slane %v6504_v7, 4  ;;  %9022 = vrcp.f32 %v12112_v31 }
 0xb88   : > { %8388 = vmatpush3.xpose.msk.msra.mxu0 %vm1494_vm3, %v6469_v56 }
 0xb89   : > { %v6513_v55 = vadd.f32 %v6512_v63, %v6511_v8  ;;  %v6506_v46 = vadd.f32 %v6505_v48, %v6504_v7  ;;  %8409 = vmatpush3.xpose.msk.msra.mxu1 %vm1494_vm3, %v6478_v9  ;;  %8389 = vmatprep.subr.mxu0 %v12603_v11  ;;  %v6519_v48 = vrot.slane %v6518_v3, 4 }
 0xb8a   : > { %8410 = vmatprep.subr.mxu1 %v12603_v11 }
 0xb8b   : > { %v6514_v26 = vrot.slane %v6513_v55, 2  ;;  %v6507_v59 = vrot.slane %v6506_v46, 2 }
 0xb8c   : > { %8390 = vmatpush3.xpose.msk.msra.mxu0 %vm1494_vm3, %v6468_v2 }
 0xb8d   : > { %v6515_v27 = vadd.f32 %v6514_v26, %v6513_v55  ;;  %v6508_v44 = vadd.f32 %v6507_v59, %v6506_v46  ;;  %8411 = vmatpush3.xpose.msk.msra.mxu1 %vm1494_vm3, %v6477_v62  ;;  %v9011_v28 = vpop.eup %9010  ;;  %8415 = vmatprep.subr.mxu0 %v12603_v11  ;;  %v6520_v55 = vadd.f32 %v6519_v48, %v6518_v3 }
 0xb8e   : > { %8436 = vmatprep.subr.mxu1 %v12603_v11  ;;  %v9013_v23 = vpop.eup %9012  ;;  %v6494_v42 = vmul.f32 %v9011_v28, %v12014_v13 }
 0xb8f   : > { %v6516_v10 = vrot.slane %v6515_v27, 1  ;;  %v6509_v14 = vrot.slane %v6508_v44, 1  ;;  %v9015_v25 = vpop.eup %9014  ;;  %v6503_v4 = vmul.f32 %v9013_v23, %v12016_v61  ;;  %v6521_v59 = vrot.slane %v6520_v55, 2 }
 0xb90   : > { %v9017_v54 = vpop.eup %9016  ;;  %v6493_v41 = vmul.f32 %v9015_v25, %v12006_v52 }
 0xb91   : > { %v6517_v60 = vadd.f32 %v6516_v10, %v6515_v27  ;;  %v6510_v51 = vadd.f32 %v6509_v14, %v6508_v44  ;;  %v6502_v13 = vmul.f32 %v9017_v54, %v12008_v53  ;;  %v6522_v44 = vadd.f32 %v6521_v59, %v6520_v55  ;;  %v12646_v54 = vld [vmem:[#allocation16_spill] sm:$0xff] }
 0xb92   : > { %v9019_v31 = vpop.eup %9018 }
 0xb93   : > { %8392 = vmatmul.mubr.msk.f32.vlgmr.msra.gmra.mxu0 %vm1494_vm3, %v6510_v51  ;;  %8413 = vmatmul.mubr.msk.f32.vlgmr.msra.gmra.mxu1 %vm1494_vm3, %v6517_v60  ;;  %v9021_v61 = vpop.eup %9020  ;;  %v6501_v52 = vmul.f32 %v9019_v31, %v12000_v18  ;;  %v6523_v10 = vrot.slane %v6522_v44, 1 }
 0xb94   : > { %8416 = vmatpush3.xpose.msk.msra.mxu0 %vm1494_vm3, %v6494_v42  ;;  %8437 = vmatpush3.xpose.msk.msra.mxu1 %vm1494_vm3, %v6503_v4  ;;  %v6492_v57 = vmul.f32 %v9021_v61, %v11998_v58  ;;  %v9023_v53 = vpop.eup %9022  ;;  %v12645_v42 = vld [vmem:[#allocation62_spill] sm:$0xff] }
 0xb95   : > { %8417 = vmatprep.subr.mxu0 %v12603_v11  ;;  %8438 = vmatprep.subr.mxu1 %v12603_v11  ;;  %v6500_v12 = vmul.f32 %v9023_v53, %v11994_v19  ;;  %v6525_v19 = vsel %vm1494_vm3, %v12153_v22, 0.0  ;;  %v6524_v60 = vadd.f32 %v6523_v10, %v6522_v44  ;;  %v12647_v53 = vld [vmem:[#allocation30_spill] sm:$0xff] }
 0xb96   : > { %8454 = vmatprep.mubr.msk.f32.mxu1 %vm9056_vm0, %v12603_v11  ;;  %8433 = vmatprep.mubr.msk.f32.mxu0 %vm9056_vm0, %v12603_v11  ;;  %v6526_v56 = vrot.slane %v6525_v19, 4 }
 0xb98   : > { %8418 = vmatpush3.xpose.msk.msra.mxu0 %vm1494_vm3, %v6493_v41  ;;  %8439 = vmatpush3.xpose.msk.msra.mxu1 %vm1494_vm3, %v6502_v13  ;;  %v6527_v63 = vadd.f32 %v6526_v56, %v6525_v19 }
 0xb99   : > { %8419 = vmatprep.subr.mxu0 %v12603_v11  ;;  %8440 = vmatprep.subr.mxu1 %v12603_v11 }
 0xb9c   : > { %8420 = vmatpush3.xpose.msk.msra.mxu0 %vm1494_vm3, %v6492_v57  ;;  %8441 = vmatpush3.xpose.msk.msra.mxu1 %vm1494_vm3, %v6501_v52 }
 0xb9d   : > { %8442 = vmatprep.subr.mxu1 %v12603_v11  ;;  %8421 = vmatprep.subr.mxu0 %v12603_v11 }
 0xba0   : > { %8443 = vmatpush3.xpose.msk.msra.mxu1 %vm1494_vm3, %v6500_v12 }
 0xba1   : > { %8444 = vmatprep.subr.mxu1 %v12603_v11 }
 0xbb4   : > { %v6395_v47 = vpop.xlane.xlu1 %6394  ;;  %v6419_v17 = vpop.xlane.xlu0 %6418 }
 0xbb5   : > { %9024 = vrcp.f32 %v6395_v47 }
 0xbb6   : > { %9026 = vrcp.f32 %v6419_v17 }
 0xbb8   : > { %v6392_v58 = vpop.xlane.xlu1 %6391  ;;  %v6413_v18 = vpop.xlane.xlu0 %6412 }
 0xbb9   : > { %9028 = vrcp.f32 %v6392_v58 }
 0xbbc   : > { %v6416_v5 = vpop.xlane.xlu1 %6415  ;;  %v6410_v36 = vpop.xlane.xlu0 %6409 }
 0xbbd   : > { %9030 = vrcp.f32 %v6416_v5 }
 0xbbe   : > { %9032 = vrcp.f32 %v6413_v18  ;;  %v12648_v18 = vld [vmem:[#allocation59_spill] sm:$0xff] }
 0xbc0   : > { %v6389_v21 = vpop.xlane.xlu1 %6388  ;;  %v6407_v32 = vpop.xlane.xlu0 %6406 }
 0xbc1   : > { %9034 = vrcp.f32 %v6389_v21 }
 0xbc2   : > { %v9025_v6 = vpop.eup %9024  ;;  %9036 = vrcp.f32 %v6410_v36 }
 0xbc3   : > { %v9027_v43 = vpop.eup %9026  ;;  %v6491_v15 = vmul.f32 %v9025_v6, %v12040_v30 }
 0xbc4   : > { %v6386_v8 = vpop.xlane.xlu1 %6385  ;;  %v6499_v7 = vmul.f32 %v9027_v43, %v12044_v37 }
 0xbc5   : > { %9038 = vrcp.f32 %v6386_v8  ;;  %8422 = vmatpush3.xpose.msk.msra.mxu0 %vm1494_vm3, %v6491_v15 }
 0xbc6   : > { %v9029_v0 = vpop.eup %9028  ;;  %8445 = vmatpush3.xpose.msk.msra.mxu1 %vm1494_vm3, %v6499_v7  ;;  %8423 = vmatprep.subr.mxu0 %v12603_v11  ;;  %9040 = vrcp.f32 %v6407_v32 }
 0xbc7   : > { %v6490_v22 = vmul.f32 %v9029_v0, %v12054_v16  ;;  %8446 = vmatprep.subr.mxu1 %v12603_v11  ;;  %v6528_v16 = vrot.slane %v6527_v63, 2 }
 0xbc8   : > { %v6383_v30 = vpop.xlane.xlu1 %6382 }
 0xbc9   : > { %9042 = vrcp.f32 %v6383_v30  ;;  %8424 = vmatpush3.xpose.msk.msra.mxu0 %vm1494_vm3, %v6490_v22  ;;  %v6529_v26 = vadd.f32 %v6528_v16, %v6527_v63 }
 0xbca   : > { %v9031_v37 = vpop.eup %9030  ;;  %8425 = vmatprep.subr.mxu0 %v12603_v11 }
 0xbcb   : > { %v6498_v29 = vmul.f32 %v9031_v37, %v12062_v50  ;;  %v9033_v9 = vpop.eup %9032 }
 0xbcc   : > { %v6380_v39 = vpop.xlane.xlu1 %6379  ;;  %v6497_v20 = vmul.f32 %v9033_v9, %v12048_v45 }
 0xbcd   : > { %9044 = vrcp.f32 %v6380_v39  ;;  %8447 = vmatpush3.xpose.msk.msra.mxu1 %vm1494_vm3, %v6498_v29 }
 0xbce   : > { %v9035_v40 = vpop.eup %9034  ;;  %8448 = vmatprep.subr.mxu1 %v12603_v11 }
 0xbcf   : > { %v6489_v46 = vmul.f32 %v9035_v40, %v12072_v49  ;;  %v9037_v2 = vpop.eup %9036  ;;  %v6530_v49 = vrot.slane %v6529_v26, 1 }
 0xbd0   : > { %v6496_v62 = vmul.f32 %v9037_v2, %v12056_v33 }
 0xbd1   : > { %8426 = vmatpush3.xpose.msk.msra.mxu0 %vm1494_vm3, %v6489_v46  ;;  %8449 = vmatpush3.xpose.msk.msra.mxu1 %vm1494_vm3, %v6497_v20 }
 0xbd2   : > { %v9039_v50 = vpop.eup %9038  ;;  %8427 = vmatprep.subr.mxu0 %v12603_v11  ;;  %8450 = vmatprep.subr.mxu1 %v12603_v11 }
 0xbd3   : > { %v6488_v34 = vmul.f32 %v9039_v50, %v12082_v1  ;;  %v9041_v27 = vpop.eup %9040  ;;  %v6531_v1 = vadd.f32 %v6530_v49, %v6529_v26 }
 0xbd4   : > { %v6495_v23 = vmul.f32 %v9041_v27, %v12066_v35  ;;  %v6939_v35 = vpop.permute.xlu0 %6938 }
 0xbd5   : > { %8428 = vmatpush3.xpose.msk.msra.mxu0 %vm1494_vm3, %v6488_v34  ;;  %8451 = vmatpush3.xpose.msk.msra.mxu1 %vm1494_vm3, %v6496_v62 }
 0xbd6   : > { %v9043_v45 = vpop.eup %9042  ;;  %8429 = vmatprep.subr.mxu0 %v12603_v11  ;;  %8452 = vmatprep.subr.mxu1 %v12603_v11 }
 0xbd7   : > { %v6487_v28 = vmul.f32 %v9043_v45, %v12088_v38  ;;  %v6940_v38 = vrot.slane %v6939_v35, 1 }
 0xbd9   : > { %8430 = vmatpush3.xpose.msk.msra.mxu0 %vm1494_vm3, %v6487_v28  ;;  %8453 = vmatpush3.xpose.msk.msra.mxu1 %vm1494_vm3, %v6495_v23 }
 0xbda   : > { %v9045_v33 = vpop.eup %9044  ;;  %8431 = vmatprep.subr.mxu0 %v12603_v11 }
 0xbdb   : > { %v6486_v14 = vmul.f32 %v9045_v33, %v12092_v24 }
 0xbdc   : > { %8455 = vmatmul.mubr.msk.f32.vlgmr.msra.gmra.mxu1 %vm1494_vm3, %v6531_v1 }
 0xbdd   : > { %8432 = vmatpush3.xpose.msk.msra.mxu0 %vm1494_vm3, %v6486_v14 }
 0xbe0   : > { %8434 = vmatmul.mubr.msk.f32.vlgmr.msra.gmra.mxu0 %vm1494_vm3, %v6524_v60 }
 0xc53   : > { %v6628_v51 = vpop.f32.mrf.mxu0  ;;  %v6728_v25 = vpop.f32.mrf.mxu1 }
 0xc54   : > { %v6932_v4 = vadd.f32 %v6628_v51, %v12645_v42  ;;  %v6933_v31 = vadd.f32 %v6728_v25, %v12646_v54 }
 0xc55   : > { %v8393_v41 = vpop.f32.mrf.mxu0  ;;  %v8414_v11 = vpop.f32.mrf.mxu1 }
 0xc56   : > { %v6944_v13 = vadd.f32 %v6940_v38, %v6933_v31  ;;  %v6943_v24 = vadd.f32 %v6939_v35, %v6932_v4 }
 0xc58   : > { %v6951_v61 = vrot.slane %v6944_v13, 7 }
 0xc5a   : > { %v6953_v57 = vsel %vm6952_vm5, %v6951_v61, %v6943_v24 }
 0xc5b   : > { %6959 = vst.msk [vmem:[%s172_s4] sm:$0x3] %vm6958_vm6, %v6953_v57 }
 0xc9c   : > { %v6928_v52 = vpop.f32.mrf.mxu1 }
 0xc9d   : > { %v6935_v12 = vadd.f32 %v6928_v52, %v12647_v53 }
 0xc9e   : > { %v8456_v47 = vpop.f32.mrf.mxu1 }
 0xc9f   : > { %v6946_v17 = vadd.f32 %v6940_v38, %v6935_v12 }
 0xca0   : > { %v6828_v58 = vpop.f32.mrf.mxu0 }
 0xca1   : > { %v6934_v5 = vadd.f32 %v6828_v58, %v12648_v18  ;;  %v6954_v21 = vrot.slane %v6946_v17, 7 }
 0xca2   : > { %v8435_v36 = vpop.f32.mrf.mxu0 }
 0xca3   : > { %v6945_v6 = vadd.f32 %v6939_v35, %v6934_v5 }
 0xca5   : > { %v6955_v43 = vsel %vm6952_vm5, %v6954_v21, %v6945_v6 }
 0xca6   : > { %6960 = vst.msk [vmem:[%s172_s4 + $0x2] sm:$0x3] %vm6958_vm6, %v6955_v43 }
 0xca7 PF: > { %s13_s12 = sadd.s32 1, %s9053_s12  }
 0xca8   : > { %p10_p4 = scmp.ge.s32.totalorder %s13_s12, 4  }
 0xcaa   :  { %12 = sbr.rel (!%p10_p4) target bundleno = 1 (0x1), region = 64 }

</bundles_post_ra>
